<compile_context>
chip_gen: v7x
topology: tpu7x:2x2x1
jax: 0.10.0
libtpu: 0.0.40
codegen_flags: <defaults>
</compile_context>

<pallas_src>
import jax
import jax.numpy as jnp
from jax.experimental import pallas as pl
from jax.experimental.pallas import tpu as pltpu

# ----------------------------------------------------------------------------
# Model constants
# ----------------------------------------------------------------------------
C1, C2 = 10, 20            # conv channel counts
KH, KW = 5, 5
IN_H, IN_W = 28, 28
OH1, OW1 = 24, 24          # conv1 output spatial
PH1, PW1 = 12, 12          # after pool1
OH2, OW2 = 8, 8            # conv2 output spatial
PH2, PW2 = 4, 4            # after pool2
FC1_N, N_CLS = 150, 47
TILE_B = 8                 # images per grid step

W1L = OW1 * C1             # 240: conv1 fused (W, C) lane width
H1L = (2 * PW1 - 1) * C1   # 230: pooled-1 lane width (valid data at even C1-chunks)
W2L = OW2 * C2             # 160
H2L = (2 * PW2 - 1) * C2   # 140


# ----------------------------------------------------------------------------
# The fused Pallas kernel (one grid step = TILE_B images)
# ----------------------------------------------------------------------------
def _enet_kernel(x_ref, t1_ref, b1_ref, t2_ref, b2_ref,
                 fw1_ref, fb1_ref, fw2_ref, fb2_ref, o_ref):
    tb = x_ref.shape[1]
    x = x_ref[...]                                           # (28, TB, 28)

    # ---- conv1: five banded MXU matmuls contracting the W axis -------------
    y1 = jnp.zeros((OH1 * tb, W1L), jnp.float32)
    for ki in range(KH):
        slab = x[ki:ki + OH1].reshape(OH1 * tb, IN_W)        # (24*TB, 28)
        y1 = y1 + jnp.dot(slab, t1_ref[ki],
                          preferred_element_type=jnp.float32)
    y1 = y1 + b1_ref[...]                                    # rows=(oh,b), lanes=(ow,c)

    # ---- maxpool 2x2 + relu (pool-then-relu, as in the reference module) ---
    y1 = y1.reshape(PH1, 2, tb, W1L)
    hp = jnp.maximum(y1[:, 0], y1[:, 1])                     # H-pool: (12, TB, 240)
    h1 = jnp.maximum(hp[..., :H1L], hp[..., C1:])            # W-pool: (12, TB, 230)
    h1 = jnp.maximum(h1, 0.0)                                # valid data at even C1-chunks

    # ---- conv2: five banded matmuls contracting the fused (W, C1) axis -----
    # (odd-chunk junk lanes hit all-zero rows of t2, so they contribute 0.)
    y2 = jnp.zeros((OH2 * tb, W2L), jnp.float32)
    for ki in range(KH):
        slab = h1[ki:ki + OH2].reshape(OH2 * tb, H1L)        # (8*TB, 230)
        y2 = y2 + jnp.dot(slab, t2_ref[ki],
                          preferred_element_type=jnp.float32)
    y2 = y2 + b2_ref[...]                                    # rows=(oh,b), lanes=(ow,c)
    # conv2_drop (Dropout2d) is identity in eval mode.

    # ---- maxpool 2x2 + relu -------------------------------------------------
    y2 = y2.reshape(PH2, 2, tb, W2L)
    hp2 = jnp.maximum(y2[:, 0], y2[:, 1])                    # (4, TB, 160)
    h2 = jnp.maximum(hp2[..., :H2L], hp2[..., C2:])          # (4, TB, 140)
    h2 = jnp.maximum(h2, 0.0)

    # ---- fc1 + relu ---------------------------------------------------------
    # The NCHW `x.view(-1, 320)` permutation and the even-W-chunk selection
    # are both folded into fw1's row layout at prepare time.
    z1 = jnp.zeros((tb, FC1_N), jnp.float32) + fb1_ref[...]
    for h in range(PH2):
        z1 = z1 + jnp.dot(h2[h], fw1_ref[h],
                          preferred_element_type=jnp.float32)
    z1 = jnp.maximum(z1, 0.0)
    # F.dropout is identity in eval mode.

    # ---- fc2 + log_softmax --------------------------------------------------
    z2 = jnp.dot(z1, fw2_ref[...],
                 preferred_element_type=jnp.float32) + fb2_ref[...]
    m = jnp.max(z2, axis=-1, keepdims=True)
    e = z2 - m
    lse = jnp.log(jnp.sum(jnp.exp(e), axis=-1, keepdims=True))
    o_ref[...] = (e - lse).astype(o_ref.dtype)


# ----------------------------------------------------------------------------
# One-time weight layout preparation (plain JAX, outside the kernel)
# ----------------------------------------------------------------------------
def _band_weights(w, in_cols, col_stride, out_w):
    """Toeplitz-expand a (Cout, Cin, KH, KW) conv kernel into KH banded
    matrices of shape ((in_cols-1)*col_stride + Cin, out_w*Cout).

    The input activation for spatial column j, channel c is expected at lane
    j*col_stride + c.  Lanes not of that form (pooling junk) get zero rows.
    """
    cout, cin, kh, kw = w.shape
    wk = jnp.transpose(w, (2, 3, 1, 0))                       # (kh, kw, cin, cout)
    ji = jnp.arange(in_cols)[:, None]
    ow = jnp.arange(out_w)[None, :]
    kj = ji - ow                                              # (in_cols, out_w)
    valid = (kj >= 0) & (kj < kw)
    kj_c = jnp.clip(kj, 0, kw - 1)
    dense = wk[:, kj_c]                                       # (kh, in_cols, out_w, cin, cout)
    dense = dense * valid[None, :, :, None, None].astype(w.dtype)
    dense = jnp.transpose(dense, (0, 1, 3, 2, 4))             # (kh, in_cols, cin, out_w, cout)
    total = (in_cols - 1) * col_stride + cin
    t = jnp.zeros((kh, in_cols, col_stride, out_w, cout), w.dtype)
    t = t.at[:, :, :cin].set(dense)
    return t.reshape(kh, in_cols * col_stride, out_w * cout)[:, :total]


def prepare_params(p):
    """PyTorch-layout params -> kernel operands (done once, weights only)."""
    t1 = _band_weights(p["conv1_w"], IN_W, 1, OW1)            # (5, 28, 240)
    t2 = _band_weights(p["conv2_w"], PW1, 2 * C1, OW2)        # (5, 230, 160)
    b1 = jnp.tile(p["conv1_b"], OW1)[None, :]                 # (1, 240)
    b2 = jnp.tile(p["conv2_b"], OW2)[None, :]                 # (1, 160)
    # fc1: fold the NCHW flatten order (c, h, w) and the even-W-chunk gather.
    w = p["fc1_w"].reshape(FC1_N, C2, PH2, PW2)               # [n, c, h, w]
    w = jnp.transpose(w, (2, 3, 1, 0))                        # [h, w, c, n]
    fw1 = jnp.zeros((PH2, PW2, 2 * C2, FC1_N), w.dtype)
    fw1 = fw1.at[:, :, :C2].set(w)
    fw1 = fw1.reshape(PH2, PW2 * 2 * C2, FC1_N)[:, :H2L]      # (4, 140, 150)
    fb1 = p["fc1_b"][None, :]                                 # (1, 150)
    fw2 = p["fc2_w"].T                                        # (150, 47)
    fb2 = p["fc2_b"][None, :]                                 # (1, 47)
    return dict(t1=t1, b1=b1, t2=t2, b2=b2,
                fw1=fw1, fb1=fb1, fw2=fw2, fb2=fb2)


# ----------------------------------------------------------------------------
# Forward wrapper
# ----------------------------------------------------------------------------
def enet_forward(kp, x_nchw):
    B = x_nchw.shape[0]
    # NCHW with C=1 -> (H, B, W): the channel squeeze is a pure reshape, the
    # (B, H) swap is one tiny transpose of the raw input (3 KB / image).
    xt = jnp.transpose(x_nchw.reshape(B, IN_H, IN_W), (1, 0, 2))
    bp = ((B + TILE_B - 1) // TILE_B) * TILE_B
    if bp != B:
        xt = jnp.pad(xt, ((0, 0), (0, bp - B), (0, 0)))

    out = pl.pallas_call(
        _enet_kernel,
        out_shape=jax.ShapeDtypeStruct((bp, N_CLS), jnp.float32),
        grid=(bp // TILE_B,),
        in_specs=[
            pl.BlockSpec((IN_H, TILE_B, IN_W), lambda i: (0, i, 0)),
            pl.BlockSpec((KH, IN_W, W1L), lambda i: (0, 0, 0)),
            pl.BlockSpec((1, W1L), lambda i: (0, 0)),
            pl.BlockSpec((KH, H1L, W2L), lambda i: (0, 0, 0)),
            pl.BlockSpec((1, W2L), lambda i: (0, 0)),
            pl.BlockSpec((PH2, H2L, FC1_N), lambda i: (0, 0, 0)),
            pl.BlockSpec((1, FC1_N), lambda i: (0, 0)),
            pl.BlockSpec((FC1_N, N_CLS), lambda i: (0, 0)),
            pl.BlockSpec((1, N_CLS), lambda i: (0, 0)),
        ],
        out_specs=pl.BlockSpec((TILE_B, N_CLS), lambda i: (i, 0)),
        compiler_params=pltpu.CompilerParams(
            dimension_semantics=("parallel",),
            vmem_limit_bytes=32 * 1024 * 1024,
        ),
    )(xt, kp["t1"], kp["b1"], kp["t2"], kp["b2"],
      kp["fw1"], kp["fb1"], kp["fw2"], kp["fb2"])
    return out[:B]


# ----------------------------------------------------------------------------
# Pure-JAX reference of the same module (used only for the self-check)
# ----------------------------------------------------------------------------
def enet_reference(p, x_nchw):
    hi = jax.lax.Precision.HIGHEST
    c1 = jax.lax.conv_general_dilated(
        x_nchw, p["conv1_w"], (1, 1), "VALID",
        dimension_numbers=("NCHW", "OIHW", "NCHW"), precision=hi)
    c1 = c1 + p["conv1_b"][None, :, None, None]
    p1 = jax.lax.reduce_window(c1, -jnp.inf, jax.lax.max,
                               (1, 1, 2, 2), (1, 1, 2, 2), "VALID")
    h1 = jnp.maximum(p1, 0.0)
    c2 = jax.lax.conv_general_dilated(
        h1, p["conv2_w"], (1, 1), "VALID",
        dimension_numbers=("NCHW", "OIHW", "NCHW"), precision=hi)
    c2 = c2 + p["conv2_b"][None, :, None, None]
    p2 = jax.lax.reduce_window(c2, -jnp.inf, jax.lax.max,
                               (1, 1, 2, 2), (1, 1, 2, 2), "VALID")
    h2 = jnp.maximum(p2, 0.0)
    flat = h2.reshape(h2.shape[0], -1)                        # NCHW flatten = view(-1, 320)
    z1 = jnp.maximum(jnp.dot(flat, p["fc1_w"].T, precision=hi) + p["fc1_b"], 0.0)
    z2 = jnp.dot(z1, p["fc2_w"].T, precision=hi) + p["fc2_b"]
    return jax.nn.log_softmax(z2, axis=-1)


# ----------------------------------------------------------------------------
# Deterministic parameter init (PyTorch-default-like uniform(+-1/sqrt(fan_in)))
# ----------------------------------------------------------------------------
def init_params(key):
    ks = jax.random.split(key, 8)

    def u(k, shape, fan_in):
        bound = 1.0 / jnp.sqrt(jnp.float32(fan_in))
        return jax.random.uniform(k, shape, jnp.float32, -bound, bound)

    return dict(
        conv1_w=u(ks[0], (C1, 1, KH, KW), 1 * KH * KW),
        conv1_b=u(ks[1], (C1,), 1 * KH * KW),
        conv2_w=u(ks[2], (C2, C1, KH, KW), C1 * KH * KW),
        conv2_b=u(ks[3], (C2,), C1 * KH * KW),
        fc1_w=u(ks[4], (FC1_N, 320), 320),
        fc1_b=u(ks[5], (FC1_N,), 320),
        fc2_w=u(ks[6], (N_CLS, FC1_N), FC1_N),
        fc2_b=u(ks[7], (N_CLS,), FC1_N),
    )


if __name__ == "__main__":
    key = jax.random.PRNGKey(0)
    pkey, xkey = jax.random.split(key)
    params = init_params(pkey)              # PyTorch-layout parameters
    kparams = prepare_params(params)        # one-time kernel layout transform
    # ENet requires 28x28 single-channel inputs (320 = 20*4*4 after conv+pool).
    x = jax.random.normal(xkey, (2, 1, 28, 28), dtype=jnp.float32)

    out = jax.jit(enet_forward)(kparams, x)
    out = jax.block_until_ready(out)

    assert out.shape == (2, 47), out.shape
    # log_softmax rows must exponentiate-sum to ~1.
    assert jnp.allclose(jnp.sum(jnp.exp(out), axis=1), 1.0, atol=1e-4)
    # cross-check against a pure-JAX/XLA reference of the same module.
    ref = enet_reference(params, x)
    assert float(jnp.max(jnp.abs(out - ref))) < 5e-2, float(jnp.max(jnp.abs(out - ref)))
    print("KERNEL_OK")
</pallas_src>

<mosaic_0001>
module attributes {stable_mosaic.version = 11 : i64} {
  func.func @_enet_kernel(%arg0: i32, %arg1: memref<28x8x28xf32, #tpu.memory_space<vmem>>, %arg2: memref<5x28x240xf32, #tpu.memory_space<vmem>>, %arg3: memref<1x240xf32, #tpu.memory_space<vmem>>, %arg4: memref<5x230x160xf32, #tpu.memory_space<vmem>>, %arg5: memref<1x160xf32, #tpu.memory_space<vmem>>, %arg6: memref<4x140x150xf32, #tpu.memory_space<vmem>>, %arg7: memref<1x150xf32, #tpu.memory_space<vmem>>, %arg8: memref<150x47xf32, #tpu.memory_space<vmem>>, %arg9: memref<1x47xf32, #tpu.memory_space<vmem>>, %arg10: memref<8x47xf32, #tpu.memory_space<vmem>>) attributes {dimension_semantics = [#tpu.dimension_semantics<parallel>], iteration_bounds = array<i64: 1>, scalar_prefetch = 0 : i64, scratch_operands = 0 : i64, tpu.core_type = #tpu.core_type<tc>, window_params = [{transform_indices = @transform_0, window_bounds = array<i64: 28, 8, 28>}, {pipeline_mode = #tpu.pipeline_mode<synchronous>, transform_indices = @transform_1, window_bounds = array<i64: 5, 28, 240>}, {pipeline_mode = #tpu.pipeline_mode<synchronous>, transform_indices = @transform_2, window_bounds = array<i64: 1, 240>}, {pipeline_mode = #tpu.pipeline_mode<synchronous>, transform_indices = @transform_3, window_bounds = array<i64: 5, 230, 160>}, {pipeline_mode = #tpu.pipeline_mode<synchronous>, transform_indices = @transform_4, window_bounds = array<i64: 1, 160>}, {pipeline_mode = #tpu.pipeline_mode<synchronous>, transform_indices = @transform_5, window_bounds = array<i64: 4, 140, 150>}, {pipeline_mode = #tpu.pipeline_mode<synchronous>, transform_indices = @transform_6, window_bounds = array<i64: 1, 150>}, {pipeline_mode = #tpu.pipeline_mode<synchronous>, transform_indices = @transform_7, window_bounds = array<i64: 150, 47>}, {pipeline_mode = #tpu.pipeline_mode<synchronous>, transform_indices = @transform_8, window_bounds = array<i64: 1, 47>}, {transform_indices = @transform_9, window_bounds = array<i64: 8, 47>}]} {
    %c0 = arith.constant 0 : index
    %c0_0 = arith.constant 0 : index
    %c0_1 = arith.constant 0 : index
    %0 = vector.load %arg1[%c0, %c0_0, %c0_1] : memref<28x8x28xf32, #tpu.memory_space<vmem>>, vector<28x8x28xf32>
    %cst = arith.constant 0.000000e+00 : f32
    %1 = vector.broadcast %cst : f32 to vector<192x240xf32>
    %2 = vector.extract_strided_slice %0 {offsets = [0, 0, 0], sizes = [24, 8, 28], strides = [1, 1, 1]} : vector<28x8x28xf32> to vector<24x8x28xf32>
    %3 = vector.shape_cast %2 : vector<24x8x28xf32> to vector<192x28xf32>
    %c0_2 = arith.constant 0 : index
    %c0_3 = arith.constant 0 : index
    %c0_4 = arith.constant 0 : index
    %4 = vector.load %arg2[%c0_2, %c0_3, %c0_4] : memref<5x28x240xf32, #tpu.memory_space<vmem>>, vector<1x28x240xf32>
    %5 = vector.shape_cast %4 : vector<1x28x240xf32> to vector<28x240xf32>
    %cst_5 = arith.constant dense<0.000000e+00> : vector<192x240xf32>
    %6 = tpu.matmul %3, %5, %cst_5 {dimension_numbers = #tpu.dot_dimension_numbers<[1], [0], [0], [1], [0, 0, 1, 1], [], []>} : vector<192x28xf32>, vector<28x240xf32>, vector<192x240xf32> -> vector<192x240xf32>
    %7 = arith.addf %1, %6 : vector<192x240xf32>
    %8 = vector.extract_strided_slice %0 {offsets = [1, 0, 0], sizes = [24, 8, 28], strides = [1, 1, 1]} : vector<28x8x28xf32> to vector<24x8x28xf32>
    %9 = vector.shape_cast %8 : vector<24x8x28xf32> to vector<192x28xf32>
    %c1 = arith.constant 1 : index
    %c0_6 = arith.constant 0 : index
    %c0_7 = arith.constant 0 : index
    %10 = vector.load %arg2[%c1, %c0_6, %c0_7] : memref<5x28x240xf32, #tpu.memory_space<vmem>>, vector<1x28x240xf32>
    %11 = vector.shape_cast %10 : vector<1x28x240xf32> to vector<28x240xf32>
    %cst_8 = arith.constant dense<0.000000e+00> : vector<192x240xf32>
    %12 = tpu.matmul %9, %11, %cst_8 {dimension_numbers = #tpu.dot_dimension_numbers<[1], [0], [0], [1], [0, 0, 1, 1], [], []>} : vector<192x28xf32>, vector<28x240xf32>, vector<192x240xf32> -> vector<192x240xf32>
    %13 = arith.addf %7, %12 : vector<192x240xf32>
    %14 = vector.extract_strided_slice %0 {offsets = [2, 0, 0], sizes = [24, 8, 28], strides = [1, 1, 1]} : vector<28x8x28xf32> to vector<24x8x28xf32>
    %15 = vector.shape_cast %14 : vector<24x8x28xf32> to vector<192x28xf32>
    %c2 = arith.constant 2 : index
    %c0_9 = arith.constant 0 : index
    %c0_10 = arith.constant 0 : index
    %16 = vector.load %arg2[%c2, %c0_9, %c0_10] : memref<5x28x240xf32, #tpu.memory_space<vmem>>, vector<1x28x240xf32>
    %17 = vector.shape_cast %16 : vector<1x28x240xf32> to vector<28x240xf32>
    %cst_11 = arith.constant dense<0.000000e+00> : vector<192x240xf32>
    %18 = tpu.matmul %15, %17, %cst_11 {dimension_numbers = #tpu.dot_dimension_numbers<[1], [0], [0], [1], [0, 0, 1, 1], [], []>} : vector<192x28xf32>, vector<28x240xf32>, vector<192x240xf32> -> vector<192x240xf32>
    %19 = arith.addf %13, %18 : vector<192x240xf32>
    %20 = vector.extract_strided_slice %0 {offsets = [3, 0, 0], sizes = [24, 8, 28], strides = [1, 1, 1]} : vector<28x8x28xf32> to vector<24x8x28xf32>
    %21 = vector.shape_cast %20 : vector<24x8x28xf32> to vector<192x28xf32>
    %c3 = arith.constant 3 : index
    %c0_12 = arith.constant 0 : index
    %c0_13 = arith.constant 0 : index
    %22 = vector.load %arg2[%c3, %c0_12, %c0_13] : memref<5x28x240xf32, #tpu.memory_space<vmem>>, vector<1x28x240xf32>
    %23 = vector.shape_cast %22 : vector<1x28x240xf32> to vector<28x240xf32>
    %cst_14 = arith.constant dense<0.000000e+00> : vector<192x240xf32>
    %24 = tpu.matmul %21, %23, %cst_14 {dimension_numbers = #tpu.dot_dimension_numbers<[1], [0], [0], [1], [0, 0, 1, 1], [], []>} : vector<192x28xf32>, vector<28x240xf32>, vector<192x240xf32> -> vector<192x240xf32>
    %25 = arith.addf %19, %24 : vector<192x240xf32>
    %26 = vector.extract_strided_slice %0 {offsets = [4, 0, 0], sizes = [24, 8, 28], strides = [1, 1, 1]} : vector<28x8x28xf32> to vector<24x8x28xf32>
    %27 = vector.shape_cast %26 : vector<24x8x28xf32> to vector<192x28xf32>
    %c4 = arith.constant 4 : index
    %c0_15 = arith.constant 0 : index
    %c0_16 = arith.constant 0 : index
    %28 = vector.load %arg2[%c4, %c0_15, %c0_16] : memref<5x28x240xf32, #tpu.memory_space<vmem>>, vector<1x28x240xf32>
    %29 = vector.shape_cast %28 : vector<1x28x240xf32> to vector<28x240xf32>
    %cst_17 = arith.constant dense<0.000000e+00> : vector<192x240xf32>
    %30 = tpu.matmul %27, %29, %cst_17 {dimension_numbers = #tpu.dot_dimension_numbers<[1], [0], [0], [1], [0, 0, 1, 1], [], []>} : vector<192x28xf32>, vector<28x240xf32>, vector<192x240xf32> -> vector<192x240xf32>
    %31 = arith.addf %25, %30 : vector<192x240xf32>
    %c0_18 = arith.constant 0 : index
    %c0_19 = arith.constant 0 : index
    %32 = vector.load %arg3[%c0_18, %c0_19] : memref<1x240xf32, #tpu.memory_space<vmem>>, vector<1x240xf32>
    %33 = vector.broadcast %32 : vector<1x240xf32> to vector<192x240xf32>
    %34 = arith.addf %31, %33 : vector<192x240xf32>
    %35 = vector.shape_cast %34 : vector<192x240xf32> to vector<12x2x8x240xf32>
    %36 = vector.extract_strided_slice %35 {offsets = [0, 0, 0, 0], sizes = [12, 1, 8, 240], strides = [1, 1, 1, 1]} : vector<12x2x8x240xf32> to vector<12x1x8x240xf32>
    %37 = vector.shape_cast %36 : vector<12x1x8x240xf32> to vector<12x8x240xf32>
    %38 = vector.extract_strided_slice %35 {offsets = [0, 1, 0, 0], sizes = [12, 1, 8, 240], strides = [1, 1, 1, 1]} : vector<12x2x8x240xf32> to vector<12x1x8x240xf32>
    %39 = vector.shape_cast %38 : vector<12x1x8x240xf32> to vector<12x8x240xf32>
    %40 = arith.maximumf %37, %39 : vector<12x8x240xf32>
    %41 = vector.extract_strided_slice %40 {offsets = [0, 0, 0], sizes = [12, 8, 230], strides = [1, 1, 1]} : vector<12x8x240xf32> to vector<12x8x230xf32>
    %42 = vector.extract_strided_slice %40 {offsets = [0, 0, 10], sizes = [12, 8, 230], strides = [1, 1, 1]} : vector<12x8x240xf32> to vector<12x8x230xf32>
    %43 = arith.maximumf %41, %42 : vector<12x8x230xf32>
    %cst_20 = arith.constant 0.000000e+00 : f32
    %44 = vector.broadcast %cst_20 : f32 to vector<12x8x230xf32>
    %45 = arith.maximumf %43, %44 : vector<12x8x230xf32>
    %cst_21 = arith.constant 0.000000e+00 : f32
    %46 = vector.broadcast %cst_21 : f32 to vector<64x160xf32>
    %47 = vector.extract_strided_slice %45 {offsets = [0, 0, 0], sizes = [8, 8, 230], strides = [1, 1, 1]} : vector<12x8x230xf32> to vector<8x8x230xf32>
    %48 = vector.shape_cast %47 : vector<8x8x230xf32> to vector<64x230xf32>
    %c0_22 = arith.constant 0 : index
    %c0_23 = arith.constant 0 : index
    %c0_24 = arith.constant 0 : index
    %49 = vector.load %arg4[%c0_22, %c0_23, %c0_24] : memref<5x230x160xf32, #tpu.memory_space<vmem>>, vector<1x230x160xf32>
    %50 = vector.shape_cast %49 : vector<1x230x160xf32> to vector<230x160xf32>
    %cst_25 = arith.constant dense<0.000000e+00> : vector<64x160xf32>
    %51 = tpu.matmul %48, %50, %cst_25 {dimension_numbers = #tpu.dot_dimension_numbers<[1], [0], [0], [1], [0, 0, 1, 1], [], []>} : vector<64x230xf32>, vector<230x160xf32>, vector<64x160xf32> -> vector<64x160xf32>
    %52 = arith.addf %46, %51 : vector<64x160xf32>
    %53 = vector.extract_strided_slice %45 {offsets = [1, 0, 0], sizes = [8, 8, 230], strides = [1, 1, 1]} : vector<12x8x230xf32> to vector<8x8x230xf32>
    %54 = vector.shape_cast %53 : vector<8x8x230xf32> to vector<64x230xf32>
    %c1_26 = arith.constant 1 : index
    %c0_27 = arith.constant 0 : index
    %c0_28 = arith.constant 0 : index
    %55 = vector.load %arg4[%c1_26, %c0_27, %c0_28] : memref<5x230x160xf32, #tpu.memory_space<vmem>>, vector<1x230x160xf32>
    %56 = vector.shape_cast %55 : vector<1x230x160xf32> to vector<230x160xf32>
    %cst_29 = arith.constant dense<0.000000e+00> : vector<64x160xf32>
    %57 = tpu.matmul %54, %56, %cst_29 {dimension_numbers = #tpu.dot_dimension_numbers<[1], [0], [0], [1], [0, 0, 1, 1], [], []>} : vector<64x230xf32>, vector<230x160xf32>, vector<64x160xf32> -> vector<64x160xf32>
    %58 = arith.addf %52, %57 : vector<64x160xf32>
    %59 = vector.extract_strided_slice %45 {offsets = [2, 0, 0], sizes = [8, 8, 230], strides = [1, 1, 1]} : vector<12x8x230xf32> to vector<8x8x230xf32>
    %60 = vector.shape_cast %59 : vector<8x8x230xf32> to vector<64x230xf32>
    %c2_30 = arith.constant 2 : index
    %c0_31 = arith.constant 0 : index
    %c0_32 = arith.constant 0 : index
    %61 = vector.load %arg4[%c2_30, %c0_31, %c0_32] : memref<5x230x160xf32, #tpu.memory_space<vmem>>, vector<1x230x160xf32>
    %62 = vector.shape_cast %61 : vector<1x230x160xf32> to vector<230x160xf32>
    %cst_33 = arith.constant dense<0.000000e+00> : vector<64x160xf32>
    %63 = tpu.matmul %60, %62, %cst_33 {dimension_numbers = #tpu.dot_dimension_numbers<[1], [0], [0], [1], [0, 0, 1, 1], [], []>} : vector<64x230xf32>, vector<230x160xf32>, vector<64x160xf32> -> vector<64x160xf32>
    %64 = arith.addf %58, %63 : vector<64x160xf32>
    %65 = vector.extract_strided_slice %45 {offsets = [3, 0, 0], sizes = [8, 8, 230], strides = [1, 1, 1]} : vector<12x8x230xf32> to vector<8x8x230xf32>
    %66 = vector.shape_cast %65 : vector<8x8x230xf32> to vector<64x230xf32>
    %c3_34 = arith.constant 3 : index
    %c0_35 = arith.constant 0 : index
    %c0_36 = arith.constant 0 : index
    %67 = vector.load %arg4[%c3_34, %c0_35, %c0_36] : memref<5x230x160xf32, #tpu.memory_space<vmem>>, vector<1x230x160xf32>
    %68 = vector.shape_cast %67 : vector<1x230x160xf32> to vector<230x160xf32>
    %cst_37 = arith.constant dense<0.000000e+00> : vector<64x160xf32>
    %69 = tpu.matmul %66, %68, %cst_37 {dimension_numbers = #tpu.dot_dimension_numbers<[1], [0], [0], [1], [0, 0, 1, 1], [], []>} : vector<64x230xf32>, vector<230x160xf32>, vector<64x160xf32> -> vector<64x160xf32>
    %70 = arith.addf %64, %69 : vector<64x160xf32>
    %71 = vector.extract_strided_slice %45 {offsets = [4, 0, 0], sizes = [8, 8, 230], strides = [1, 1, 1]} : vector<12x8x230xf32> to vector<8x8x230xf32>
    %72 = vector.shape_cast %71 : vector<8x8x230xf32> to vector<64x230xf32>
    %c4_38 = arith.constant 4 : index
    %c0_39 = arith.constant 0 : index
    %c0_40 = arith.constant 0 : index
    %73 = vector.load %arg4[%c4_38, %c0_39, %c0_40] : memref<5x230x160xf32, #tpu.memory_space<vmem>>, vector<1x230x160xf32>
    %74 = vector.shape_cast %73 : vector<1x230x160xf32> to vector<230x160xf32>
    %cst_41 = arith.constant dense<0.000000e+00> : vector<64x160xf32>
    %75 = tpu.matmul %72, %74, %cst_41 {dimension_numbers = #tpu.dot_dimension_numbers<[1], [0], [0], [1], [0, 0, 1, 1], [], []>} : vector<64x230xf32>, vector<230x160xf32>, vector<64x160xf32> -> vector<64x160xf32>
    %76 = arith.addf %70, %75 : vector<64x160xf32>
    %c0_42 = arith.constant 0 : index
    %c0_43 = arith.constant 0 : index
    %77 = vector.load %arg5[%c0_42, %c0_43] : memref<1x160xf32, #tpu.memory_space<vmem>>, vector<1x160xf32>
    %78 = vector.broadcast %77 : vector<1x160xf32> to vector<64x160xf32>
    %79 = arith.addf %76, %78 : vector<64x160xf32>
    %80 = vector.shape_cast %79 : vector<64x160xf32> to vector<4x2x8x160xf32>
    %81 = vector.extract_strided_slice %80 {offsets = [0, 0, 0, 0], sizes = [4, 1, 8, 160], strides = [1, 1, 1, 1]} : vector<4x2x8x160xf32> to vector<4x1x8x160xf32>
    %82 = vector.shape_cast %81 : vector<4x1x8x160xf32> to vector<4x8x160xf32>
    %83 = vector.extract_strided_slice %80 {offsets = [0, 1, 0, 0], sizes = [4, 1, 8, 160], strides = [1, 1, 1, 1]} : vector<4x2x8x160xf32> to vector<4x1x8x160xf32>
    %84 = vector.shape_cast %83 : vector<4x1x8x160xf32> to vector<4x8x160xf32>
    %85 = arith.maximumf %82, %84 : vector<4x8x160xf32>
    %86 = vector.extract_strided_slice %85 {offsets = [0, 0, 0], sizes = [4, 8, 140], strides = [1, 1, 1]} : vector<4x8x160xf32> to vector<4x8x140xf32>
    %87 = vector.extract_strided_slice %85 {offsets = [0, 0, 20], sizes = [4, 8, 140], strides = [1, 1, 1]} : vector<4x8x160xf32> to vector<4x8x140xf32>
    %88 = arith.maximumf %86, %87 : vector<4x8x140xf32>
    %cst_44 = arith.constant 0.000000e+00 : f32
    %89 = vector.broadcast %cst_44 : f32 to vector<4x8x140xf32>
    %90 = arith.maximumf %88, %89 : vector<4x8x140xf32>
    %cst_45 = arith.constant 0.000000e+00 : f32
    %91 = vector.broadcast %cst_45 : f32 to vector<8x150xf32>
    %c0_46 = arith.constant 0 : index
    %c0_47 = arith.constant 0 : index
    %92 = vector.load %arg7[%c0_46, %c0_47] : memref<1x150xf32, #tpu.memory_space<vmem>>, vector<1x150xf32>
    %93 = vector.broadcast %92 : vector<1x150xf32> to vector<8x150xf32>
    %94 = arith.addf %91, %93 : vector<8x150xf32>
    %95 = vector.extract_strided_slice %90 {offsets = [0, 0, 0], sizes = [1, 8, 140], strides = [1, 1, 1]} : vector<4x8x140xf32> to vector<1x8x140xf32>
    %96 = vector.shape_cast %95 : vector<1x8x140xf32> to vector<8x140xf32>
    %c0_48 = arith.constant 0 : index
    %c0_49 = arith.constant 0 : index
    %c0_50 = arith.constant 0 : index
    %97 = vector.load %arg6[%c0_48, %c0_49, %c0_50] : memref<4x140x150xf32, #tpu.memory_space<vmem>>, vector<1x140x150xf32>
    %98 = vector.shape_cast %97 : vector<1x140x150xf32> to vector<140x150xf32>
    %cst_51 = arith.constant dense<0.000000e+00> : vector<8x150xf32>
    %99 = tpu.matmul %96, %98, %cst_51 {dimension_numbers = #tpu.dot_dimension_numbers<[1], [0], [0], [1], [0, 0, 1, 1], [], []>} : vector<8x140xf32>, vector<140x150xf32>, vector<8x150xf32> -> vector<8x150xf32>
    %100 = arith.addf %94, %99 : vector<8x150xf32>
    %101 = vector.extract_strided_slice %90 {offsets = [1, 0, 0], sizes = [1, 8, 140], strides = [1, 1, 1]} : vector<4x8x140xf32> to vector<1x8x140xf32>
    %102 = vector.shape_cast %101 : vector<1x8x140xf32> to vector<8x140xf32>
    %c1_52 = arith.constant 1 : index
    %c0_53 = arith.constant 0 : index
    %c0_54 = arith.constant 0 : index
    %103 = vector.load %arg6[%c1_52, %c0_53, %c0_54] : memref<4x140x150xf32, #tpu.memory_space<vmem>>, vector<1x140x150xf32>
    %104 = vector.shape_cast %103 : vector<1x140x150xf32> to vector<140x150xf32>
    %cst_55 = arith.constant dense<0.000000e+00> : vector<8x150xf32>
    %105 = tpu.matmul %102, %104, %cst_55 {dimension_numbers = #tpu.dot_dimension_numbers<[1], [0], [0], [1], [0, 0, 1, 1], [], []>} : vector<8x140xf32>, vector<140x150xf32>, vector<8x150xf32> -> vector<8x150xf32>
    %106 = arith.addf %100, %105 : vector<8x150xf32>
    %107 = vector.extract_strided_slice %90 {offsets = [2, 0, 0], sizes = [1, 8, 140], strides = [1, 1, 1]} : vector<4x8x140xf32> to vector<1x8x140xf32>
    %108 = vector.shape_cast %107 : vector<1x8x140xf32> to vector<8x140xf32>
    %c2_56 = arith.constant 2 : index
    %c0_57 = arith.constant 0 : index
    %c0_58 = arith.constant 0 : index
    %109 = vector.load %arg6[%c2_56, %c0_57, %c0_58] : memref<4x140x150xf32, #tpu.memory_space<vmem>>, vector<1x140x150xf32>
    %110 = vector.shape_cast %109 : vector<1x140x150xf32> to vector<140x150xf32>
    %cst_59 = arith.constant dense<0.000000e+00> : vector<8x150xf32>
    %111 = tpu.matmul %108, %110, %cst_59 {dimension_numbers = #tpu.dot_dimension_numbers<[1], [0], [0], [1], [0, 0, 1, 1], [], []>} : vector<8x140xf32>, vector<140x150xf32>, vector<8x150xf32> -> vector<8x150xf32>
    %112 = arith.addf %106, %111 : vector<8x150xf32>
    %113 = vector.extract_strided_slice %90 {offsets = [3, 0, 0], sizes = [1, 8, 140], strides = [1, 1, 1]} : vector<4x8x140xf32> to vector<1x8x140xf32>
    %114 = vector.shape_cast %113 : vector<1x8x140xf32> to vector<8x140xf32>
    %c3_60 = arith.constant 3 : index
    %c0_61 = arith.constant 0 : index
    %c0_62 = arith.constant 0 : index
    %115 = vector.load %arg6[%c3_60, %c0_61, %c0_62] : memref<4x140x150xf32, #tpu.memory_space<vmem>>, vector<1x140x150xf32>
    %116 = vector.shape_cast %115 : vector<1x140x150xf32> to vector<140x150xf32>
    %cst_63 = arith.constant dense<0.000000e+00> : vector<8x150xf32>
    %117 = tpu.matmul %114, %116, %cst_63 {dimension_numbers = #tpu.dot_dimension_numbers<[1], [0], [0], [1], [0, 0, 1, 1], [], []>} : vector<8x140xf32>, vector<140x150xf32>, vector<8x150xf32> -> vector<8x150xf32>
    %118 = arith.addf %112, %117 : vector<8x150xf32>
    %cst_64 = arith.constant 0.000000e+00 : f32
    %119 = vector.broadcast %cst_64 : f32 to vector<8x150xf32>
    %120 = arith.maximumf %118, %119 : vector<8x150xf32>
    %c0_65 = arith.constant 0 : index
    %c0_66 = arith.constant 0 : index
    %121 = vector.load %arg8[%c0_65, %c0_66] : memref<150x47xf32, #tpu.memory_space<vmem>>, vector<150x47xf32>
    %cst_67 = arith.constant dense<0.000000e+00> : vector<8x47xf32>
    %122 = tpu.matmul %120, %121, %cst_67 {dimension_numbers = #tpu.dot_dimension_numbers<[1], [0], [0], [1], [0, 0, 1, 1], [], []>} : vector<8x150xf32>, vector<150x47xf32>, vector<8x47xf32> -> vector<8x47xf32>
    %c0_68 = arith.constant 0 : index
    %c0_69 = arith.constant 0 : index
    %123 = vector.load %arg9[%c0_68, %c0_69] : memref<1x47xf32, #tpu.memory_space<vmem>>, vector<1x47xf32>
    %124 = vector.broadcast %123 : vector<1x47xf32> to vector<8x47xf32>
    %125 = arith.addf %122, %124 : vector<8x47xf32>
    %cst_70 = arith.constant dense<0xFF800000> : vector<8xf32>
    %126 = vector.multi_reduction <maximumf>, %125, %cst_70 [1] : vector<8x47xf32> to vector<8xf32>
    %127 = vector.shape_cast %126 : vector<8xf32> to vector<8x1xf32>
    %128 = vector.broadcast %127 : vector<8x1xf32> to vector<8x47xf32>
    %129 = arith.subf %125, %128 : vector<8x47xf32>
    %130 = math.exp %129 : vector<8x47xf32>
    %cst_71 = arith.constant dense<0.000000e+00> : vector<8xf32>
    %131 = vector.multi_reduction <add>, %130, %cst_71 [1] : vector<8x47xf32> to vector<8xf32>
    %132 = vector.shape_cast %131 : vector<8xf32> to vector<8x1xf32>
    %133 = math.log %132 : vector<8x1xf32>
    %134 = vector.broadcast %133 : vector<8x1xf32> to vector<8x47xf32>
    %135 = arith.subf %129, %134 : vector<8x47xf32>
    %c0_72 = arith.constant 0 : index
    %c0_73 = arith.constant 0 : index
    %136 = vector.load %arg10[%c0_72, %c0_73] : memref<8x47xf32, #tpu.memory_space<vmem>>, vector<8x47xf32>
    tpu.vector_store %arg10[%c0_72, %c0_73], %135 {strides = array<i32>} : memref<8x47xf32, #tpu.memory_space<vmem>>, vector<8x47xf32>,
    return
  }
  func.func @transform_0(%arg0: i32) -> (i32, i32, i32) {
    %c0_i32 = arith.constant 0 : i32
    %c0_i32_0 = arith.constant 0 : i32
    %c0_i32_1 = arith.constant 0 : i32
    return %c0_i32, %arg0, %c0_i32_0 : i32, i32, i32
  }
  func.func @transform_1(%arg0: i32) -> (i32, i32, i32) {
    %c0_i32 = arith.constant 0 : i32
    %c0_i32_0 = arith.constant 0 : i32
    %c0_i32_1 = arith.constant 0 : i32
    %c0_i32_2 = arith.constant 0 : i32
    return %c0_i32, %c0_i32_0, %c0_i32_1 : i32, i32, i32
  }
  func.func @transform_2(%arg0: i32) -> (i32, i32) {
    %c0_i32 = arith.constant 0 : i32
    %c0_i32_0 = arith.constant 0 : i32
    %c0_i32_1 = arith.constant 0 : i32
    return %c0_i32, %c0_i32_0 : i32, i32
  }
  func.func @transform_3(%arg0: i32) -> (i32, i32, i32) {
    %c0_i32 = arith.constant 0 : i32
    %c0_i32_0 = arith.constant 0 : i32
    %c0_i32_1 = arith.constant 0 : i32
    %c0_i32_2 = arith.constant 0 : i32
    return %c0_i32, %c0_i32_0, %c0_i32_1 : i32, i32, i32
  }
  func.func @transform_4(%arg0: i32) -> (i32, i32) {
    %c0_i32 = arith.constant 0 : i32
    %c0_i32_0 = arith.constant 0 : i32
    %c0_i32_1 = arith.constant 0 : i32
    return %c0_i32, %c0_i32_0 : i32, i32
  }
  func.func @transform_5(%arg0: i32) -> (i32, i32, i32) {
    %c0_i32 = arith.constant 0 : i32
    %c0_i32_0 = arith.constant 0 : i32
    %c0_i32_1 = arith.constant 0 : i32
    %c0_i32_2 = arith.constant 0 : i32
    return %c0_i32, %c0_i32_0, %c0_i32_1 : i32, i32, i32
  }
  func.func @transform_6(%arg0: i32) -> (i32, i32) {
    %c0_i32 = arith.constant 0 : i32
    %c0_i32_0 = arith.constant 0 : i32
    %c0_i32_1 = arith.constant 0 : i32
    return %c0_i32, %c0_i32_0 : i32, i32
  }
  func.func @transform_7(%arg0: i32) -> (i32, i32) {
    %c0_i32 = arith.constant 0 : i32
    %c0_i32_0 = arith.constant 0 : i32
    %c0_i32_1 = arith.constant 0 : i32
    return %c0_i32, %c0_i32_0 : i32, i32
  }
  func.func @transform_8(%arg0: i32) -> (i32, i32) {
    %c0_i32 = arith.constant 0 : i32
    %c0_i32_0 = arith.constant 0 : i32
    %c0_i32_1 = arith.constant 0 : i32
    return %c0_i32, %c0_i32_0 : i32, i32
  }
  func.func @transform_9(%arg0: i32) -> (i32, i32) {
    %c0_i32 = arith.constant 0 : i32
    %c0_i32_0 = arith.constant 0 : i32
    return %arg0, %c0_i32 : i32, i32
  }
}

</mosaic_0001>

<bundles_post_ra>
// kernel: enet_forward.1
= control target key start
LH: loop header
LB: loop body
LE: loop exit
PB: predicated region body
PF: predicated region fallthrough
CT: control target
= control target key end

     0   :  { %vm150_vm0 = vcmask 1043456   ;;  %v4676_v3 = vmov 0.0   ;;  %vm4677_vm1 = vmmov 1   ;;  %vm77_vm3 = vcmask 228352   ;;  %s4678_s24 = smov 118   ;;  %s7164_s1 = inlined_call_operand.vmem [shape: f32[5,28,240], index: 1, kind: input, shape index: {}]   ;;  %s7165_s0 = inlined_call_operand.vmem [shape: f32[28,8,28], index: 0, kind: input, shape index: {}]   ;;  %s7166_s3 = inlined_call_operand.vmem [shape: f32[5,230,160], index: 3, kind: input, shape index: {}]   ;;  %s7167_s2 = inlined_call_operand.vmem [shape: f32[1,240], index: 2, kind: input, shape index: {}]   ;;  %s7168_s5 = inlined_call_operand.vmem [shape: f32[4,140,150], index: 5, kind: input, shape index: {}]   ;;  %s7169_s4 = inlined_call_operand.vmem [shape: f32[1,160], index: 4, kind: input, shape index: {}]   ;;  %s7170_s7 = inlined_call_operand.vmem [shape: f32[150,47], index: 7, kind: input, shape index: {}]   ;;  %s7171_s6 = inlined_call_operand.vmem [shape: f32[1,150], index: 6, kind: input, shape index: {}]   ;;  %s7172_s8 = inlined_call_operand.vmem [shape: f32[1,47], index: 8, kind: input, shape index: {}]   ;;  %s7173_s9 = inlined_call_operand.vmem [shape: f32[8,47], index: 9, kind: output, shape index: {}]  }
   0x1   :  { %v3328_v0 = vld [vmem:[%s7164_s1 + $0x48] sm:$0xff]  ;;  %v3330_v1 = vld [vmem:[%s7164_s1 + $0x58] sm:$0xff]  ;;  %v3327_v2 = vld [vmem:[%s7164_s1 + $0x40] sm:$0xff]  ;;  %221 = vmatprep.mubr.f32.mxu0 %v4676_v3  ;;  %vm1792_vm4 = vcmask 1045504   ;;  %vm1565_vm5 = vcmask 965632   ;;  %vm1767_vm6 = vcmask 834560  }
   0x2   :  { %v3894_v4 = vpack.c.bf16 %v3330_v1, %v3328_v0  ;;  %v3329_v5 = vld [vmem:[%s7164_s1 + $0x50] sm:$0xff]  ;;  %v3332_v6 = vld [vmem:[%s7164_s1 + $0x68] sm:$0xff]  ;;  %v3334_v7 = vld [vmem:[%s7164_s1 + $0x78] sm:$0xf]  ;;  %vm2685_vm7 = vcmask 883712   ;;  %vm2764_vm8 = vcmask 97280  }
   0x3   :  { %v3896_v8 = vpack.c.bf16 %v3329_v5, %v3327_v2  ;;  %v3898_v9 = vpack.c.bf16 %v3334_v7, %v3332_v6  ;;  %vm4750_vm2 = vmpackc.low %vm150_vm0, %vm4677_vm1  ;;  %v3331_v11 = vld [vmem:[%s7164_s1 + $0x60] sm:$0xff]  ;;  %v3333_v12 = vld [vmem:[%s7164_s1 + $0x70] sm:$0xf]  ;;  %vm3232_vm9 = vcmask 179200   ;;  %vm3309_vm10 = vcmask 384000  }
   0x4   :  { %3895 = vmatprep.subr.bf16.mxu0 %v3894_v4  ;;  %v61_v13 = vld [vmem:[%s7164_s1 + $0x8] sm:$0xff]  ;;  %v63_v14 = vld [vmem:[%s7164_s1 + $0x18] sm:$0xff]  ;;  %v3901_v15 = vpack.c.bf16 %v3333_v12, %v3331_v11  ;;  %v60_v17 = vld [vmem:[%s7164_s1] sm:$0xff] }
   0x5   :  { %3897 = vmatpush1.bf16.msra.mxu0 %v3896_v8  ;;  %v3904_v16 = vpack.c.bf16 %v63_v14, %v61_v13  ;;  %v62_v18 = vld [vmem:[%s7164_s1 + $0x10] sm:$0xff]  ;;  %v4779_v19 = vld [vmem:[%s7165_s0 + $0x8] sm:$0xff]  ;;  %v67_v22 = vld [vmem:[%s7164_s1 + $0x38] sm:$0xf] }
   0x6   :  { %3900 = vmatprep.subr.msk.bf16.mxu0 %vm4750_vm2, %v3898_v9  ;;  %v3906_v20 = vpack.c.bf16 %v62_v18, %v60_v17  ;;  %v65_v21 = vld [vmem:[%s7164_s1 + $0x28] sm:$0xff]  ;;  %v64_v23 = vld [vmem:[%s7164_s1 + $0x20] sm:$0xff]  ;;  %v66_v24 = vld [vmem:[%s7164_s1 + $0x30] sm:$0xf] }
   0x7   :  { %v3908_v25 = vpack.c.bf16 %v67_v22, %v65_v21  ;;  %v4799_v26 = vld [vmem:[%s7165_s0 + $0x10] sm:$0xff]  ;;  %v3911_v27 = vpack.c.bf16 %v66_v24, %v64_v23  ;;  %v3388_v28 = vld [vmem:[%s7164_s1 + $0x88] sm:$0xff]  ;;  %v3390_v29 = vld [vmem:[%s7164_s1 + $0x98] sm:$0xff] }
   0x8   :  { %v3914_v30 = vpack.c.bf16 %v3390_v29, %v3388_v28  ;;  %v4815_v31 = vld [vmem:[%s7165_s0 + $0x18] sm:$0xff]  ;;  %v4825_v32 = vld [vmem:[%s7165_s0 + $0x20] sm:$0xff]  ;;  %v4833_v33 = vld [vmem:[%s7165_s0 + $0x28] sm:$0xff] }
   0x9   :  { %3903 = vmatpush1.bf16.msk.msra.mxu0 %vm4750_vm2, %v3901_v15  ;;  %v4841_v34 = vld [vmem:[%s7165_s0 + $0x30] sm:$0xff]  ;;  %v4849_v35 = vld [vmem:[%s7165_s0 + $0x38] sm:$0xff]  ;;  %v4857_v36 = vld [vmem:[%s7165_s0 + $0x40] sm:$0xff] }
   0xa   :  { %3905 = vmatprep.subr.bf16.mxu0 %v3904_v16  ;;  %v4865_v37 = vld [vmem:[%s7165_s0 + $0x48] sm:$0xff]  ;;  %v4873_v38 = vld [vmem:[%s7165_s0 + $0x50] sm:$0xff]  ;;  %v4881_v39 = vld [vmem:[%s7165_s0 + $0x58] sm:$0xff] }
   0xb   :  { %v4889_v40 = vld [vmem:[%s7165_s0 + $0x60] sm:$0xff]  ;;  %v4897_v41 = vld [vmem:[%s7165_s0 + $0x68] sm:$0xff]  ;;  %v4905_v42 = vld [vmem:[%s7165_s0 + $0x70] sm:$0xff] }
   0xc   :  { %3337 = vmatmul.mubr.msk.f32.vlgmr.msra.gmra.mrb[0].mxu0 %vm77_vm3, %v4779_v19  ;;  %v4913_v43 = vld [vmem:[%s7165_s0 + $0x78] sm:$0xff]  ;;  %v4921_v44 = vld [vmem:[%s7165_s0 + $0x80] sm:$0xff]  ;;  %v4929_v45 = vld [vmem:[%s7165_s0 + $0x88] sm:$0xff] }
   0xd   :  { %3907 = vmatpush1.bf16.msra.mxu0 %v3906_v20  ;;  %227 = vmatprep.mubr.f32.mxu0 %v4676_v3  ;;  %v4937_v46 = vld [vmem:[%s7165_s0 + $0x90] sm:$0xff]  ;;  %v4945_v47 = vld [vmem:[%s7165_s0 + $0x98] sm:$0xff]  ;;  %v4953_v48 = vld [vmem:[%s7165_s0 + $0xa0] sm:$0xff] }
   0xe   :  { %3910 = vmatprep.subr.msk.bf16.mxu0 %vm4750_vm2, %v3908_v25  ;;  %v4961_v49 = vld [vmem:[%s7165_s0 + $0xa8] sm:$0xff]  ;;  %v4969_v50 = vld [vmem:[%s7165_s0 + $0xb0] sm:$0xff]  ;;  %v4977_v51 = vld [vmem:[%s7165_s0 + $0xb8] sm:$0xff] }
   0xf   :  { %v4985_v52 = vld [vmem:[%s7165_s0 + $0xc0] sm:$0xff]  ;;  %v3389_v54 = vld [vmem:[%s7164_s1 + $0x90] sm:$0xff]  ;;  %v3392_v55 = vld [vmem:[%s7164_s1 + $0xa8] sm:$0xff] }
  0x10   :  { %3338 = vmatmul.mubr.msk.f32.gmra.mrb[2].mxu0 %vm77_vm3, %v4799_v26  ;;  %v3387_v53 = vld [vmem:[%s7164_s1 + $0x80] sm:$0xff]  ;;  %v3394_v56 = vld [vmem:[%s7164_s1 + $0xb8] sm:$0xf]  ;;  %v3393_v61 = vld [vmem:[%s7164_s1 + $0xb0] sm:$0xf] }
  0x11   :  { %233 = vmatprep.mubr.f32.mxu0 %v4676_v3  ;;  %3913 = vmatpush1.bf16.msk.msra.mxu0 %vm4750_vm2, %v3911_v27  ;;  %v32_v57 = vld [vmem:[%s7165_s0] sm:$0xff]  ;;  %v3916_v58 = vpack.c.bf16 %v3389_v54, %v3387_v53  ;;  %v3918_v59 = vpack.c.bf16 %v3394_v56, %v3392_v55  ;;  %v3422_v62 = vld [vmem:[%s7164_s1 + $0xc8] sm:$0xff]  ;;  %v3424_v63 = vld [vmem:[%s7164_s1 + $0xd8] sm:$0xff] }
  0x12   :  { %3915 = vmatprep.subr.bf16.mxu0 %v3914_v30  ;;  %v3391_v60 = vld [vmem:[%s7164_s1 + $0xa0] sm:$0xff]  ;;  %v3924_v1 = vpack.c.bf16 %v3424_v63, %v3422_v62  ;;  %v3423_v4 = vld [vmem:[%s7164_s1 + $0xd0] sm:$0xff]  ;;  %v3426_v5 = vld [vmem:[%s7164_s1 + $0xe8] sm:$0xff] }
  0x13   :  { %v3921_v0 = vpack.c.bf16 %v3393_v61, %v3391_v60  ;;  %v3421_v2 = vld [vmem:[%s7164_s1 + $0xc0] sm:$0xff]  ;;  %v3428_v6 = vld [vmem:[%s7164_s1 + $0xf8] sm:$0xf]  ;;  %v3427_v11 = vld [vmem:[%s7164_s1 + $0xf0] sm:$0xf] }
  0x14   :  { %3339 = vmatmul.mubr.msk.f32.gmra.mrb[4].mxu0 %vm77_vm3, %v4815_v31  ;;  %v3926_v7 = vpack.c.bf16 %v3423_v4, %v3421_v2  ;;  %v3928_v8 = vpack.c.bf16 %v3428_v6, %v3426_v5  ;;  %v3425_v9 = vld [vmem:[%s7164_s1 + $0xe0] sm:$0xff]  ;;  %v3456_v12 = vld [vmem:[%s7164_s1 + $0x108] sm:$0xff]  ;;  %v3458_v13 = vld [vmem:[%s7164_s1 + $0x118] sm:$0xff] }
  0x15   :  { %239 = vmatprep.mubr.f32.mxu0 %v4676_v3  ;;  %v3931_v14 = vpack.c.bf16 %v3427_v11, %v3425_v9  ;;  %v3934_v15 = vpack.c.bf16 %v3458_v13, %v3456_v12  ;;  %v5192_v16 = vld [vmem:[%s7165_s0 + $0xc8] sm:$0xff]  ;;  %v3455_v17 = vld [vmem:[%s7164_s1 + $0x100] sm:$0xff]  ;;  %v3457_v18 = vld [vmem:[%s7164_s1 + $0x110] sm:$0xff] }
  0x16   :  { %v3462_v20 = vld [vmem:[%s7164_s1 + $0x138] sm:$0xf]  ;;  %v3936_v21 = vpack.c.bf16 %v3457_v18, %v3455_v17  ;;  %v3459_v23 = vld [vmem:[%s7164_s1 + $0x120] sm:$0xff]  ;;  %v3461_v24 = vld [vmem:[%s7164_s1 + $0x130] sm:$0xf] }
  0x17   :  { %v3941_v25 = vpack.c.bf16 %v3461_v24, %v3459_v23  ;;  %v59_v27 = vld [vmem:[%s7165_s0 + $0xd8] sm:$0xff]  ;;  %v3492_v29 = vld [vmem:[%s7166_s3 + $0x1e8] sm:$0xff]  ;;  %v3505_v55 = vld [vmem:[%s7166_s3 + $0x250] sm:$0xff] }
  0x18   :  { %3340 = vmatmul.mubr.msk.f32.gmra.mrb[6].mxu0 %vm77_vm3, %v4825_v32  ;;  %v3490_v28 = vld [vmem:[%s7166_s3 + $0x1d8] sm:$0xff]  ;;  %v3508_v53 = vld [vmem:[%s7166_s3 + $0x268] sm:$0xff]  ;;  %v3507_v56 = vld [vmem:[%s7166_s3 + $0x260] sm:$0xff] }
  0x19   :  { %245 = vmatprep.mubr.f32.mxu0 %v4676_v3  ;;  %v3944_v30 = vpack.c.bf16 %v3492_v29, %v3490_v28  ;;  %v3509_v60 = vld [vmem:[%s7166_s3 + $0x270] sm:$0xff]  ;;  %v3511_v62 = vld [vmem:[%s7166_s3 + $0x280] sm:$0xff]  ;;  %v3514_v63 = vld [vmem:[%s7166_s3 + $0x298] sm:$0xff] }
  0x1a   :  { %v3513_v4 = vld [vmem:[%s7166_s3 + $0x290] sm:$0xff]  ;;  %v3515_v5 = vld [vmem:[%s7166_s3 + $0x2a0] sm:$0xff]  ;;  %v3518_v6 = vld [vmem:[%s7166_s3 + $0x2b8] sm:$0xff] }
  0x1b   :  { %3945 = vmatprep.subr.bf16.mxu1 %v3944_v30  ;;  %v3517_v11 = vld [vmem:[%s7166_s3 + $0x2b0] sm:$0xff]  ;;  %v3519_v12 = vld [vmem:[%s7166_s3 + $0x2c0] sm:$0xff]  ;;  %v3522_v13 = vld [vmem:[%s7166_s3 + $0x2d8] sm:$0xff] }
  0x1c   :  { %3341 = vmatmul.mubr.msk.f32.gmra.mrb[8].mxu0 %vm77_vm3, %v4833_v33  ;;  %v3521_v17 = vld [vmem:[%s7166_s3 + $0x2d0] sm:$0xff]  ;;  %v3523_v18 = vld [vmem:[%s7166_s3 + $0x2e0] sm:$0xff] }
  0x1d   :  { %251 = vmatprep.mubr.f32.mxu0 %v4676_v3  ;;  %v3525_v23 = vld [vmem:[%s7166_s3 + $0x2f0] sm:$0xff]  ;;  %v3527_v24 = vld [vmem:[%s7166_s3 + $0x300] sm:$0xff] }
  0x1e   :  { %v3529_v29 = vld [vmem:[%s7166_s3 + $0x310] sm:$0xff]  ;;  %v3531_v30 = vld [vmem:[%s7166_s3 + $0x320] sm:$0xff] }
  0x1f   :  { %v3210_v10 = vld [vmem:[%s7170_s7 + $0x20] sm:$0xff] }
  0x20   :  { %3342 = vmatmul.mubr.msk.f32.gmra.mrb[10].mxu0 %vm77_vm3, %v4841_v34 }
  0x21   :  { %257 = vmatprep.mubr.f32.mxu0 %v4676_v3 }
  0x24   :  { %3343 = vmatmul.mubr.msk.f32.gmra.mrb[12].mxu0 %vm77_vm3, %v4849_v35 }
  0x25   :  { %263 = vmatprep.mubr.f32.mxu0 %v4676_v3 }
  0x28   :  { %3344 = vmatmul.mubr.msk.f32.gmra.mrb[14].mxu0 %vm77_vm3, %v4857_v36 }
  0x29   :  { %269 = vmatprep.mubr.f32.mxu0 %v4676_v3 }
  0x2c   :  { %3345 = vmatmul.mubr.msk.f32.gmra.mrb[16].mxu0 %vm77_vm3, %v4865_v37 }
  0x2d   :  { %275 = vmatprep.mubr.f32.mxu0 %v4676_v3 }
  0x30   :  { %3346 = vmatmul.mubr.msk.f32.gmra.mrb[18].mxu0 %vm77_vm3, %v4873_v38 }
  0x31   :  { %281 = vmatprep.mubr.f32.mxu0 %v4676_v3 }
  0x34   :  { %3347 = vmatmul.mubr.msk.f32.gmra.mrb[20].mxu0 %vm77_vm3, %v4881_v39 }
  0x35   :  { %287 = vmatprep.mubr.f32.mxu0 %v4676_v3 }
  0x38   :  { %3348 = vmatmul.mubr.msk.f32.gmra.mrb[22].mxu0 %vm77_vm3, %v4889_v40 }
  0x39   :  { %293 = vmatprep.mubr.f32.mxu0 %v4676_v3 }
  0x3c   :  { %3349 = vmatmul.mubr.msk.f32.gmra.mrb[24].mxu0 %vm77_vm3, %v4897_v41 }
  0x3d   :  { %299 = vmatprep.mubr.f32.mxu0 %v4676_v3 }
  0x40   :  { %3350 = vmatmul.mubr.msk.f32.gmra.mrb[26].mxu0 %vm77_vm3, %v4905_v42 }
  0x41   :  { %305 = vmatprep.mubr.f32.mxu0 %v4676_v3 }
  0x44   :  { %3351 = vmatmul.mubr.msk.f32.gmra.mrb[28].mxu0 %vm77_vm3, %v4913_v43 }
  0x45   :  { %311 = vmatprep.mubr.f32.mxu0 %v4676_v3 }
  0x48   :  { %3352 = vmatmul.mubr.msk.f32.gmra.mrb[30].mxu0 %vm77_vm3, %v4921_v44 }
  0x49   :  { %317 = vmatprep.mubr.f32.mxu0 %v4676_v3 }
  0x4c   :  { %3353 = vmatmul.mubr.msk.f32.gmra.mrb[32].mxu0 %vm77_vm3, %v4929_v45 }
  0x4d   :  { %323 = vmatprep.mubr.f32.mxu0 %v4676_v3 }
  0x50   :  { %3354 = vmatmul.mubr.msk.f32.gmra.mrb[34].mxu0 %vm77_vm3, %v4937_v46 }
  0x51   :  { %329 = vmatprep.mubr.f32.mxu0 %v4676_v3 }
  0x54   :  { %3355 = vmatmul.mubr.msk.f32.gmra.mrb[36].mxu0 %vm77_vm3, %v4945_v47 }
  0x55   :  { %335 = vmatprep.mubr.f32.mxu0 %v4676_v3 }
  0x58   :  { %3356 = vmatmul.mubr.msk.f32.gmra.mrb[38].mxu0 %vm77_vm3, %v4953_v48 }
  0x59   :  { %341 = vmatprep.mubr.f32.mxu0 %v4676_v3 }
  0x5c   :  { %3357 = vmatmul.mubr.msk.f32.gmra.mrb[40].mxu0 %vm77_vm3, %v4961_v49 }
  0x5d   :  { %347 = vmatprep.mubr.f32.mxu0 %v4676_v3 }
  0x60   :  { %3358 = vmatmul.mubr.msk.f32.gmra.mrb[42].mxu0 %vm77_vm3, %v4969_v50 }
  0x61   :  { %353 = vmatprep.mubr.f32.mxu0 %v4676_v3 }
  0x64   :  { %3359 = vmatmul.mubr.msk.f32.gmra.mrb[44].mxu0 %vm77_vm3, %v4977_v51 }
  0x65   :  { %359 = vmatprep.mubr.f32.mxu0 %v4676_v3 }
  0x68   :  { %3360 = vmatmul.mubr.msk.f32.gmra.mrb[46].mxu0 %vm77_vm3, %v4985_v52 }
  0x69   :  { %439 = vmatprep.mubr.f32.mxu0 %v4676_v3 }
  0x6c   :  { %3363 = vmatmul.mubr.msk.f32.vlgmr.msra.gmra.mrb[0].mxu0 %vm77_vm3, %v32_v57  ;;  %v3962_v57 = vpack.c.bf16 %v3507_v56, %v3505_v55  ;;  %v3541_v55 = vld [vmem:[%s7166_s3 + $0x370] sm:$0xff] }
  0x6d   :  { %3917 = vmatpush1.bf16.msra.mxu0 %v3916_v58  ;;  %445 = vmatprep.mubr.f32.mxu0 %v4676_v3  ;;  %v3510_v58 = vld [vmem:[%s7166_s3 + $0x278] sm:$0xff] }
  0x6e   :  { %3920 = vmatprep.subr.msk.bf16.mxu0 %vm4750_vm2, %v3918_v59  ;;  %v3512_v59 = vld [vmem:[%s7166_s3 + $0x288] sm:$0xff] }
  0x6f   :  { %v3964_v61 = vpack.c.bf16 %v3512_v59, %v3510_v58  ;;  %v3543_v58 = vld [vmem:[%s7166_s3 + $0x380] sm:$0xff] }
  0x70   :  { %3364 = vmatmul.mubr.msk.f32.gmra.mrb[2].mxu0 %vm77_vm3, %v4779_v19  ;;  %v3460_v19 = vld [vmem:[%s7164_s1 + $0x128] sm:$0xff] }
  0x71   :  { %451 = vmatprep.mubr.f32.mxu0 %v4676_v3  ;;  %3923 = vmatpush1.bf16.msk.msra.mxu0 %vm4750_vm2, %v3921_v0  ;;  %v3938_v22 = vpack.c.bf16 %v3462_v20, %v3460_v19  ;;  %v3516_v0 = vld [vmem:[%s7166_s3 + $0x2a8] sm:$0xff]  ;;  %v3526_v19 = vld [vmem:[%s7166_s3 + $0x2f8] sm:$0xff] }
  0x72   :  { %3925 = vmatprep.subr.bf16.mxu0 %v3924_v1  ;;  %v3966_v1 = vpack.c.bf16 %v3511_v62, %v3509_v60  ;;  %v3968_v2 = vpack.c.bf16 %v3516_v0, %v3514_v63  ;;  %v3528_v20 = vld [vmem:[%s7166_s3 + $0x308] sm:$0xff]  ;;  %v3998_v62 = vpack.c.bf16 %v3543_v58, %v3541_v55 }
  0x74   :  { %3365 = vmatmul.mubr.msk.f32.gmra.mrb[4].mxu0 %vm77_vm3, %v4799_v26 }
  0x75   :  { %457 = vmatprep.mubr.f32.mxu0 %v4676_v3 }
  0x78   :  { %3366 = vmatmul.mubr.msk.f32.gmra.mrb[6].mxu0 %vm77_vm3, %v4815_v31 }
  0x79   :  { %463 = vmatprep.mubr.f32.mxu0 %v4676_v3 }
  0x7c   :  { %3367 = vmatmul.mubr.msk.f32.gmra.mrb[8].mxu0 %vm77_vm3, %v4825_v32 }
  0x7d   :  { %469 = vmatprep.mubr.f32.mxu0 %v4676_v3 }
  0x80   :  { %3368 = vmatmul.mubr.msk.f32.gmra.mrb[10].mxu0 %vm77_vm3, %v4833_v33 }
  0x81   :  { %475 = vmatprep.mubr.f32.mxu0 %v4676_v3 }
  0x84   :  { %3369 = vmatmul.mubr.msk.f32.gmra.mrb[12].mxu0 %vm77_vm3, %v4841_v34 }
  0x85   :  { %481 = vmatprep.mubr.f32.mxu0 %v4676_v3 }
  0x88   :  { %3370 = vmatmul.mubr.msk.f32.gmra.mrb[14].mxu0 %vm77_vm3, %v4849_v35 }
  0x89   :  { %487 = vmatprep.mubr.f32.mxu0 %v4676_v3 }
  0x8c   :  { %3371 = vmatmul.mubr.msk.f32.gmra.mrb[16].mxu0 %vm77_vm3, %v4857_v36 }
  0x8d   :  { %493 = vmatprep.mubr.f32.mxu0 %v4676_v3 }
  0x90   :  { %3372 = vmatmul.mubr.msk.f32.gmra.mrb[18].mxu0 %vm77_vm3, %v4865_v37 }
  0x91   :  { %499 = vmatprep.mubr.f32.mxu0 %v4676_v3 }
  0x94   :  { %3373 = vmatmul.mubr.msk.f32.gmra.mrb[20].mxu0 %vm77_vm3, %v4873_v38 }
  0x95   :  { %505 = vmatprep.mubr.f32.mxu0 %v4676_v3 }
  0x98   :  { %3374 = vmatmul.mubr.msk.f32.gmra.mrb[22].mxu0 %vm77_vm3, %v4881_v39 }
  0x99   :  { %511 = vmatprep.mubr.f32.mxu0 %v4676_v3 }
  0x9c   :  { %3375 = vmatmul.mubr.msk.f32.gmra.mrb[24].mxu0 %vm77_vm3, %v4889_v40 }
  0x9d   :  { %517 = vmatprep.mubr.f32.mxu0 %v4676_v3 }
  0xa0   :  { %3376 = vmatmul.mubr.msk.f32.gmra.mrb[26].mxu0 %vm77_vm3, %v4897_v41 }
  0xa1   :  { %523 = vmatprep.mubr.f32.mxu0 %v4676_v3 }
  0xa4   :  { %3377 = vmatmul.mubr.msk.f32.gmra.mrb[28].mxu0 %vm77_vm3, %v4905_v42 }
  0xa5   :  { %529 = vmatprep.mubr.f32.mxu0 %v4676_v3 }
  0xa8   :  { %3378 = vmatmul.mubr.msk.f32.gmra.mrb[30].mxu0 %vm77_vm3, %v4913_v43 }
  0xa9   :  { %535 = vmatprep.mubr.f32.mxu0 %v4676_v3 }
  0xac   :  { %3379 = vmatmul.mubr.msk.f32.gmra.mrb[32].mxu0 %vm77_vm3, %v4921_v44 }
  0xad   :  { %541 = vmatprep.mubr.f32.mxu0 %v4676_v3 }
  0xb0   :  { %3380 = vmatmul.mubr.msk.f32.gmra.mrb[34].mxu0 %vm77_vm3, %v4929_v45 }
  0xb1   :  { %547 = vmatprep.mubr.f32.mxu0 %v4676_v3 }
  0xb4   :  { %3381 = vmatmul.mubr.msk.f32.gmra.mrb[36].mxu0 %vm77_vm3, %v4937_v46 }
  0xb5   :  { %553 = vmatprep.mubr.f32.mxu0 %v4676_v3 }
  0xb8   :  { %3382 = vmatmul.mubr.msk.f32.gmra.mrb[38].mxu0 %vm77_vm3, %v4945_v47 }
  0xb9   :  { %559 = vmatprep.mubr.f32.mxu0 %v4676_v3 }
  0xbc   :  { %3383 = vmatmul.mubr.msk.f32.gmra.mrb[40].mxu0 %vm77_vm3, %v4953_v48 }
  0xbd   :  { %565 = vmatprep.mubr.f32.mxu0 %v4676_v3 }
  0xc0   :  { %3384 = vmatmul.mubr.msk.f32.gmra.mrb[42].mxu0 %vm77_vm3, %v4961_v49 }
  0xc1   :  { %571 = vmatprep.mubr.f32.mxu0 %v4676_v3 }
  0xc4   :  { %3385 = vmatmul.mubr.msk.f32.gmra.mrb[44].mxu0 %vm77_vm3, %v4969_v50 }
  0xc5   :  { %577 = vmatprep.mubr.f32.mxu0 %v4676_v3 }
  0xc8   :  { %3386 = vmatmul.mubr.msk.f32.gmra.mrb[46].mxu0 %vm77_vm3, %v4977_v51 }
  0xc9   :  { %666 = vmatprep.mubr.f32.mxu0 %v4676_v3 }
  0xcc   :  { %3397 = vmatmul.mubr.msk.f32.vlgmr.msra.gmra.mrb[0].mxu0 %vm77_vm3, %v4799_v26  ;;  %v58_v26 = vld [vmem:[%s7165_s0 + $0xd0] sm:$0xff] }
  0xcd   :  { %3927 = vmatpush1.bf16.msra.mxu0 %v3926_v7  ;;  %672 = vmatprep.mubr.f32.mxu0 %v4676_v3  ;;  %v3520_v7 = vld [vmem:[%s7166_s3 + $0x2c8] sm:$0xff] }
  0xce   :  { %3930 = vmatprep.subr.msk.bf16.mxu0 %vm4750_vm2, %v3928_v8  ;;  %v3970_v8 = vpack.c.bf16 %v3515_v5, %v3513_v4  ;;  %v3972_v9 = vpack.c.bf16 %v3520_v7, %v3518_v6  ;;  %v3546_v6 = vld [vmem:[%s7166_s3 + $0x398] sm:$0x3f]  ;;  %v1651_v7 = vld [vmem:[%s7166_s3 + $0x8] sm:$0xff] }
  0xd0   :  { %3398 = vmatmul.mubr.msk.f32.gmra.mrb[2].mxu0 %vm77_vm3, %v4815_v31 }
  0xd1   :  { %678 = vmatprep.mubr.f32.mxu0 %v4676_v3  ;;  %3933 = vmatpush1.bf16.msk.msra.mxu0 %vm4750_vm2, %v3931_v14  ;;  %v3524_v14 = vld [vmem:[%s7166_s3 + $0x2e8] sm:$0xff] }
  0xd2   :  { %3935 = vmatprep.subr.bf16.mxu0 %v3934_v15  ;;  %v3974_v15 = vpack.c.bf16 %v3519_v12, %v3517_v11 }
  0xd4   :  { %3399 = vmatmul.mubr.msk.f32.gmra.mrb[4].mxu0 %vm77_vm3, %v4825_v32 }
  0xd5   :  { %684 = vmatprep.mubr.f32.mxu0 %v4676_v3 }
  0xd8   :  { %3400 = vmatmul.mubr.msk.f32.gmra.mrb[6].mxu0 %vm77_vm3, %v4833_v33 }
  0xd9   :  { %690 = vmatprep.mubr.f32.mxu0 %v4676_v3 }
  0xdc   :  { %3401 = vmatmul.mubr.msk.f32.gmra.mrb[8].mxu0 %vm77_vm3, %v4841_v34 }
  0xdd   :  { %696 = vmatprep.mubr.f32.mxu0 %v4676_v3 }
  0xe0   :  { %3402 = vmatmul.mubr.msk.f32.gmra.mrb[10].mxu0 %vm77_vm3, %v4849_v35 }
  0xe1   :  { %702 = vmatprep.mubr.f32.mxu0 %v4676_v3 }
  0xe4   :  { %3403 = vmatmul.mubr.msk.f32.gmra.mrb[12].mxu0 %vm77_vm3, %v4857_v36 }
  0xe5   :  { %708 = vmatprep.mubr.f32.mxu0 %v4676_v3 }
  0xe8   :  { %3404 = vmatmul.mubr.msk.f32.gmra.mrb[14].mxu0 %vm77_vm3, %v4865_v37 }
  0xe9   :  { %714 = vmatprep.mubr.f32.mxu0 %v4676_v3 }
  0xec   :  { %3405 = vmatmul.mubr.msk.f32.gmra.mrb[16].mxu0 %vm77_vm3, %v4873_v38 }
  0xed   :  { %720 = vmatprep.mubr.f32.mxu0 %v4676_v3 }
  0xf0   :  { %3406 = vmatmul.mubr.msk.f32.gmra.mrb[18].mxu0 %vm77_vm3, %v4881_v39 }
  0xf1   :  { %726 = vmatprep.mubr.f32.mxu0 %v4676_v3 }
  0xf4   :  { %3407 = vmatmul.mubr.msk.f32.gmra.mrb[20].mxu0 %vm77_vm3, %v4889_v40 }
  0xf5   :  { %732 = vmatprep.mubr.f32.mxu0 %v4676_v3 }
  0xf8   :  { %3408 = vmatmul.mubr.msk.f32.gmra.mrb[22].mxu0 %vm77_vm3, %v4897_v41 }
  0xf9   :  { %738 = vmatprep.mubr.f32.mxu0 %v4676_v3 }
  0xfc   :  { %3409 = vmatmul.mubr.msk.f32.gmra.mrb[24].mxu0 %vm77_vm3, %v4905_v42 }
  0xfd   :  { %744 = vmatprep.mubr.f32.mxu0 %v4676_v3 }
 0x100   :  { %3410 = vmatmul.mubr.msk.f32.gmra.mrb[26].mxu0 %vm77_vm3, %v4913_v43 }
 0x101   :  { %750 = vmatprep.mubr.f32.mxu0 %v4676_v3 }
 0x104   :  { %3411 = vmatmul.mubr.msk.f32.gmra.mrb[28].mxu0 %vm77_vm3, %v4921_v44 }
 0x105   :  { %756 = vmatprep.mubr.f32.mxu0 %v4676_v3 }
 0x108   :  { %3412 = vmatmul.mubr.msk.f32.gmra.mrb[30].mxu0 %vm77_vm3, %v4929_v45 }
 0x109   :  { %762 = vmatprep.mubr.f32.mxu0 %v4676_v3 }
 0x10c   :  { %3413 = vmatmul.mubr.msk.f32.gmra.mrb[32].mxu0 %vm77_vm3, %v4937_v46 }
 0x10d   :  { %768 = vmatprep.mubr.f32.mxu0 %v4676_v3 }
 0x110   :  { %3414 = vmatmul.mubr.msk.f32.gmra.mrb[34].mxu0 %vm77_vm3, %v4945_v47 }
 0x111   :  { %774 = vmatprep.mubr.f32.mxu0 %v4676_v3 }
 0x114   :  { %3415 = vmatmul.mubr.msk.f32.gmra.mrb[36].mxu0 %vm77_vm3, %v4953_v48 }
 0x115   :  { %780 = vmatprep.mubr.f32.mxu0 %v4676_v3 }
 0x118   :  { %3416 = vmatmul.mubr.msk.f32.gmra.mrb[38].mxu0 %vm77_vm3, %v4961_v49 }
 0x119   :  { %786 = vmatprep.mubr.f32.mxu0 %v4676_v3 }
 0x11c   :  { %3417 = vmatmul.mubr.msk.f32.gmra.mrb[40].mxu0 %vm77_vm3, %v4969_v50 }
 0x11d   :  { %792 = vmatprep.mubr.f32.mxu0 %v4676_v3 }
 0x120   :  { %3418 = vmatmul.mubr.msk.f32.gmra.mrb[42].mxu0 %vm77_vm3, %v4977_v51 }
 0x121   :  { %798 = vmatprep.mubr.f32.mxu0 %v4676_v3 }
 0x124   :  { %3419 = vmatmul.mubr.msk.f32.gmra.mrb[44].mxu0 %vm77_vm3, %v4985_v52 }
 0x125   :  { %804 = vmatprep.mubr.f32.mxu0 %v4676_v3 }
 0x128   :  { %3420 = vmatmul.mubr.msk.f32.gmra.mrb[46].mxu0 %vm77_vm3, %v5192_v16 }
 0x129   :  { %941 = vmatprep.mubr.f32.mxu0 %v4676_v3 }
 0x12c   :  { %3431 = vmatmul.mubr.msk.f32.vlgmr.msra.gmra.mrb[0].mxu0 %vm77_vm3, %v4815_v31  ;;  %v3489_v31 = vld [vmem:[%s7166_s3 + $0x1d0] sm:$0xff] }
 0x12d   :  { %3937 = vmatpush1.bf16.msra.mxu0 %v3936_v21  ;;  %947 = vmatprep.mubr.f32.mxu0 %v4676_v3  ;;  %v3978_v21 = vpack.c.bf16 %v3523_v18, %v3521_v17 }
 0x12e   :  { %3940 = vmatprep.subr.msk.bf16.mxu0 %vm4750_vm2, %v3938_v22  ;;  %v3980_v22 = vpack.c.bf16 %v3528_v20, %v3526_v19 }
 0x130   :  { %3432 = vmatmul.mubr.msk.f32.gmra.mrb[2].mxu0 %vm77_vm3, %v4825_v32 }
 0x131   :  { %953 = vmatprep.mubr.f32.mxu0 %v4676_v3  ;;  %3943 = vmatpush1.bf16.msk.msra.mxu0 %vm4750_vm2, %v3941_v25  ;;  %v3530_v25 = vld [vmem:[%s7166_s3 + $0x318] sm:$0xff] }
 0x134   :  { %3433 = vmatmul.mubr.msk.f32.gmra.mrb[4].mxu0 %vm77_vm3, %v4833_v33 }
 0x135   :  { %959 = vmatprep.mubr.f32.mxu0 %v4676_v3 }
 0x138   :  { %3434 = vmatmul.mubr.msk.f32.gmra.mrb[6].mxu0 %vm77_vm3, %v4841_v34 }
 0x139   :  { %965 = vmatprep.mubr.f32.mxu0 %v4676_v3 }
 0x13c   :  { %3435 = vmatmul.mubr.msk.f32.gmra.mrb[8].mxu0 %vm77_vm3, %v4849_v35 }
 0x13d   :  { %971 = vmatprep.mubr.f32.mxu0 %v4676_v3 }
 0x140   :  { %3436 = vmatmul.mubr.msk.f32.gmra.mrb[10].mxu0 %vm77_vm3, %v4857_v36 }
 0x141   :  { %977 = vmatprep.mubr.f32.mxu0 %v4676_v3 }
 0x144   :  { %3437 = vmatmul.mubr.msk.f32.gmra.mrb[12].mxu0 %vm77_vm3, %v4865_v37 }
 0x145   :  { %983 = vmatprep.mubr.f32.mxu0 %v4676_v3 }
 0x148   :  { %3438 = vmatmul.mubr.msk.f32.gmra.mrb[14].mxu0 %vm77_vm3, %v4873_v38 }
 0x149   :  { %989 = vmatprep.mubr.f32.mxu0 %v4676_v3 }
 0x14c   :  { %3439 = vmatmul.mubr.msk.f32.gmra.mrb[16].mxu0 %vm77_vm3, %v4881_v39 }
 0x14d   :  { %995 = vmatprep.mubr.f32.mxu0 %v4676_v3 }
 0x150   :  { %3440 = vmatmul.mubr.msk.f32.gmra.mrb[18].mxu0 %vm77_vm3, %v4889_v40 }
 0x151   :  { %1001 = vmatprep.mubr.f32.mxu0 %v4676_v3 }
 0x154   :  { %3441 = vmatmul.mubr.msk.f32.gmra.mrb[20].mxu0 %vm77_vm3, %v4897_v41 }
 0x155   :  { %1007 = vmatprep.mubr.f32.mxu0 %v4676_v3 }
 0x158   :  { %3442 = vmatmul.mubr.msk.f32.gmra.mrb[22].mxu0 %vm77_vm3, %v4905_v42 }
 0x159   :  { %1013 = vmatprep.mubr.f32.mxu0 %v4676_v3 }
 0x15c   :  { %3443 = vmatmul.mubr.msk.f32.gmra.mrb[24].mxu0 %vm77_vm3, %v4913_v43 }
 0x15d   :  { %1019 = vmatprep.mubr.f32.mxu0 %v4676_v3 }
 0x160   :  { %3444 = vmatmul.mubr.msk.f32.gmra.mrb[26].mxu0 %vm77_vm3, %v4921_v44 }
 0x161   :  { %1025 = vmatprep.mubr.f32.mxu0 %v4676_v3 }
 0x164   :  { %3445 = vmatmul.mubr.msk.f32.gmra.mrb[28].mxu0 %vm77_vm3, %v4929_v45 }
 0x165   :  { %1031 = vmatprep.mubr.f32.mxu0 %v4676_v3 }
 0x168   :  { %3446 = vmatmul.mubr.msk.f32.gmra.mrb[30].mxu0 %vm77_vm3, %v4937_v46 }
 0x169   :  { %1037 = vmatprep.mubr.f32.mxu0 %v4676_v3 }
 0x16c   :  { %3447 = vmatmul.mubr.msk.f32.gmra.mrb[32].mxu0 %vm77_vm3, %v4945_v47 }
 0x16d   :  { %1043 = vmatprep.mubr.f32.mxu0 %v4676_v3 }
 0x170   :  { %3448 = vmatmul.mubr.msk.f32.gmra.mrb[34].mxu0 %vm77_vm3, %v4953_v48 }
 0x171   :  { %1049 = vmatprep.mubr.f32.mxu0 %v4676_v3 }
 0x174   :  { %3449 = vmatmul.mubr.msk.f32.gmra.mrb[36].mxu0 %vm77_vm3, %v4961_v49 }
 0x175   :  { %1055 = vmatprep.mubr.f32.mxu0 %v4676_v3 }
 0x178   :  { %3450 = vmatmul.mubr.msk.f32.gmra.mrb[38].mxu0 %vm77_vm3, %v4969_v50 }
 0x179   :  { %1061 = vmatprep.mubr.f32.mxu0 %v4676_v3 }
 0x17c   :  { %3451 = vmatmul.mubr.msk.f32.gmra.mrb[40].mxu0 %vm77_vm3, %v4977_v51 }
 0x17d   :  { %1067 = vmatprep.mubr.f32.mxu0 %v4676_v3 }
 0x180   :  { %3452 = vmatmul.mubr.msk.f32.gmra.mrb[42].mxu0 %vm77_vm3, %v4985_v52 }
 0x181   :  { %1073 = vmatprep.mubr.f32.mxu0 %v4676_v3 }
 0x184   :  { %3453 = vmatmul.mubr.msk.f32.gmra.mrb[44].mxu0 %vm77_vm3, %v5192_v16 }
 0x185   :  { %1079 = vmatprep.mubr.f32.mxu0 %v4676_v3 }
 0x188   :  { %3454 = vmatmul.mubr.msk.f32.gmra.mrb[46].mxu0 %vm77_vm3, %v58_v26 }
 0x189   :  { %1216 = vmatprep.mubr.f32.mxu0 %v4676_v3 }
 0x18c   :  { %3465 = vmatmul.mubr.msk.f32.vlgmr.msra.gmra.mrb[0].mxu0 %vm77_vm3, %v4825_v32  ;;  %v3491_v32 = vld [vmem:[%s7166_s3 + $0x1e0] sm:$0xff] }
 0x18d   :  { %1222 = vmatprep.mubr.f32.mxu0 %v4676_v3 }
 0x190   :  { %3466 = vmatmul.mubr.msk.f32.gmra.mrb[2].mxu0 %vm77_vm3, %v4833_v33  ;;  %v3946_v33 = vpack.c.bf16 %v3491_v32, %v3489_v31  ;;  %v1411_v31 = vlaneseq  ;;  %v3534_v32 = vld [vmem:[%s7166_s3 + $0x338] sm:$0xff] }
 0x191   :  { %1228 = vmatprep.mubr.f32.mxu0 %v4676_v3 }
 0x192   :  { %3947 = vmatpush1.bf16.msra.mxu1 %v3946_v33  ;;  %v3536_v33 = vld [vmem:[%s7166_s3 + $0x348] sm:$0xff] }
 0x194   :  { %3467 = vmatmul.mubr.msk.f32.gmra.mrb[4].mxu0 %vm77_vm3, %v4841_v34  ;;  %v3494_v34 = vld [vmem:[%s7166_s3 + $0x1f8] sm:$0xff] }
 0x195   :  { %1234 = vmatprep.mubr.f32.mxu0 %v4676_v3 }
 0x198   :  { %3468 = vmatmul.mubr.msk.f32.gmra.mrb[6].mxu0 %vm77_vm3, %v4849_v35  ;;  %v3496_v35 = vld [vmem:[%s7166_s3 + $0x208] sm:$0xff] }
 0x199   :  { %1240 = vmatprep.mubr.f32.mxu0 %v4676_v3 }
 0x19c   :  { %3469 = vmatmul.mubr.msk.f32.gmra.mrb[8].mxu0 %vm77_vm3, %v4857_v36  ;;  %v3948_v36 = vpack.c.bf16 %v3496_v35, %v3494_v34  ;;  %v3986_v34 = vpack.c.bf16 %v3531_v30, %v3529_v29  ;;  %v3988_v35 = vpack.c.bf16 %v3536_v33, %v3534_v32 }
 0x19d   :  { %1246 = vmatprep.mubr.f32.mxu0 %v4676_v3 }
 0x19e   :  { %3949 = vmatprep.subr.bf16.mxu1 %v3948_v36  ;;  %v3533_v36 = vld [vmem:[%s7166_s3 + $0x330] sm:$0xff] }
 0x1a0   :  { %3470 = vmatmul.mubr.msk.f32.gmra.mrb[10].mxu0 %vm77_vm3, %v4865_v37  ;;  %v3493_v37 = vld [vmem:[%s7166_s3 + $0x1f0] sm:$0xff] }
 0x1a1   :  { %1252 = vmatprep.mubr.f32.mxu0 %v4676_v3 }
 0x1a4   :  { %3471 = vmatmul.mubr.msk.f32.gmra.mrb[12].mxu0 %vm77_vm3, %v4873_v38  ;;  %v3495_v38 = vld [vmem:[%s7166_s3 + $0x200] sm:$0xff] }
 0x1a5   :  { %1258 = vmatprep.mubr.f32.mxu0 %v4676_v3 }
 0x1a8   :  { %3472 = vmatmul.mubr.msk.f32.gmra.mrb[14].mxu0 %vm77_vm3, %v4881_v39  ;;  %v3950_v39 = vpack.c.bf16 %v3495_v38, %v3493_v37  ;;  %v3535_v37 = vld [vmem:[%s7166_s3 + $0x340] sm:$0xff]  ;;  %v1412_v38 = vshrl.u32 %v1411_v31, 7 }
 0x1a9   :  { %1264 = vmatprep.mubr.f32.mxu0 %v4676_v3 }
 0x1aa   :  { %3951 = vmatpush1.bf16.msra.mxu1 %v3950_v39  ;;  %v3538_v39 = vld [vmem:[%s7166_s3 + $0x358] sm:$0xff] }
 0x1ac   :  { %3473 = vmatmul.mubr.msk.f32.gmra.mrb[16].mxu0 %vm77_vm3, %v4889_v40  ;;  %v3498_v40 = vld [vmem:[%s7166_s3 + $0x218] sm:$0xff] }
 0x1ad   :  { %1270 = vmatprep.mubr.f32.mxu0 %v4676_v3 }
 0x1b0   :  { %3474 = vmatmul.mubr.msk.f32.gmra.mrb[18].mxu0 %vm77_vm3, %v4897_v41  ;;  %v3500_v41 = vld [vmem:[%s7166_s3 + $0x228] sm:$0xff] }
 0x1b1   :  { %1276 = vmatprep.mubr.f32.mxu0 %v4676_v3 }
 0x1b4   :  { %3475 = vmatmul.mubr.msk.f32.gmra.mrb[20].mxu0 %vm77_vm3, %v4905_v42  ;;  %v3952_v42 = vpack.c.bf16 %v3500_v41, %v3498_v40  ;;  %v3540_v40 = vld [vmem:[%s7166_s3 + $0x368] sm:$0xff]  ;;  %v3990_v41 = vpack.c.bf16 %v3535_v37, %v3533_v36 }
 0x1b5   :  { %1282 = vmatprep.mubr.f32.mxu0 %v4676_v3 }
 0x1b6   :  { %3953 = vmatprep.subr.bf16.mxu1 %v3952_v42  ;;  %v3992_v42 = vpack.c.bf16 %v3540_v40, %v3538_v39 }
 0x1b8   :  { %3476 = vmatmul.mubr.msk.f32.gmra.mrb[22].mxu0 %vm77_vm3, %v4913_v43  ;;  %v3497_v43 = vld [vmem:[%s7166_s3 + $0x210] sm:$0xff] }
 0x1b9   :  { %1288 = vmatprep.mubr.f32.mxu0 %v4676_v3 }
 0x1bc   :  { %3477 = vmatmul.mubr.msk.f32.gmra.mrb[24].mxu0 %vm77_vm3, %v4921_v44  ;;  %v3499_v44 = vld [vmem:[%s7166_s3 + $0x220] sm:$0xff] }
 0x1bd   :  { %1294 = vmatprep.mubr.f32.mxu0 %v4676_v3 }
 0x1c0   :  { %3478 = vmatmul.mubr.msk.f32.gmra.mrb[26].mxu0 %vm77_vm3, %v4929_v45  ;;  %v3954_v45 = vpack.c.bf16 %v3499_v44, %v3497_v43  ;;  %v3537_v43 = vld [vmem:[%s7166_s3 + $0x350] sm:$0xff]  ;;  %v3539_v44 = vld [vmem:[%s7166_s3 + $0x360] sm:$0xff] }
 0x1c1   :  { %1300 = vmatprep.mubr.f32.mxu0 %v4676_v3 }
 0x1c2   :  { %3955 = vmatpush1.bf16.msra.mxu1 %v3954_v45  ;;  %v5521_v45 = vsub.s32 0, %v1412_v38 }
 0x1c4   :  { %3479 = vmatmul.mubr.msk.f32.gmra.mrb[28].mxu0 %vm77_vm3, %v4937_v46  ;;  %v3502_v46 = vld [vmem:[%s7166_s3 + $0x238] sm:$0xff] }
 0x1c5   :  { %1306 = vmatprep.mubr.f32.mxu0 %v4676_v3 }
 0x1c8   :  { %3480 = vmatmul.mubr.msk.f32.gmra.mrb[30].mxu0 %vm77_vm3, %v4945_v47  ;;  %v3504_v47 = vld [vmem:[%s7166_s3 + $0x248] sm:$0xff] }
 0x1c9   :  { %1312 = vmatprep.mubr.f32.mxu0 %v4676_v3 }
 0x1cc   :  { %3481 = vmatmul.mubr.msk.f32.gmra.mrb[32].mxu0 %vm77_vm3, %v4953_v48  ;;  %v3956_v48 = vpack.c.bf16 %v3504_v47, %v3502_v46  ;;  %v1409_v46 = vld [vmem:[%s7167_s2] sm:$0x3]  ;;  %v5526_v47 = vsub.s32 1, %v1412_v38 }
 0x1cd   :  { %1318 = vmatprep.mubr.f32.mxu0 %v4676_v3 }
 0x1ce   :  { %3957 = vmatprep.subr.bf16.mxu1 %v3956_v48  ;;  %v3994_v48 = vpack.c.bf16 %v3539_v44, %v3537_v43 }
 0x1d0   :  { %3482 = vmatmul.mubr.msk.f32.gmra.mrb[34].mxu0 %vm77_vm3, %v4961_v49  ;;  %v3501_v49 = vld [vmem:[%s7166_s3 + $0x230] sm:$0xff] }
 0x1d1   :  { %1324 = vmatprep.mubr.f32.mxu0 %v4676_v3 }
 0x1d4   :  { %3483 = vmatmul.mubr.msk.f32.gmra.mrb[36].mxu0 %vm77_vm3, %v4969_v50  ;;  %v3503_v50 = vld [vmem:[%s7166_s3 + $0x240] sm:$0xff] }
 0x1d5   :  { %1330 = vmatprep.mubr.f32.mxu0 %v4676_v3 }
 0x1d8   :  { %3484 = vmatmul.mubr.msk.f32.gmra.mrb[38].mxu0 %vm77_vm3, %v4977_v51  ;;  %v3958_v51 = vpack.c.bf16 %v3503_v50, %v3501_v49  ;;  %v5529_v50 = vrot.slane %v1409_v46, %v5521_v45 }
 0x1d9   :  { %1336 = vmatprep.mubr.f32.mxu0 %v4676_v3 }
 0x1da   :  { %3959 = vmatpush1.bf16.msra.mxu1 %v3958_v51 }
 0x1dc   :  { %3485 = vmatmul.mubr.msk.f32.gmra.mrb[40].mxu0 %vm77_vm3, %v4985_v52  ;;  %v3506_v52 = vld [vmem:[%s7166_s3 + $0x258] sm:$0xff] }
 0x1dd   :  { %1342 = vmatprep.mubr.f32.mxu0 %v4676_v3  ;;  %v3960_v54 = vpack.c.bf16 %v3508_v53, %v3506_v52  ;;  %v5532_v52 = vrot.slane %v1409_v46, %v5526_v47  ;;  %v3542_v53 = vld [vmem:[%s7166_s3 + $0x378] sm:$0xff] }
 0x1df   :  { %3961 = vmatprep.subr.bf16.mxu1 %v3960_v54  ;;  %v3544_v54 = vld [vmem:[%s7166_s3 + $0x388] sm:$0xff] }
 0x1e0   :  { %3486 = vmatmul.mubr.msk.f32.gmra.mrb[42].mxu0 %vm77_vm3, %v5192_v16  ;;  %3963 = vmatpush1.bf16.msra.mxu1 %v3962_v57  ;;  %v3976_v16 = vpack.c.bf16 %v3524_v14, %v3522_v13  ;;  %v3996_v57 = vpack.c.bf16 %v3544_v54, %v3542_v53 }
 0x1e1   :  { %1348 = vmatprep.mubr.f32.mxu0 %v4676_v3  ;;  %3965 = vmatprep.subr.bf16.mxu1 %v3964_v61 }
 0x1e4   :  { %3487 = vmatmul.mubr.msk.f32.gmra.mrb[44].mxu0 %vm77_vm3, %v58_v26  ;;  %3967 = vmatpush1.bf16.msra.mxu1 %v3966_v1  ;;  %v3532_v26 = vld [vmem:[%s7166_s3 + $0x328] sm:$0xff] }
 0x1e5   :  { %1354 = vmatprep.mubr.f32.mxu0 %v4676_v3  ;;  %3969 = vmatprep.subr.bf16.mxu1 %v3968_v2  ;;  %v3984_v28 = vpack.c.bf16 %v3532_v26, %v3530_v25 }
 0x1e8   :  { %3488 = vmatmul.mubr.msk.f32.gmra.mrb[46].mxu0 %vm77_vm3, %v59_v27  ;;  %3971 = vmatpush1.bf16.msra.mxu1 %v3970_v8  ;;  %v3982_v27 = vpack.c.bf16 %v3527_v24, %v3525_v23  ;;  %v1653_v8 = vld [vmem:[%s7166_s3 + $0x18] sm:$0xff] }
 0x1e9   :  { %3973 = vmatprep.subr.bf16.mxu1 %v3972_v9  ;;  %v3545_v9 = vld [vmem:[%s7166_s3 + $0x390] sm:$0x3f]  ;;  %v4000_v11 = vpack.c.bf16 %v1653_v8, %v1651_v7 }
 0x1ec   :  { %3975 = vmatpush1.bf16.msra.mxu1 %v3974_v15 }
 0x1ed   :  { %3977 = vmatprep.subr.bf16.mxu1 %v3976_v16 }
 0x1f0   :  { %3979 = vmatpush1.bf16.msra.mxu1 %v3978_v21 }
 0x1f1   :  { %3981 = vmatprep.subr.bf16.mxu1 %v3980_v22 }
 0x1f4   :  { %3983 = vmatpush1.bf16.msra.mxu1 %v3982_v27 }
 0x1f5   :  { %3985 = vmatprep.subr.bf16.mxu1 %v3984_v28 }
 0x1f8   :  { %3987 = vmatpush1.bf16.msra.mxu1 %v3986_v34 }
 0x1f9   :  { %3989 = vmatprep.subr.bf16.mxu1 %v3988_v35 }
 0x1fc   :  { %3991 = vmatpush1.bf16.msra.mxu1 %v3990_v41 }
 0x1fd   :  { %3993 = vmatprep.subr.bf16.mxu1 %v3992_v42 }
 0x200   :  { %3995 = vmatpush1.bf16.msra.mxu1 %v3994_v48 }
 0x201   :  { %3997 = vmatprep.subr.bf16.mxu1 %v3996_v57 }
 0x204   :  { %3999 = vmatpush1.bf16.msra.mxu1 %v3998_v62 }
 0x205   :  { %3547 = vmatprep.subr.msk.mxu1 %vm1792_vm4, %v3546_v6 }
 0x208   :  { %3548 = vmatpush1.msk.msra.mxu1 %vm1792_vm4, %v3545_v9 }
 0x209   :  { %4001 = vmatprep.subr.bf16.mxu1 %v4000_v11 }
 0x25f   :  { %v1218_v49 = vpop.f32.mrb[0].mxu0 }
 0x260   :  { %v1220_v51 = vpop.f32.mrb[1].mxu0  ;;  %v1421_v59 = vadd.f32 %v5529_v50, %v1218_v49 }
 0x261   :  { %v1422_v63 = vadd.f32 %v5532_v52, %v1220_v51 }
 0x263   :  { %v1224_v56 = vpop.f32.mrb[2].mxu0 }
 0x264   :  { %v1423_v60 = vadd.f32 %v5529_v50, %v1224_v56  ;;  %v1226_v61 = vpop.f32.mrb[3].mxu0 }
 0x265   :  { %v1424_v0 = vadd.f32 %v5532_v52, %v1226_v61 }
 0x266   :  { %v5550_v1 = vmax.f32 %v1421_v59, %v1423_v60 }
 0x267   :  { %v5552_v2 = vmax.f32 %v1422_v63, %v1424_v0  ;;  %v1230_v4 = vpop.f32.mrb[4].mxu0 }
 0x268   :  { %v1232_v5 = vpop.f32.mrb[5].mxu0  ;;  %v1425_v13 = vadd.f32 %v5529_v50, %v1230_v4 }
 0x269   :  { %v1426_v16 = vadd.f32 %v5532_v52, %v1232_v5 }
 0x26b   :  { %v1236_v12 = vpop.f32.mrb[6].mxu0 }
 0x26c   :  { %v1427_v14 = vadd.f32 %v5529_v50, %v1236_v12  ;;  %v1238_v15 = vpop.f32.mrb[7].mxu0 }
 0x26d   :  { %v1428_v17 = vadd.f32 %v5532_v52, %v1238_v15 }
 0x26e   :  { %v5572_v18 = vmax.f32 %v1425_v13, %v1427_v14 }
 0x26f   :  { %v5574_v19 = vmax.f32 %v1426_v16, %v1428_v17  ;;  %v1242_v20 = vpop.f32.mrb[8].mxu0 }
 0x270   :  { %1521 = vrot.lane.b32.xlu0 %v5572_v18, %s4678_s24  ;;  %v1244_v21 = vpop.f32.mrb[9].mxu0  ;;  %v1429_v23 = vadd.f32 %v5529_v50, %v1242_v20 }
 0x271   :  { %v1430_v26 = vadd.f32 %v5532_v52, %v1244_v21 }
 0x273   :  { %v1248_v22 = vpop.f32.mrb[10].mxu0 }
 0x274   :  { %v1431_v24 = vadd.f32 %v5529_v50, %v1248_v22  ;;  %1523 = vrot.lane.b32.xlu0 %v5574_v19, %s4678_s24  ;;  %v1250_v25 = vpop.f32.mrb[11].mxu0 }
 0x275   :  { %v1432_v27 = vadd.f32 %v5532_v52, %v1250_v25 }
 0x276   :  { %v5584_v28 = vmax.f32 %v1429_v23, %v1431_v24 }
 0x277   :  { %v5586_v29 = vmax.f32 %v1430_v26, %v1432_v27  ;;  %v1254_v30 = vpop.f32.mrb[12].mxu0 }
 0x278   :  { %1525 = vrot.lane.b32.xlu1 %v5584_v28, %s4678_s24  ;;  %v1256_v31 = vpop.f32.mrb[13].mxu0  ;;  %v1433_v33 = vadd.f32 %v5529_v50, %v1254_v30 }
 0x279   :  { %v1434_v36 = vadd.f32 %v5532_v52, %v1256_v31 }
 0x27b   :  { %v1260_v32 = vpop.f32.mrb[14].mxu0 }
 0x27c   :  { %v1435_v34 = vadd.f32 %v5529_v50, %v1260_v32  ;;  %1527 = vrot.lane.b32.xlu1 %v5586_v29, %s4678_s24  ;;  %v1262_v35 = vpop.f32.mrb[15].mxu0 }
 0x27d   :  { %v1436_v37 = vadd.f32 %v5532_v52, %v1262_v35 }
 0x27e   :  { %v5596_v38 = vmax.f32 %v1433_v33, %v1435_v34 }
 0x27f   :  { %v5598_v39 = vmax.f32 %v1434_v36, %v1436_v37  ;;  %v1266_v40 = vpop.f32.mrb[16].mxu0 }
 0x280   :  { %1529 = vrot.lane.b32.xlu0 %v5596_v38, %s4678_s24  ;;  %v1268_v41 = vpop.f32.mrb[17].mxu0  ;;  %v1437_v43 = vadd.f32 %v5529_v50, %v1266_v40 }
 0x281   :  { %1531 = vrot.lane.b32.xlu1 %v5598_v39, %s4678_s24  ;;  %v1438_v48 = vadd.f32 %v5532_v52, %v1268_v41 }
 0x283   :  { %v1272_v42 = vpop.f32.mrb[18].mxu0 }
 0x284   :  { %v1439_v44 = vadd.f32 %v5529_v50, %v1272_v42  ;;  %v1274_v46 = vpop.f32.mrb[19].mxu0 }
 0x285   :  { %v1440_v49 = vadd.f32 %v5532_v52, %v1274_v46 }
 0x286   :  { %v5608_v51 = vmax.f32 %v1437_v43, %v1439_v44 }
 0x287   :  { %v5610_v53 = vmax.f32 %v1438_v48, %v1440_v49  ;;  %v1278_v54 = vpop.f32.mrb[20].mxu0 }
 0x288   :  { %1533 = vrot.lane.b32.xlu0 %v5608_v51, %s4678_s24  ;;  %v1280_v55 = vpop.f32.mrb[21].mxu0  ;;  %v1441_v57 = vadd.f32 %v5529_v50, %v1278_v54 }
 0x289   :  { %1535 = vrot.lane.b32.xlu1 %v5610_v53, %s4678_s24  ;;  %v1442_v60 = vadd.f32 %v5532_v52, %v1280_v55 }
 0x28b   :  { %v1284_v56 = vpop.f32.mrb[22].mxu0 }
 0x28c   :  { %v1443_v58 = vadd.f32 %v5529_v50, %v1284_v56  ;;  %v1286_v59 = vpop.f32.mrb[23].mxu0 }
 0x28d   :  { %v1444_v61 = vadd.f32 %v5532_v52, %v1286_v59 }
 0x28e   :  { %v5620_v62 = vmax.f32 %v1441_v57, %v1443_v58 }
 0x28f   :  { %v5622_v63 = vmax.f32 %v1442_v60, %v1444_v61  ;;  %v1290_v0 = vpop.f32.mrb[24].mxu0 }
 0x290   :  { %1537 = vrot.lane.b32.xlu0 %v5620_v62, %s4678_s24  ;;  %v1292_v4 = vpop.f32.mrb[25].mxu0  ;;  %v1445_v6 = vadd.f32 %v5529_v50, %v1290_v0 }
 0x291   :  { %1539 = vrot.lane.b32.xlu1 %v5622_v63, %s4678_s24  ;;  %v1446_v9 = vadd.f32 %v5532_v52, %v1292_v4 }
 0x293   :  { %v1296_v5 = vpop.f32.mrb[26].mxu0 }
 0x294   :  { %v1447_v7 = vadd.f32 %v5529_v50, %v1296_v5  ;;  %v1298_v8 = vpop.f32.mrb[27].mxu0 }
 0x295   :  { %v1448_v11 = vadd.f32 %v5532_v52, %v1298_v8 }
 0x296   :  { %v5632_v12 = vmax.f32 %v1445_v6, %v1447_v7 }
 0x297   :  { %v5634_v13 = vmax.f32 %v1446_v9, %v1448_v11  ;;  %v1302_v14 = vpop.f32.mrb[28].mxu0 }
 0x298   :  { %1541 = vrot.lane.b32.xlu0 %v5632_v12, %s4678_s24  ;;  %v1304_v15 = vpop.f32.mrb[29].mxu0  ;;  %v1449_v17 = vadd.f32 %v5529_v50, %v1302_v14 }
 0x299   :  { %1543 = vrot.lane.b32.xlu1 %v5634_v13, %s4678_s24  ;;  %v1450_v22 = vadd.f32 %v5532_v52, %v1304_v15 }
 0x29b   :  { %v1308_v16 = vpop.f32.mrb[30].mxu0 }
 0x29c   :  { %v1451_v20 = vadd.f32 %v5529_v50, %v1308_v16  ;;  %v1310_v21 = vpop.f32.mrb[31].mxu0 }
 0x29d   :  { %v1452_v23 = vadd.f32 %v5532_v52, %v1310_v21 }
 0x29e   :  { %v5644_v24 = vmax.f32 %v1449_v17, %v1451_v20 }
 0x29f   :  { %v5646_v25 = vmax.f32 %v1450_v22, %v1452_v23  ;;  %v1314_v26 = vpop.f32.mrb[32].mxu0 }
 0x2a0   :  { %1545 = vrot.lane.b32.xlu0 %v5644_v24, %s4678_s24  ;;  %v1316_v27 = vpop.f32.mrb[33].mxu0  ;;  %v1453_v31 = vadd.f32 %v5529_v50, %v1314_v26 }
 0x2a1   :  { %1547 = vrot.lane.b32.xlu1 %v5646_v25, %s4678_s24  ;;  %v1454_v34 = vadd.f32 %v5532_v52, %v1316_v27 }
 0x2a3   :  { %v1320_v30 = vpop.f32.mrb[34].mxu0 }
 0x2a4   :  { %v1455_v32 = vadd.f32 %v5529_v50, %v1320_v30  ;;  %v1322_v33 = vpop.f32.mrb[35].mxu0  ;;  %v1655_v30 = vld [vmem:[%s7166_s3 + $0x28] sm:$0xff] }
 0x2a5   :  { %v1456_v35 = vadd.f32 %v5532_v52, %v1322_v33 }
 0x2a6   :  { %v5656_v36 = vmax.f32 %v1453_v31, %v1455_v32  ;;  %v1657_v31 = vld [vmem:[%s7166_s3 + $0x38] sm:$0xff] }
 0x2a7   :  { %v5658_v37 = vmax.f32 %v1454_v34, %v1456_v35  ;;  %v1326_v40 = vpop.f32.mrb[36].mxu0 }
 0x2a8   :  { %1549 = vrot.lane.b32.xlu0 %v5656_v36, %s4678_s24  ;;  %v1328_v41 = vpop.f32.mrb[37].mxu0  ;;  %v1457_v43 = vadd.f32 %v5529_v50, %v1326_v40 }
 0x2a9   :  { %1551 = vrot.lane.b32.xlu1 %v5658_v37, %s4678_s24  ;;  %v1458_v48 = vadd.f32 %v5532_v52, %v1328_v41  ;;  %v4004_v41 = vpack.c.bf16 %v1657_v31, %v1655_v30 }
 0x2ab   :  { %v1332_v42 = vpop.f32.mrb[38].mxu0 }
 0x2ac   :  { %v1459_v44 = vadd.f32 %v5529_v50, %v1332_v42  ;;  %1517 = vrot.lane.b32.xlu0 %v5550_v1, %s4678_s24  ;;  %v1334_v46 = vpop.f32.mrb[39].mxu0  ;;  %v1656_v42 = vld [vmem:[%s7166_s3 + $0x30] sm:$0xff] }
 0x2ad   :  { %v1460_v49 = vadd.f32 %v5532_v52, %v1334_v46  ;;  %1519 = vrot.lane.b32.xlu1 %v5552_v2, %s4678_s24 }
 0x2ae   :  { %v5672_v54 = vmax.f32 %v1457_v43, %v1459_v44  ;;  %v1661_v43 = vld [vmem:[%s7166_s3 + $0x58] sm:$0xff] }
 0x2af   :  { %v5674_v55 = vmax.f32 %v1458_v48, %v1460_v49  ;;  %v1338_v56 = vpop.f32.mrb[40].mxu0  ;;  %v1658_v49 = vld [vmem:[%s7166_s3 + $0x40] sm:$0xff] }
 0x2b0   :  { %1553 = vrot.lane.b32.xlu0 %v5672_v54, %s4678_s24  ;;  %v1340_v57 = vpop.f32.mrb[41].mxu0  ;;  %v1461_v59 = vadd.f32 %v5529_v50, %v1338_v56  ;;  %v1660_v56 = vld [vmem:[%s7166_s3 + $0x50] sm:$0xff] }
 0x2b1   :  { %1555 = vrot.lane.b32.xlu1 %v5674_v55, %s4678_s24  ;;  %v1462_v0 = vadd.f32 %v5532_v52, %v1340_v57 }
 0x2b3   :  { %v1344_v58 = vpop.f32.mrb[42].mxu0 }
 0x2b4   :  { %v1463_v60 = vadd.f32 %v5529_v50, %v1344_v58  ;;  %v1346_v61 = vpop.f32.mrb[43].mxu0 }
 0x2b5   :  { %v1464_v4 = vadd.f32 %v5532_v52, %v1346_v61 }
 0x2b6   :  { %v5684_v5 = vmax.f32 %v1461_v59, %v1463_v60  ;;  %v1663_v59 = vld [vmem:[%s7166_s3 + $0x68] sm:$0xff]  ;;  %v1665_v60 = vld [vmem:[%s7166_s3 + $0x78] sm:$0xff] }
 0x2b7   :  { %v5686_v6 = vmax.f32 %v1462_v0, %v1464_v4  ;;  %v1350_v7 = vpop.f32.mrb[44].mxu0  ;;  %v4010_v4 = vpack.c.bf16 %v1660_v56, %v1658_v49 }
 0x2b8   :  { %1557 = vrot.lane.b32.xlu0 %v5684_v5, %s4678_s24  ;;  %v1352_v8 = vpop.f32.mrb[45].mxu0  ;;  %v1465_v11 = vadd.f32 %v5529_v50, %v1350_v7 }
 0x2b9   :  { %1559 = vrot.lane.b32.xlu1 %v5686_v6, %s4678_s24  ;;  %v1466_v16 = vadd.f32 %v5532_v52, %v1352_v8 }
 0x2bb   :  { %v1356_v9 = vpop.f32.mrb[46].mxu0 }
 0x2bc   :  { %v1467_v14 = vadd.f32 %v5529_v50, %v1356_v9  ;;  %v1358_v15 = vpop.f32.mrb[47].mxu0  ;;  %v1650_v50 = vld [vmem:[%s7166_s3] sm:$0xff]  ;;  %v4012_v9 = vpack.c.bf16 %v1665_v60, %v1663_v59 }
 0x2bd   :  { %v1468_v17 = vadd.f32 %v5532_v52, %v1358_v15  ;;  %v1652_v52 = vld [vmem:[%s7166_s3 + $0x10] sm:$0xff]  ;;  %v1669_v15 = vld [vmem:[%s7166_s3 + $0x98] sm:$0xff] }
 0x2be   :  { %v5696_v20 = vmax.f32 %v1465_v11, %v1467_v14  ;;  %v4002_v34 = vpack.c.bf16 %v1652_v52, %v1650_v50  ;;  %v1664_v11 = vld [vmem:[%s7166_s3 + $0x70] sm:$0xff]  ;;  %v1667_v14 = vld [vmem:[%s7166_s3 + $0x88] sm:$0xff] }
 0x2bf   :  { %v5698_v21 = vmax.f32 %v1466_v16, %v1468_v17  ;;  %v4016_v52 = vpack.c.bf16 %v1669_v15, %v1667_v14 }
 0x2c0   :  { %1561 = vrot.lane.b32.xlu0 %v5696_v20, %s4678_s24 }
 0x2c1   :  { %1563 = vrot.lane.b32.xlu1 %v5698_v21, %s4678_s24 }
 0x2e2   :  { %v1522_v22 = vpop.permute.xlu0 %1521 }
 0x2e6   :  { %v1524_v23 = vpop.permute.xlu0 %1523 }
 0x2e7   :  { %v1567_v26 = vsel %vm1565_vm5, %v1522_v22, %v1524_v23  ;;  %v1605_v27 = vmax.f32 %v5574_v19, %v1524_v23  ;;  %v1654_v19 = vld [vmem:[%s7166_s3 + $0x20] sm:$0xff] }
 0x2e8   :  { %v1604_v32 = vmax.f32 %v5572_v18, %v1567_v26  ;;  %v1659_v18 = vld [vmem:[%s7166_s3 + $0x48] sm:$0xff]  ;;  %v4006_v44 = vpack.c.bf16 %v1656_v42, %v1654_v19  ;;  %v1666_v26 = vld [vmem:[%s7166_s3 + $0x80] sm:$0xff] }
 0x2e9   :  { %v5719_v33 = vmax.f32 %v1605_v27, 0.0  ;;  %v4008_v48 = vpack.c.bf16 %v1661_v43, %v1659_v18  ;;  %v1668_v27 = vld [vmem:[%s7166_s3 + $0x90] sm:$0xff]  ;;  %v1675_v42 = vld [vmem:[%s7166_s3 + $0xc8] sm:$0xff]  ;;  %v1677_v18 = vld [vmem:[%s7166_s3 + $0xd8] sm:$0xff] }
 0x2ea   :  { %v5721_v35 = vmax.f32 %v1604_v32, 0.0  ;;  %v1526_v40 = vpop.permute.xlu1 %1525  ;;  %v4018_v31 = vpack.c.bf16 %v1668_v27, %v1666_v26  ;;  %v4024_v56 = vpack.c.bf16 %v1677_v18, %v1675_v42  ;;  %v1684_v26 = vld [vmem:[%s7166_s3 + $0x110] sm:$0xff] }
 0x2eb   :  { %3549 = vmatprep.mubr.msk.f32.mxu1 %vm1767_vm6, %v5719_v33 }
 0x2ec   :  { %1864 = vmatmul.mubr.f32.vlgmr.msra.gmra.mrb[0].mxu1 %v5721_v35 }
 0x2ed   :  { %4003 = vmatpush1.bf16.msra.mxu1 %v4002_v34 }
 0x2ee   :  { %v1528_v46 = vpop.permute.xlu1 %1527  ;;  %4005 = vmatprep.subr.bf16.mxu1 %v4004_v41  ;;  %v1672_v41 = vld [vmem:[%s7166_s3 + $0xb0] sm:$0xff] }
 0x2ef   :  { %v1568_v57 = vsel %vm1565_vm5, %v1526_v40, %v1528_v46  ;;  %v1607_v58 = vmax.f32 %v5586_v29, %v1528_v46  ;;  %v1662_v29 = vld [vmem:[%s7166_s3 + $0x60] sm:$0xff] }
 0x2f0   :  { %v1606_v61 = vmax.f32 %v5584_v28, %v1568_v57  ;;  %v4014_v23 = vpack.c.bf16 %v1664_v11, %v1662_v29  ;;  %v1670_v40 = vld [vmem:[%s7166_s3 + $0xa0] sm:$0xff]  ;;  %v1683_v11 = vld [vmem:[%s7166_s3 + $0x108] sm:$0xff] }
 0x2f1   :  { %v5753_v0 = vmax.f32 %v1607_v58, 0.0  ;;  %4007 = vmatpush1.bf16.msra.mxu1 %v4006_v44  ;;  %v1674_v57 = vld [vmem:[%s7166_s3 + $0xc0] sm:$0xff]  ;;  %v1676_v58 = vld [vmem:[%s7166_s3 + $0xd0] sm:$0xff] }
 0x2f2   :  { %v5755_v7 = vmax.f32 %v1606_v61, 0.0  ;;  %v1530_v8 = vpop.permute.xlu0 %1529  ;;  %4009 = vmatprep.subr.bf16.mxu1 %v4008_v48  ;;  %v4022_v48 = vpack.c.bf16 %v1672_v41, %v1670_v40  ;;  %v4026_v60 = vpack.c.bf16 %v1676_v58, %v1674_v57  ;;  %v1691_v41 = vld [vmem:[%s7166_s3 + $0x148] sm:$0xff]  ;;  %v1692_v57 = vld [vmem:[%s7166_s3 + $0x150] sm:$0xff] }
 0x2f3   :  { %3550 = vmatprep.mubr.msk.f32.mxu1 %vm1767_vm6, %v5753_v0  ;;  %v1532_v28 = vpop.permute.xlu1 %1531 }
 0x2f4   :  { %v1569_v16 = vsel %vm1565_vm5, %v1530_v8, %v1532_v28  ;;  %v1609_v17 = vmax.f32 %v5598_v39, %v1532_v28  ;;  %1870 = vmatmul.mubr.f32.gmra.mrb[2].mxu1 %v5755_v7  ;;  %v1673_v39 = vld [vmem:[%s7166_s3 + $0xb8] sm:$0xff]  ;;  %v1678_v8 = vld [vmem:[%s7166_s3 + $0xe0] sm:$0xff] }
 0x2f5   :  { %v1608_v22 = vmax.f32 %v5596_v38, %v1569_v16  ;;  %4011 = vmatpush1.bf16.msra.mxu1 %v4010_v4  ;;  %v1671_v38 = vld [vmem:[%s7166_s3 + $0xa8] sm:$0xff]  ;;  %v1685_v28 = vld [vmem:[%s7166_s3 + $0x118] sm:$0xff] }
 0x2f6   :  { %v5775_v50 = vmax.f32 %v1609_v17, 0.0  ;;  %4013 = vmatprep.subr.bf16.mxu1 %v4012_v9  ;;  %v4020_v34 = vpack.c.bf16 %v1673_v39, %v1671_v38  ;;  %v1680_v9 = vld [vmem:[%s7166_s3 + $0xf0] sm:$0xff] }
 0x2f7   :  { %v5783_v30 = vmax.f32 %v1608_v22, 0.0  ;;  %v4030_v17 = vpack.c.bf16 %v1680_v9, %v1678_v8  ;;  %v1699_v9 = vld [vmem:[%s7166_s3 + $0x188] sm:$0xff] }
 0x2f8   :  { %3551 = vmatprep.mubr.msk.f32.mxu1 %vm1767_vm6, %v5775_v50 }
 0x2f9   :  { %4015 = vmatpush1.bf16.msra.mxu1 %v4014_v23  ;;  %v4032_v23 = vpack.c.bf16 %v1685_v28, %v1683_v11 }
 0x2fa   :  { %1876 = vmatmul.mubr.f32.gmra.mrb[4].mxu1 %v5783_v30  ;;  %v1534_v32 = vpop.permute.xlu0 %1533  ;;  %4017 = vmatprep.subr.bf16.mxu1 %v4016_v52  ;;  %v1682_v52 = vld [vmem:[%s7166_s3 + $0x100] sm:$0xff] }
 0x2fb   :  { %v1536_v19 = vpop.permute.xlu1 %1535  ;;  %v4034_v38 = vpack.c.bf16 %v1684_v26, %v1682_v52  ;;  %v1700_v52 = vld [vmem:[%s7166_s3 + $0x190] sm:$0xff] }
 0x2fc   :  { %v1570_v43 = vsel %vm1565_vm5, %v1534_v32, %v1536_v19  ;;  %v1611_v44 = vmax.f32 %v5610_v53, %v1536_v19  ;;  %v1681_v53 = vld [vmem:[%s7166_s3 + $0xf8] sm:$0xff]  ;;  %v1686_v32 = vld [vmem:[%s7166_s3 + $0x120] sm:$0xff] }
 0x2fd   :  { %v1610_v46 = vmax.f32 %v5608_v51, %v1570_v43  ;;  %4019 = vmatpush1.bf16.msra.mxu1 %v4018_v31  ;;  %v1679_v51 = vld [vmem:[%s7166_s3 + $0xe8] sm:$0xff]  ;;  %v1693_v19 = vld [vmem:[%s7166_s3 + $0x158] sm:$0xff] }
 0x2fe   :  { %v5809_v49 = vmax.f32 %v1611_v44, 0.0  ;;  %4021 = vmatprep.subr.bf16.mxu1 %v4020_v34  ;;  %v4028_v4 = vpack.c.bf16 %v1681_v53, %v1679_v51  ;;  %v1688_v34 = vld [vmem:[%s7166_s3 + $0x130] sm:$0xff] }
 0x2ff   :  { %v5817_v59 = vmax.f32 %v1610_v46, 0.0  ;;  %v4038_v44 = vpack.c.bf16 %v1688_v34, %v1686_v32 }
 0x300   :  { %3552 = vmatprep.mubr.msk.f32.mxu1 %vm1767_vm6, %v5809_v49 }
 0x301   :  { %4023 = vmatpush1.bf16.msra.mxu1 %v4022_v48  ;;  %v4040_v48 = vpack.c.bf16 %v1693_v19, %v1691_v41 }
 0x302   :  { %1882 = vmatmul.mubr.f32.gmra.mrb[6].mxu1 %v5817_v59  ;;  %v1538_v61 = vpop.permute.xlu0 %1537  ;;  %4025 = vmatprep.subr.bf16.mxu1 %v4024_v56  ;;  %v1690_v56 = vld [vmem:[%s7166_s3 + $0x140] sm:$0xff] }
 0x303   :  { %v1540_v29 = vpop.permute.xlu1 %1539  ;;  %v4042_v51 = vpack.c.bf16 %v1692_v57, %v1690_v56  ;;  %v3568_v56 = vld [vmem:[%s7166_s3 + $0x3a8] sm:$0xff] }
 0x304   :  { %v1571_v14 = vsel %vm1565_vm5, %v1538_v61, %v1540_v29  ;;  %v1613_v15 = vmax.f32 %v5622_v63, %v1540_v29  ;;  %v1689_v63 = vld [vmem:[%s7166_s3 + $0x138] sm:$0xff]  ;;  %v1694_v61 = vld [vmem:[%s7166_s3 + $0x160] sm:$0xff] }
 0x305   :  { %v1612_v16 = vmax.f32 %v5620_v62, %v1571_v14  ;;  %4027 = vmatpush1.bf16.msra.mxu1 %v4026_v60  ;;  %v1687_v62 = vld [vmem:[%s7166_s3 + $0x128] sm:$0xff]  ;;  %v1701_v29 = vld [vmem:[%s7166_s3 + $0x198] sm:$0xff] }
 0x306   :  { %v5843_v22 = vmax.f32 %v1613_v15, 0.0  ;;  %4029 = vmatprep.subr.bf16.mxu1 %v4028_v4  ;;  %v4036_v31 = vpack.c.bf16 %v1689_v63, %v1687_v62  ;;  %v1696_v4 = vld [vmem:[%s7166_s3 + $0x170] sm:$0xff] }
 0x307   :  { %v5851_v27 = vmax.f32 %v1612_v16, 0.0  ;;  %v4046_v15 = vpack.c.bf16 %v1696_v4, %v1694_v61  ;;  %v1706_v61 = vld [vmem:[%s7166_s3 + $0x1c0] sm:$0x3f] }
 0x308   :  { %3553 = vmatprep.mubr.msk.f32.mxu1 %vm1767_vm6, %v5843_v22 }
 0x309   :  { %4031 = vmatpush1.bf16.msra.mxu1 %v4030_v17  ;;  %v4048_v17 = vpack.c.bf16 %v1701_v29, %v1699_v9  ;;  %v3571_v29 = vld [vmem:[%s7166_s3 + $0x3c0] sm:$0xff] }
 0x30a   :  { %1888 = vmatmul.mubr.f32.gmra.mrb[8].mxu1 %v5851_v27  ;;  %v1542_v39 = vpop.permute.xlu0 %1541  ;;  %4033 = vmatprep.subr.bf16.mxu1 %v4032_v23  ;;  %v1698_v23 = vld [vmem:[%s7166_s3 + $0x180] sm:$0xff] }
 0x30b   :  { %v1544_v40 = vpop.permute.xlu1 %1543  ;;  %v4050_v62 = vpack.c.bf16 %v1700_v52, %v1698_v23  ;;  %v3575_v23 = vld [vmem:[%s7166_s3 + $0x3e0] sm:$0xff]  ;;  %v3577_v52 = vld [vmem:[%s7166_s3 + $0x3f0] sm:$0xff] }
 0x30c   :  { %v1572_v42 = vsel %vm1565_vm5, %v1542_v39, %v1544_v40  ;;  %v1615_v18 = vmax.f32 %v5634_v13, %v1544_v40  ;;  %v1697_v13 = vld [vmem:[%s7166_s3 + $0x178] sm:$0xff]  ;;  %v1702_v39 = vld [vmem:[%s7166_s3 + $0x1a0] sm:$0xff] }
 0x30d   :  { %v1614_v43 = vmax.f32 %v5632_v12, %v1572_v42  ;;  %4035 = vmatpush1.bf16.msra.mxu1 %v4034_v38  ;;  %v1695_v12 = vld [vmem:[%s7166_s3 + $0x168] sm:$0xff] }
 0x30e   :  { %v5877_v46 = vmax.f32 %v1615_v18, 0.0  ;;  %4037 = vmatprep.subr.bf16.mxu1 %v4036_v31  ;;  %v4044_v60 = vpack.c.bf16 %v1697_v13, %v1695_v12  ;;  %v1704_v31 = vld [vmem:[%s7166_s3 + $0x1b0] sm:$0xff]  ;;  %v3567_v12 = vld [vmem:[%s7166_s3 + $0x3a0] sm:$0xff] }
 0x30f   :  { %v5885_v58 = vmax.f32 %v1614_v43, 0.0  ;;  %v4054_v19 = vpack.c.bf16 %v1704_v31, %v1702_v39  ;;  %v3569_v13 = vld [vmem:[%s7166_s3 + $0x3b0] sm:$0xff]  ;;  %v3584_v39 = vld [vmem:[%s7166_s3 + $0x428] sm:$0xff] }
 0x310   :  { %3554 = vmatprep.mubr.msk.f32.mxu1 %vm1767_vm6, %v5877_v46 }
 0x311   :  { %4039 = vmatpush1.bf16.msra.mxu1 %v4038_v44 }
 0x312   :  { %1894 = vmatmul.mubr.f32.gmra.mrb[10].mxu1 %v5885_v58  ;;  %v1546_v53 = vpop.permute.xlu0 %1545  ;;  %4041 = vmatprep.subr.bf16.mxu1 %v4040_v48  ;;  %v1707_v48 = vld [vmem:[%s7166_s3 + $0x1c8] sm:$0x3f] }
 0x313   :  { %v1548_v8 = vpop.permute.xlu1 %1547 }
 0x314   :  { %v1573_v11 = vsel %vm1565_vm5, %v1546_v53, %v1548_v8  ;;  %v1617_v28 = vmax.f32 %v5646_v25, %v1548_v8  ;;  %v1705_v25 = vld [vmem:[%s7166_s3 + $0x1b8] sm:$0xff]  ;;  %v3572_v53 = vld [vmem:[%s7166_s3 + $0x3c8] sm:$0xff]  ;;  %v4058_v8 = vpack.c.bf16 %v3569_v13, %v3567_v12  ;;  %v3591_v13 = vld [vmem:[%s7166_s3 + $0x460] sm:$0xff] }
 0x315   :  { %v1616_v14 = vmax.f32 %v5644_v24, %v1573_v11  ;;  %4043 = vmatpush1.bf16.msra.mxu1 %v4042_v51  ;;  %v1703_v24 = vld [vmem:[%s7166_s3 + $0x1a8] sm:$0xff]  ;;  %v3573_v11 = vld [vmem:[%s7166_s3 + $0x3d0] sm:$0xff] }
 0x316   :  { %v5911_v16 = vmax.f32 %v1617_v28, 0.0  ;;  %4045 = vmatprep.subr.bf16.mxu1 %v4044_v60  ;;  %v4052_v38 = vpack.c.bf16 %v1705_v25, %v1703_v24  ;;  %v3576_v28 = vld [vmem:[%s7166_s3 + $0x3e8] sm:$0xff]  ;;  %v4066_v25 = vpack.c.bf16 %v3577_v52, %v3575_v23 }
 0x317   :  { %v5919_v26 = vmax.f32 %v1616_v14, 0.0  ;;  %v3578_v14 = vld [vmem:[%s7166_s3 + $0x3f8] sm:$0xff]  ;;  %v3580_v24 = vld [vmem:[%s7166_s3 + $0x408] sm:$0xff] }
 0x318   :  { %3555 = vmatprep.mubr.msk.f32.mxu1 %vm1767_vm6, %v5911_v16 }
 0x319   :  { %4047 = vmatpush1.bf16.msra.mxu1 %v4046_v15  ;;  %v4062_v15 = vpack.c.bf16 %v3573_v11, %v3571_v29 }
 0x31a   :  { %1900 = vmatmul.mubr.f32.gmra.mrb[12].mxu1 %v5919_v26  ;;  %v1550_v63 = vpop.permute.xlu0 %1549  ;;  %4049 = vmatprep.subr.bf16.mxu1 %v4048_v17  ;;  %v4064_v17 = vpack.c.bf16 %v3578_v14, %v3576_v28  ;;  %v3599_v28 = vld [vmem:[%s7166_s3 + $0x4a0] sm:$0xff]  ;;  %v3601_v14 = vld [vmem:[%s7166_s3 + $0x4b0] sm:$0xff] }
 0x31b   :  { %v1552_v32 = vpop.permute.xlu1 %1551  ;;  %v4090_v23 = vpack.c.bf16 %v3601_v14, %v3599_v28 }
 0x31c   :  { %v1574_v34 = vsel %vm1565_vm5, %v1550_v63, %v1552_v32  ;;  %v1619_v40 = vmax.f32 %v5658_v37, %v1552_v32  ;;  %v3579_v63 = vld [vmem:[%s7166_s3 + $0x400] sm:$0xff] }
 0x31d   :  { %v1618_v41 = vmax.f32 %v5656_v36, %v1574_v34  ;;  %4051 = vmatpush1.bf16.msra.mxu1 %v4050_v62  ;;  %v3570_v36 = vld [vmem:[%s7166_s3 + $0x3b8] sm:$0xff]  ;;  %v3583_v34 = vld [vmem:[%s7166_s3 + $0x420] sm:$0xff] }
 0x31e   :  { %v5939_v42 = vmax.f32 %v1619_v40, 0.0  ;;  %v1518_v18 = vpop.permute.xlu0 %1517  ;;  %4053 = vmatprep.subr.bf16.mxu1 %v4052_v38  ;;  %v4056_v4 = vpack.c.bf16 %v3570_v36, %v3568_v56  ;;  %v3581_v38 = vld [vmem:[%s7166_s3 + $0x410] sm:$0xff]  ;;  %v3592_v36 = vld [vmem:[%s7166_s3 + $0x468] sm:$0xff] }
 0x31f   :  { %v5941_v43 = vmax.f32 %v1618_v41, 0.0  ;;  %v1520_v44 = vpop.permute.xlu1 %1519  ;;  %v4070_v31 = vpack.c.bf16 %v3581_v38, %v3579_v63  ;;  %v3585_v40 = vld [vmem:[%s7166_s3 + $0x430] sm:$0xff]  ;;  %v3588_v41 = vld [vmem:[%s7166_s3 + $0x448] sm:$0xff]  ;;  %v3607_v38 = vld [vmem:[%s7166_s3 + $0x4e0] sm:$0xff] }
 0x320   :  { %v1566_v37 = vsel %vm1565_vm5, %v1518_v18, %v1520_v44  ;;  %v1603_v57 = vmax.f32 %v5552_v2, %v1520_v44  ;;  %3556 = vmatprep.mubr.msk.f32.mxu1 %vm1767_vm6, %v5939_v42  ;;  %v3574_v2 = vld [vmem:[%s7166_s3 + $0x3d8] sm:$0xff]  ;;  %v4074_v18 = vpack.c.bf16 %v3585_v40, %v3583_v34  ;;  %v3589_v56 = vld [vmem:[%s7166_s3 + $0x450] sm:$0xff]  ;;  %v3611_v40 = vld [vmem:[%s7166_s3 + $0x500] sm:$0xff] }
 0x321   :  { %v1602_v51 = vmax.f32 %v5550_v1, %v1566_v37  ;;  %4055 = vmatpush1.bf16.msra.mxu1 %v4054_v19  ;;  %v4060_v9 = vpack.c.bf16 %v3574_v2, %v3572_v53  ;;  %v3590_v19 = vld [vmem:[%s7166_s3 + $0x458] sm:$0xff]  ;;  %v3596_v53 = vld [vmem:[%s7166_s3 + $0x488] sm:$0xff] }
 0x322   :  { %v1627_v60 = vmax.f32 %v1603_v57, 0.0  ;;  %1906 = vmatmul.mubr.f32.gmra.mrb[14].mxu1 %v5941_v43  ;;  %3557 = vmatprep.subr.msk.mxu1 %vm1792_vm4, %v1707_v48  ;;  %v4076_v44 = vpack.c.bf16 %v3590_v19, %v3588_v41  ;;  %v3587_v48 = vld [vmem:[%s7166_s3 + $0x440] sm:$0xff]  ;;  %v3594_v37 = vld [vmem:[%s7166_s3 + $0x478] sm:$0xff]  ;;  %v3613_v41 = vld [vmem:[%s7166_s3 + $0x510] sm:$0xff] }
 0x323   :  { %v1626_v1 = vmax.f32 %v1602_v51, 0.0  ;;  %v4078_v57 = vpack.c.bf16 %v3589_v56, %v3587_v48  ;;  %v4080_v12 = vpack.c.bf16 %v3594_v37, %v3592_v36  ;;  %v3593_v51 = vld [vmem:[%s7166_s3 + $0x470] sm:$0xff]  ;;  %v3598_v2 = vld [vmem:[%s7166_s3 + $0x498] sm:$0xff]  ;;  %v3616_v19 = vld [vmem:[%s7166_s3 + $0x528] sm:$0xff] }
 0x324   :  { %3559 = vmatprep.mubr.msk.f32.mxu1 %vm1767_vm6, %v1627_v60  ;;  %v4082_v60 = vpack.c.bf16 %v3593_v51, %v3591_v13  ;;  %v3615_v56 = vld [vmem:[%s7166_s3 + $0x520] sm:$0xff]  ;;  %v3617_v36 = vld [vmem:[%s7166_s3 + $0x530] sm:$0xff]  ;;  %v3620_v37 = vld [vmem:[%s7166_s3 + $0x548] sm:$0xff] }
 0x325   :  { %3558 = vmatpush1.msk.msra.mxu1 %vm1792_vm4, %v1706_v61  ;;  %v4084_v61 = vpack.c.bf16 %v3598_v2, %v3596_v53  ;;  %v3619_v51 = vld [vmem:[%s7166_s3 + $0x540] sm:$0xff]  ;;  %v3621_v53 = vld [vmem:[%s7166_s3 + $0x550] sm:$0xff] }
 0x326   :  { %1986 = vmatmul.mubr.f32.vlgmr.msra.gmra.mrb[0].mxu1 %v1626_v1  ;;  %4057 = vmatprep.subr.bf16.mxu1 %v4056_v4  ;;  %v3595_v4 = vld [vmem:[%s7166_s3 + $0x480] sm:$0xff]  ;;  %v3597_v1 = vld [vmem:[%s7166_s3 + $0x490] sm:$0xff]  ;;  %v4110_v2 = vpack.c.bf16 %v3621_v53, %v3619_v51  ;;  %v1554_v51 = vpop.permute.xlu0 %1553  ;;  %v1556_v53 = vpop.permute.xlu1 %1555 }
 0x327   :  { %3560 = vmatprep.mubr.msk.f32.mxu1 %vm1767_vm6, %v5719_v33  ;;  %4059 = vmatpush1.bf16.msra.mxu1 %v4058_v8  ;;  %v3582_v33 = vld [vmem:[%s7166_s3 + $0x418] sm:$0xff]  ;;  %v3600_v8 = vld [vmem:[%s7166_s3 + $0x4a8] sm:$0xff]  ;;  %v4086_v29 = vpack.c.bf16 %v3597_v1, %v3595_v4  ;;  %v3635_v1 = vld [vmem:[%s7166_s3 + $0x570] sm:$0xff] }
 0x328   :  { %4061 = vmatprep.subr.bf16.mxu1 %v4060_v9  ;;  %v4068_v62 = vpack.c.bf16 %v3582_v33, %v3580_v24  ;;  %v3602_v9 = vld [vmem:[%s7166_s3 + $0x4b8] sm:$0xff]  ;;  %v3603_v24 = vld [vmem:[%s7166_s3 + $0x4c0] sm:$0xff]  ;;  %v3605_v33 = vld [vmem:[%s7166_s3 + $0x4d0] sm:$0xff] }
 0x329   :  { %v4088_v11 = vpack.c.bf16 %v3602_v9, %v3600_v8  ;;  %v3638_v4 = vld [vmem:[%s7166_s3 + $0x588] sm:$0xff]  ;;  %v3637_v8 = vld [vmem:[%s7166_s3 + $0x580] sm:$0xff]  ;;  %v3640_v9 = vld [vmem:[%s7166_s3 + $0x598] sm:$0xff] }
 0x32a   :  { %1992 = vmatmul.mubr.f32.gmra.mrb[2].mxu1 %v5721_v35  ;;  %v3586_v35 = vld [vmem:[%s7166_s3 + $0x438] sm:$0xff]  ;;  %v4114_v14 = vpack.c.bf16 %v3637_v8, %v3635_v1  ;;  %v1575_v1 = vsel %vm1565_vm5, %v1554_v51, %v1556_v53  ;;  %v1621_v8 = vmax.f32 %v5674_v55, %v1556_v53  ;;  %v3663_v55 = vld [vmem:[%s7166_s3 + $0x650] sm:$0xff]  ;;  %v3685_v53 = vld [vmem:[%s7166_s3 + $0x700] sm:$0xff] }
 0x32b   :  { %3561 = vmatprep.mubr.msk.f32.mxu1 %vm1767_vm6, %v5753_v0  ;;  %4063 = vmatpush1.bf16.msra.mxu1 %v4062_v15  ;;  %v4072_v32 = vpack.c.bf16 %v3586_v35, %v3584_v39  ;;  %v3604_v15 = vld [vmem:[%s7166_s3 + $0x4c8] sm:$0xff]  ;;  %v3609_v39 = vld [vmem:[%s7166_s3 + $0x4f0] sm:$0xff] }
 0x32c   :  { %4065 = vmatprep.subr.bf16.mxu1 %v4064_v17  ;;  %v3606_v17 = vld [vmem:[%s7166_s3 + $0x4d8] sm:$0xff]  ;;  %v3612_v35 = vld [vmem:[%s7166_s3 + $0x508] sm:$0xff]  ;;  %v3683_v51 = vld [vmem:[%s7166_s3 + $0x6f0] sm:$0xff] }
 0x32d   :  { %v4092_v52 = vpack.c.bf16 %v3606_v17, %v3604_v15  ;;  %v3639_v17 = vld [vmem:[%s7166_s3 + $0x590] sm:$0xff] }
 0x32e   :  { %1998 = vmatmul.mubr.f32.gmra.mrb[4].mxu1 %v5755_v7 }
 0x32f   :  { %3562 = vmatprep.mubr.msk.f32.mxu1 %vm1767_vm6, %v5775_v50  ;;  %4067 = vmatpush1.bf16.msra.mxu1 %v4066_v25  ;;  %v3608_v25 = vld [vmem:[%s7166_s3 + $0x4e8] sm:$0xff] }
 0x330   :  { %4069 = vmatprep.subr.bf16.mxu1 %v4068_v62  ;;  %v3610_v62 = vld [vmem:[%s7166_s3 + $0x4f8] sm:$0xff] }
 0x331   :  { %v4096_v63 = vpack.c.bf16 %v3610_v62, %v3608_v25  ;;  %v3643_v62 = vld [vmem:[%s7166_s3 + $0x5b0] sm:$0xff] }
 0x332   :  { %2004 = vmatmul.mubr.f32.gmra.mrb[6].mxu1 %v5783_v30 }
 0x333   :  { %3563 = vmatprep.mubr.msk.f32.mxu1 %vm1767_vm6, %v5809_v49  ;;  %4071 = vmatpush1.bf16.msra.mxu1 %v4070_v31  ;;  %v3614_v31 = vld [vmem:[%s7166_s3 + $0x518] sm:$0xff] }
 0x334   :  { %4073 = vmatprep.subr.bf16.mxu1 %v4072_v32  ;;  %v4098_v32 = vpack.c.bf16 %v3609_v39, %v3607_v38  ;;  %v4100_v34 = vpack.c.bf16 %v3614_v31, %v3612_v35  ;;  %v3647_v35 = vld [vmem:[%s7166_s3 + $0x5d0] sm:$0xff]  ;;  %v3649_v31 = vld [vmem:[%s7166_s3 + $0x5e0] sm:$0xff] }
 0x336   :  { %2010 = vmatmul.mubr.f32.gmra.mrb[8].mxu1 %v5817_v59 }
 0x337   :  { %3564 = vmatprep.mubr.msk.f32.mxu1 %vm1767_vm6, %v5843_v22  ;;  %4075 = vmatpush1.bf16.msra.mxu1 %v4074_v18  ;;  %v3618_v18 = vld [vmem:[%s7166_s3 + $0x538] sm:$0xff] }
 0x338   :  { %4077 = vmatprep.subr.bf16.mxu1 %v4076_v44  ;;  %v4102_v44 = vpack.c.bf16 %v3613_v41, %v3611_v40  ;;  %v4104_v48 = vpack.c.bf16 %v3618_v18, %v3616_v19  ;;  %v4126_v40 = vpack.c.bf16 %v3649_v31, %v3647_v35  ;;  %v3651_v19 = vld [vmem:[%s7166_s3 + $0x5f0] sm:$0xff]  ;;  %v3653_v18 = vld [vmem:[%s7166_s3 + $0x600] sm:$0xff]  ;;  %v3676_v31 = vld [vmem:[%s7166_s3 + $0x6b8] sm:$0xff] }
 0x339   :  { %v3673_v35 = vld [vmem:[%s7166_s3 + $0x6a0] sm:$0xff] }
 0x33a   :  { %2016 = vmatmul.mubr.f32.gmra.mrb[10].mxu1 %v5851_v27 }
 0x33b   :  { %3565 = vmatprep.mubr.msk.f32.mxu1 %vm1767_vm6, %v5877_v46  ;;  %4079 = vmatpush1.bf16.msra.mxu1 %v4078_v57  ;;  %v3622_v57 = vld [vmem:[%s7166_s3 + $0x558] sm:$0xff] }
 0x33c   :  { %4081 = vmatprep.subr.bf16.mxu1 %v4080_v12  ;;  %v4106_v12 = vpack.c.bf16 %v3617_v36, %v3615_v56  ;;  %v4108_v13 = vpack.c.bf16 %v3622_v57, %v3620_v37  ;;  %v4130_v56 = vpack.c.bf16 %v3653_v18, %v3651_v19  ;;  %v3655_v37 = vld [vmem:[%s7166_s3 + $0x610] sm:$0xff]  ;;  %v3657_v57 = vld [vmem:[%s7166_s3 + $0x620] sm:$0xff]  ;;  %v3680_v19 = vld [vmem:[%s7166_s3 + $0x6d8] sm:$0xff] }
 0x33d   :  { %v3682_v18 = vld [vmem:[%s7166_s3 + $0x6e8] sm:$0xff] }
 0x33e   :  { %2022 = vmatmul.mubr.f32.gmra.mrb[12].mxu1 %v5885_v58 }
 0x33f   :  { %3566 = vmatprep.mubr.msk.f32.mxu1 %vm1767_vm6, %v5911_v16  ;;  %4083 = vmatpush1.bf16.msra.mxu1 %v4082_v60  ;;  %v3624_v60 = vld [vmem:[%s7166_s3 + $0x568] sm:$0x3f] }
 0x340   :  { %4085 = vmatprep.subr.bf16.mxu1 %v4084_v61  ;;  %v3636_v61 = vld [vmem:[%s7166_s3 + $0x578] sm:$0xff] }
 0x341   :  { %v4112_v28 = vpack.c.bf16 %v3638_v4, %v3636_v61  ;;  %v3659_v61 = vld [vmem:[%s7166_s3 + $0x630] sm:$0xff]  ;;  %v3661_v4 = vld [vmem:[%s7166_s3 + $0x640] sm:$0xff] }
 0x342   :  { %2028 = vmatmul.mubr.f32.gmra.mrb[14].mxu1 %v5919_v26 }
 0x343   :  { %4087 = vmatpush1.bf16.msra.mxu1 %v4086_v29  ;;  %3627 = vmatprep.mubr.msk.f32.mxu1 %vm1767_vm6, %v5753_v0  ;;  %v4094_v0 = vpack.c.bf16 %v3605_v33, %v3603_v24  ;;  %v3642_v29 = vld [vmem:[%s7166_s3 + $0x5a8] sm:$0xff] }
 0x344   :  { %4089 = vmatprep.subr.bf16.mxu1 %v4088_v11  ;;  %v3623_v11 = vld [vmem:[%s7166_s3 + $0x560] sm:$0x3f]  ;;  %v4116_v15 = vpack.c.bf16 %v3642_v29, %v3640_v9  ;;  %v3646_v24 = vld [vmem:[%s7166_s3 + $0x5c8] sm:$0xff]  ;;  %v3664_v9 = vld [vmem:[%s7166_s3 + $0x658] sm:$0xff] }
 0x345   :  { %v3666_v29 = vld [vmem:[%s7166_s3 + $0x668] sm:$0xff] }
 0x347   :  { %4091 = vmatpush1.bf16.msra.mxu1 %v4090_v23  ;;  %v3641_v23 = vld [vmem:[%s7166_s3 + $0x5a0] sm:$0xff] }
 0x348   :  { %4093 = vmatprep.subr.bf16.mxu1 %v4092_v52  ;;  %v3644_v52 = vld [vmem:[%s7166_s3 + $0x5b8] sm:$0xff]  ;;  %v4118_v33 = vpack.c.bf16 %v3641_v23, %v3639_v17  ;;  %v6274_v17 = vmax.f32 %v1621_v8, 0.0  ;;  %v3689_v8 = vld [vmem:[%s7166_s3 + $0x720] sm:$0xff] }
 0x349   :  { %v4120_v25 = vpack.c.bf16 %v3646_v24, %v3644_v52  ;;  %v3668_v23 = vld [vmem:[%s7166_s3 + $0x678] sm:$0xff] }
 0x34b   :  { %4095 = vmatpush1.bf16.msra.mxu1 %v4094_v0  ;;  %v3645_v0 = vld [vmem:[%s7166_s3 + $0x5c0] sm:$0xff] }
 0x34c   :  { %4097 = vmatprep.subr.bf16.mxu1 %v4096_v63  ;;  %v3650_v63 = vld [vmem:[%s7166_s3 + $0x5e8] sm:$0xff]  ;;  %v4122_v38 = vpack.c.bf16 %v3645_v0, %v3643_v62  ;;  %v3669_v62 = vld [vmem:[%s7166_s3 + $0x680] sm:$0xff]  ;;  %v3672_v0 = vld [vmem:[%s7166_s3 + $0x698] sm:$0xff] }
 0x34f   :  { %4099 = vmatpush1.bf16.msra.mxu1 %v4098_v32  ;;  %v3652_v32 = vld [vmem:[%s7166_s3 + $0x5f8] sm:$0xff] }
 0x350   :  { %4101 = vmatprep.subr.bf16.mxu1 %v4100_v34  ;;  %v3654_v34 = vld [vmem:[%s7166_s3 + $0x608] sm:$0xff] }
 0x351   :  { %v4128_v41 = vpack.c.bf16 %v3654_v34, %v3652_v32  ;;  %v3678_v32 = vld [vmem:[%s7166_s3 + $0x6c8] sm:$0xff] }
 0x352   :  { %v4152_v34 = vpack.c.bf16 %v3678_v32, %v3676_v31  ;;  %v3713_v31 = vld [vmem:[%s7166_s3 + $0x790] sm:$0xff]  ;;  %v3718_v32 = vld [vmem:[%s7166_s3 + $0x7b8] sm:$0xff] }
 0x353   :  { %4103 = vmatpush1.bf16.msra.mxu1 %v4102_v44  ;;  %v3656_v44 = vld [vmem:[%s7166_s3 + $0x618] sm:$0xff] }
 0x354   :  { %4105 = vmatprep.subr.bf16.mxu1 %v4104_v48  ;;  %v3658_v48 = vld [vmem:[%s7166_s3 + $0x628] sm:$0xff] }
 0x355   :  { %v4132_v36 = vpack.c.bf16 %v3658_v48, %v3656_v44  ;;  %v4156_v48 = vpack.c.bf16 %v3682_v18, %v3680_v19  ;;  %v3720_v19 = vld [vmem:[%s7166_s3 + $0x7c8] sm:$0xff]  ;;  %v3722_v18 = vld [vmem:[%s7166_s3 + $0x7d8] sm:$0xff] }
 0x357   :  { %4107 = vmatpush1.bf16.msra.mxu1 %v4106_v12  ;;  %v3660_v12 = vld [vmem:[%s7166_s3 + $0x638] sm:$0xff] }
 0x358   :  { %4109 = vmatprep.subr.bf16.mxu1 %v4108_v13  ;;  %v3662_v13 = vld [vmem:[%s7166_s3 + $0x648] sm:$0xff] }
 0x35b   :  { %4111 = vmatpush1.bf16.msra.mxu1 %v4110_v2  ;;  %v4134_v2 = vpack.c.bf16 %v3657_v57, %v3655_v37  ;;  %v3684_v37 = vld [vmem:[%s7166_s3 + $0x6f8] sm:$0xff]  ;;  %v3686_v57 = vld [vmem:[%s7166_s3 + $0x708] sm:$0xff] }
 0x35c   :  { %3625 = vmatprep.subr.msk.mxu1 %vm1792_vm4, %v3624_v60  ;;  %v4136_v60 = vpack.c.bf16 %v3662_v13, %v3660_v12  ;;  %v4160_v13 = vpack.c.bf16 %v3686_v57, %v3684_v37  ;;  %v3724_v37 = vld [vmem:[%s7166_s3 + $0x7e8] sm:$0xff]  ;;  %v3726_v57 = vld [vmem:[%s7166_s3 + $0x7f8] sm:$0xff] }
 0x35f   :  { %3626 = vmatpush1.msk.msra.mxu1 %vm1792_vm4, %v3623_v11  ;;  %v4138_v11 = vpack.c.bf16 %v3661_v4, %v3659_v61  ;;  %v4162_v61 = vpack.c.bf16 %v3685_v53, %v3683_v51  ;;  %v3723_v51 = vld [vmem:[%s7166_s3 + $0x7e0] sm:$0xff]  ;;  %v3725_v53 = vld [vmem:[%s7166_s3 + $0x7f0] sm:$0xff] }
 0x360   :  { %2167 = vmatmul.mubr.f32.vlgmr.msra.gmra.mrb[0].mxu1 %v5755_v7  ;;  %4113 = vmatprep.subr.bf16.mxu1 %v4112_v28  ;;  %v3648_v7 = vld [vmem:[%s7166_s3 + $0x5d8] sm:$0xff]  ;;  %v1620_v28 = vmax.f32 %v5672_v54, %v1575_v1  ;;  %v3670_v54 = vld [vmem:[%s7166_s3 + $0x688] sm:$0xff]  ;;  %v3687_v1 = vld [vmem:[%s7166_s3 + $0x710] sm:$0xff] }
 0x361   :  { %3628 = vmatprep.mubr.msk.f32.mxu1 %vm1767_vm6, %v5775_v50  ;;  %4115 = vmatpush1.bf16.msra.mxu1 %v4114_v14  ;;  %v4124_v39 = vpack.c.bf16 %v3650_v63, %v3648_v7  ;;  %v4140_v14 = vpack.c.bf16 %v3666_v29, %v3664_v9  ;;  %v3674_v7 = vld [vmem:[%s7166_s3 + $0x6a8] sm:$0xff]  ;;  %v4166_v9 = vpack.c.bf16 %v3689_v8, %v3687_v1  ;;  %v3692_v29 = vld [vmem:[%s7166_s3 + $0x738] sm:$0x3f] }
 0x362   :  { %4117 = vmatprep.subr.bf16.mxu1 %v4116_v15  ;;  %v3665_v15 = vld [vmem:[%s7166_s3 + $0x660] sm:$0xff]  ;;  %v6285_v24 = vmax.f32 %v1620_v28, 0.0  ;;  %v3706_v28 = vld [vmem:[%s7166_s3 + $0x758] sm:$0xff]  ;;  %v4190_v1 = vpack.c.bf16 %v3725_v53, %v3723_v51 }
 0x363   :  { %v4142_v52 = vpack.c.bf16 %v3665_v15, %v3663_v55  ;;  %v3705_v55 = vld [vmem:[%s7166_s3 + $0x750] sm:$0xff]  ;;  %v3708_v15 = vld [vmem:[%s7166_s3 + $0x768] sm:$0xff] }
 0x364   :  { %2173 = vmatmul.mubr.f32.gmra.mrb[2].mxu1 %v5783_v30 }
 0x365   :  { %3629 = vmatprep.mubr.msk.f32.mxu1 %vm1767_vm6, %v5809_v49  ;;  %4119 = vmatpush1.bf16.msra.mxu1 %v4118_v33  ;;  %v4144_v33 = vpack.c.bf16 %v3670_v54, %v3668_v23  ;;  %v3710_v23 = vld [vmem:[%s7166_s3 + $0x778] sm:$0xff]  ;;  %v3691_v54 = vld [vmem:[%s7166_s3 + $0x730] sm:$0x3f] }
 0x366   :  { %4121 = vmatprep.subr.bf16.mxu1 %v4120_v25  ;;  %v3667_v25 = vld [vmem:[%s7166_s3 + $0x670] sm:$0xff] }
 0x367   :  { %v4146_v63 = vpack.c.bf16 %v3669_v62, %v3667_v25  ;;  %v4172_v25 = vpack.c.bf16 %v3710_v23, %v3708_v15  ;;  %v3707_v62 = vld [vmem:[%s7166_s3 + $0x760] sm:$0xff] }
 0x368   :  { %2179 = vmatmul.mubr.f32.gmra.mrb[4].mxu1 %v5817_v59 }
 0x369   :  { %3630 = vmatprep.mubr.msk.f32.mxu1 %vm1767_vm6, %v5843_v22  ;;  %4123 = vmatpush1.bf16.msra.mxu1 %v4122_v38  ;;  %v4148_v38 = vpack.c.bf16 %v3674_v7, %v3672_v0  ;;  %v3709_v0 = vld [vmem:[%s7166_s3 + $0x770] sm:$0xff]  ;;  %v3712_v7 = vld [vmem:[%s7166_s3 + $0x788] sm:$0xff] }
 0x36a   :  { %4125 = vmatprep.subr.bf16.mxu1 %v4124_v39  ;;  %v3671_v39 = vld [vmem:[%s7166_s3 + $0x690] sm:$0xff] }
 0x36c   :  { %2185 = vmatmul.mubr.f32.gmra.mrb[6].mxu1 %v5851_v27 }
 0x36d   :  { %3631 = vmatprep.mubr.msk.f32.mxu1 %vm1767_vm6, %v5877_v46  ;;  %4127 = vmatpush1.bf16.msra.mxu1 %v4126_v40  ;;  %v3675_v40 = vld [vmem:[%s7166_s3 + $0x6b0] sm:$0xff] }
 0x36e   :  { %4129 = vmatprep.subr.bf16.mxu1 %v4128_v41  ;;  %v3677_v41 = vld [vmem:[%s7166_s3 + $0x6c0] sm:$0xff] }
 0x36f   :  { %v4154_v44 = vpack.c.bf16 %v3677_v41, %v3675_v40  ;;  %v3715_v40 = vld [vmem:[%s7166_s3 + $0x7a0] sm:$0xff]  ;;  %v3717_v41 = vld [vmem:[%s7166_s3 + $0x7b0] sm:$0xff] }
 0x370   :  { %2191 = vmatmul.mubr.f32.gmra.mrb[8].mxu1 %v5885_v58 }
 0x371   :  { %3632 = vmatprep.mubr.msk.f32.mxu1 %vm1767_vm6, %v5911_v16  ;;  %4131 = vmatpush1.bf16.msra.mxu1 %v4130_v56  ;;  %v3679_v56 = vld [vmem:[%s7166_s3 + $0x6d0] sm:$0xff] }
 0x372   :  { %4133 = vmatprep.subr.bf16.mxu1 %v4132_v36  ;;  %v3681_v36 = vld [vmem:[%s7166_s3 + $0x6e0] sm:$0xff] }
 0x373   :  { %v4158_v12 = vpack.c.bf16 %v3681_v36, %v3679_v56  ;;  %v3719_v56 = vld [vmem:[%s7166_s3 + $0x7c0] sm:$0xff]  ;;  %v3721_v36 = vld [vmem:[%s7166_s3 + $0x7d0] sm:$0xff] }
 0x374   :  { %2197 = vmatmul.mubr.f32.gmra.mrb[10].mxu1 %v5919_v26 }
 0x375   :  { %3633 = vmatprep.mubr.msk.f32.mxu1 %vm1767_vm6, %v5939_v42  ;;  %4135 = vmatpush1.bf16.msra.mxu1 %v4134_v2  ;;  %v3688_v2 = vld [vmem:[%s7166_s3 + $0x718] sm:$0xff] }
 0x376   :  { %4137 = vmatprep.subr.bf16.mxu1 %v4136_v60  ;;  %v3690_v60 = vld [vmem:[%s7166_s3 + $0x728] sm:$0xff] }
 0x377   :  { %v4164_v4 = vpack.c.bf16 %v3690_v60, %v3688_v2  ;;  %v3728_v2 = vld [vmem:[%s7166_s3 + $0x808] sm:$0xff]  ;;  %v3730_v60 = vld [vmem:[%s7166_s3 + $0x818] sm:$0xff] }
 0x378   :  { %2203 = vmatmul.mubr.f32.gmra.mrb[12].mxu1 %v5941_v43  ;;  %v4192_v8 = vpack.c.bf16 %v3730_v60, %v3728_v2  ;;  %v3751_v2 = vld [vmem:[%s7166_s3 + $0x8c0] sm:$0xff]  ;;  %v3753_v60 = vld [vmem:[%s7166_s3 + $0x8d0] sm:$0xff] }
 0x379   :  { %3634 = vmatprep.mubr.msk.f32.mxu1 %vm1767_vm6, %v6274_v17  ;;  %4139 = vmatpush1.bf16.msra.mxu1 %v4138_v11  ;;  %v3704_v11 = vld [vmem:[%s7166_s3 + $0x748] sm:$0xff] }
 0x37a   :  { %4141 = vmatprep.subr.bf16.mxu1 %v4140_v14  ;;  %v3703_v14 = vld [vmem:[%s7166_s3 + $0x740] sm:$0xff] }
 0x37c   :  { %2209 = vmatmul.mubr.f32.gmra.mrb[14].mxu1 %v6285_v24 }
 0x37d   :  { %4143 = vmatpush1.bf16.msra.mxu1 %v4142_v52  ;;  %3695 = vmatprep.mubr.msk.f32.mxu1 %vm1767_vm6, %v5775_v50  ;;  %v4150_v50 = vpack.c.bf16 %v3673_v35, %v3671_v39  ;;  %v4168_v52 = vpack.c.bf16 %v3706_v28, %v3704_v11  ;;  %v3711_v35 = vld [vmem:[%s7166_s3 + $0x780] sm:$0xff] }
 0x37e   :  { %4145 = vmatprep.subr.bf16.mxu1 %v4144_v33  ;;  %v4170_v33 = vpack.c.bf16 %v3705_v55, %v3703_v14  ;;  %v3732_v14 = vld [vmem:[%s7166_s3 + $0x828] sm:$0xff]  ;;  %v3734_v55 = vld [vmem:[%s7166_s3 + $0x838] sm:$0xff] }
 0x381   :  { %4147 = vmatpush1.bf16.msra.mxu1 %v4146_v63  ;;  %v3714_v63 = vld [vmem:[%s7166_s3 + $0x798] sm:$0xff] }
 0x382   :  { %4149 = vmatprep.subr.bf16.mxu1 %v4148_v38  ;;  %v4174_v38 = vpack.c.bf16 %v3709_v0, %v3707_v62  ;;  %v4176_v39 = vpack.c.bf16 %v3714_v63, %v3712_v7  ;;  %v3735_v63 = vld [vmem:[%s7166_s3 + $0x840] sm:$0xff] }
 0x385   :  { %4151 = vmatpush1.bf16.msra.mxu1 %v4150_v50  ;;  %v4178_v50 = vpack.c.bf16 %v3713_v31, %v3711_v35  ;;  %v3742_v35 = vld [vmem:[%s7166_s3 + $0x878] sm:$0xff] }
 0x386   :  { %4153 = vmatprep.subr.bf16.mxu1 %v4152_v34 }
 0x389   :  { %4155 = vmatpush1.bf16.msra.mxu1 %v4154_v44  ;;  %v4182_v44 = vpack.c.bf16 %v3717_v41, %v3715_v40  ;;  %v3746_v40 = vld [vmem:[%s7166_s3 + $0x898] sm:$0xff] }
 0x38a   :  { %4157 = vmatprep.subr.bf16.mxu1 %v4156_v48  ;;  %v4184_v48 = vpack.c.bf16 %v3722_v18, %v3720_v19  ;;  %v3743_v19 = vld [vmem:[%s7166_s3 + $0x880] sm:$0xff]  ;;  %v3745_v18 = vld [vmem:[%s7166_s3 + $0x890] sm:$0xff] }
 0x38d   :  { %4159 = vmatpush1.bf16.msra.mxu1 %v4158_v12  ;;  %v4186_v12 = vpack.c.bf16 %v3721_v36, %v3719_v56  ;;  %v4210_v56 = vpack.c.bf16 %v3745_v18, %v3743_v19  ;;  %v2751_v19 = vld [vmem:[%s7168_s5 + $0xb8] sm:$0xff] }
 0x38e   :  { %4161 = vmatprep.subr.bf16.mxu1 %v4160_v13  ;;  %v4188_v13 = vpack.c.bf16 %v3726_v57, %v3724_v37  ;;  %v3747_v37 = vld [vmem:[%s7166_s3 + $0x8a0] sm:$0xff]  ;;  %v3749_v57 = vld [vmem:[%s7166_s3 + $0x8b0] sm:$0xff] }
 0x38f   :  { %v4214_v51 = vpack.c.bf16 %v3749_v57, %v3747_v37  ;;  %v2755_v37 = vld [vmem:[%s7168_s5 + $0xd8] sm:$0xff] }
 0x391   :  { %4163 = vmatpush1.bf16.msra.mxu1 %v4162_v61  ;;  %v1558_v61 = vpop.permute.xlu0 %1557 }
 0x392   :  { %4165 = vmatprep.subr.bf16.mxu1 %v4164_v4  ;;  %v1560_v4 = vpop.permute.xlu1 %1559 }
 0x393   :  { %v1576_v11 = vsel %vm1565_vm5, %v1558_v61, %v1560_v4  ;;  %v1623_v28 = vmax.f32 %v5686_v6, %v1560_v4  ;;  %v3731_v6 = vld [vmem:[%s7166_s3 + $0x820] sm:$0xff]  ;;  %v3756_v61 = vld [vmem:[%s7166_s3 + $0x8e8] sm:$0xff]  ;;  %v3758_v4 = vld [vmem:[%s7166_s3 + $0x8f8] sm:$0xff] }
 0x394   :  { %v1622_v23 = vmax.f32 %v5684_v5, %v1576_v11  ;;  %v3738_v5 = vld [vmem:[%s7166_s3 + $0x858] sm:$0xff] }
 0x395   :  { %4167 = vmatpush1.bf16.msra.mxu1 %v4166_v9  ;;  %v3727_v9 = vld [vmem:[%s7166_s3 + $0x800] sm:$0xff] }
 0x396   :  { %3693 = vmatprep.subr.msk.mxu1 %vm1792_vm4, %v3692_v29  ;;  %v3729_v29 = vld [vmem:[%s7166_s3 + $0x810] sm:$0xff]  ;;  %v6492_v0 = vmax.f32 %v1622_v23, 0.0 }
 0x397   :  { %v4194_v15 = vpack.c.bf16 %v3729_v29, %v3727_v9  ;;  %v3755_v9 = vld [vmem:[%s7166_s3 + $0x8e0] sm:$0xff]  ;;  %v3757_v29 = vld [vmem:[%s7166_s3 + $0x8f0] sm:$0xff] }
 0x398   :  { %v4222_v11 = vpack.c.bf16 %v3757_v29, %v3755_v9  ;;  %v2761_v9 = vld [vmem:[%s7168_s5 + $0x108] sm:$0xff]  ;;  %v2763_v29 = vld [vmem:[%s7168_s5 + $0x118] sm:$0xf] }
 0x399   :  { %3694 = vmatpush1.msk.msra.mxu1 %vm1792_vm4, %v3691_v54  ;;  %v4196_v54 = vpack.c.bf16 %v3734_v55, %v3732_v14  ;;  %v3759_v14 = vld [vmem:[%s7166_s3 + $0x900] sm:$0x3f]  ;;  %v1562_v55 = vpop.permute.xlu0 %1561 }
 0x39a   :  { %2364 = vmatmul.mubr.f32.vlgmr.msra.gmra.mrb[0].mxu1 %v5783_v30  ;;  %4169 = vmatprep.subr.bf16.mxu1 %v4168_v52  ;;  %v3716_v30 = vld [vmem:[%s7166_s3 + $0x7a8] sm:$0xff]  ;;  %v3733_v52 = vld [vmem:[%s7166_s3 + $0x830] sm:$0xff] }
 0x39b   :  { %3696 = vmatprep.mubr.msk.f32.mxu1 %vm1767_vm6, %v5809_v49  ;;  %4171 = vmatpush1.bf16.msra.mxu1 %v4170_v33  ;;  %v4180_v34 = vpack.c.bf16 %v3718_v32, %v3716_v30  ;;  %v6481_v33 = vmax.f32 %v1623_v28, 0.0  ;;  %v4198_v62 = vpack.c.bf16 %v3733_v52, %v3731_v6  ;;  %v3739_v32 = vld [vmem:[%s7166_s3 + $0x860] sm:$0xff]  ;;  %v3760_v28 = vld [vmem:[%s7166_s3 + $0x908] sm:$0x3f]  ;;  %v2734_v6 = vld [vmem:[%s7168_s5 + $0x30] sm:$0xff] }
 0x39c   :  { %4173 = vmatprep.subr.bf16.mxu1 %v4172_v25  ;;  %v3736_v25 = vld [vmem:[%s7166_s3 + $0x848] sm:$0xff] }
 0x39d   :  { %v4200_v7 = vpack.c.bf16 %v3738_v5, %v3736_v25  ;;  %v2737_v52 = vld [vmem:[%s7168_s5 + $0x48] sm:$0xff] }
 0x39e   :  { %2370 = vmatmul.mubr.f32.gmra.mrb[2].mxu1 %v5817_v59 }
 0x39f   :  { %3697 = vmatprep.mubr.msk.f32.mxu1 %vm1767_vm6, %v5843_v22  ;;  %4175 = vmatpush1.bf16.msra.mxu1 %v4174_v38  ;;  %v3737_v38 = vld [vmem:[%s7166_s3 + $0x850] sm:$0xff] }
 0x3a0   :  { %4177 = vmatprep.subr.bf16.mxu1 %v4176_v39  ;;  %v3740_v39 = vld [vmem:[%s7166_s3 + $0x868] sm:$0xff]  ;;  %v4202_v31 = vpack.c.bf16 %v3737_v38, %v3735_v63  ;;  %v2743_v63 = vld [vmem:[%s7168_s5 + $0x78] sm:$0xff] }
 0x3a1   :  { %v4204_v30 = vpack.c.bf16 %v3742_v35, %v3740_v39  ;;  %v2740_v35 = vld [vmem:[%s7168_s5 + $0x60] sm:$0xff] }
 0x3a2   :  { %2376 = vmatmul.mubr.f32.gmra.mrb[4].mxu1 %v5851_v27 }
 0x3a3   :  { %3698 = vmatprep.mubr.msk.f32.mxu1 %vm1767_vm6, %v5877_v46  ;;  %4179 = vmatpush1.bf16.msra.mxu1 %v4178_v50  ;;  %v3741_v50 = vld [vmem:[%s7166_s3 + $0x870] sm:$0xff] }
 0x3a4   :  { %4181 = vmatprep.subr.bf16.mxu1 %v4180_v34  ;;  %v3744_v34 = vld [vmem:[%s7166_s3 + $0x888] sm:$0xff] }
 0x3a5   :  { %v4208_v41 = vpack.c.bf16 %v3746_v40, %v3744_v34  ;;  %v2744_v40 = vld [vmem:[%s7168_s5 + $0x80] sm:$0xff] }
 0x3a6   :  { %2382 = vmatmul.mubr.f32.gmra.mrb[6].mxu1 %v5885_v58 }
 0x3a7   :  { %3699 = vmatprep.mubr.msk.f32.mxu1 %vm1767_vm6, %v5911_v16  ;;  %4183 = vmatpush1.bf16.msra.mxu1 %v4182_v44  ;;  %v3748_v44 = vld [vmem:[%s7166_s3 + $0x8a8] sm:$0xff] }
 0x3a8   :  { %4185 = vmatprep.subr.bf16.mxu1 %v4184_v48  ;;  %v3750_v48 = vld [vmem:[%s7166_s3 + $0x8b8] sm:$0xff] }
 0x3a9   :  { %v4212_v36 = vpack.c.bf16 %v3750_v48, %v3748_v44  ;;  %v2748_v48 = vld [vmem:[%s7168_s5 + $0xa0] sm:$0xff] }
 0x3aa   :  { %2388 = vmatmul.mubr.f32.gmra.mrb[8].mxu1 %v5919_v26 }
 0x3ab   :  { %3700 = vmatprep.mubr.msk.f32.mxu1 %vm1767_vm6, %v5939_v42  ;;  %4187 = vmatpush1.bf16.msra.mxu1 %v4186_v12  ;;  %v3752_v12 = vld [vmem:[%s7166_s3 + $0x8c8] sm:$0xff] }
 0x3ac   :  { %4189 = vmatprep.subr.bf16.mxu1 %v4188_v13  ;;  %v3754_v13 = vld [vmem:[%s7166_s3 + $0x8d8] sm:$0xff] }
 0x3ad   :  { %v4216_v53 = vpack.c.bf16 %v3754_v13, %v3752_v12  ;;  %v2752_v13 = vld [vmem:[%s7168_s5 + $0xc0] sm:$0xff] }
 0x3ae   :  { %2394 = vmatmul.mubr.f32.gmra.mrb[10].mxu1 %v5941_v43 }
 0x3af   :  { %3701 = vmatprep.mubr.msk.f32.mxu1 %vm1767_vm6, %v6274_v17  ;;  %4191 = vmatpush1.bf16.msra.mxu1 %v4190_v1  ;;  %v4218_v1 = vpack.c.bf16 %v3753_v60, %v3751_v2  ;;  %v2759_v2 = vld [vmem:[%s7168_s5 + $0xf8] sm:$0xff] }
 0x3b0   :  { %4193 = vmatprep.subr.bf16.mxu1 %v4192_v8  ;;  %v4220_v8 = vpack.c.bf16 %v3758_v4, %v3756_v61  ;;  %v2756_v4 = vld [vmem:[%s7168_s5 + $0xe0] sm:$0xff] }
 0x3b2   :  { %2400 = vmatmul.mubr.f32.gmra.mrb[12].mxu1 %v6285_v24 }
 0x3b3   :  { %3702 = vmatprep.mubr.msk.f32.mxu1 %vm1767_vm6, %v6481_v33  ;;  %4195 = vmatpush1.bf16.msra.mxu1 %v4194_v15 }
 0x3b4   :  { %4197 = vmatprep.subr.bf16.mxu1 %v4196_v54  ;;  %v2732_v54 = vld [vmem:[%s7168_s5 + $0x20] sm:$0xff] }
 0x3b5   :  { %v4230_v25 = vpack.c.bf16 %v2734_v6, %v2732_v54 }
 0x3b6   :  { %2406 = vmatmul.mubr.f32.gmra.mrb[14].mxu1 %v6492_v0 }
 0x3b7   :  { %4199 = vmatpush1.bf16.msra.mxu1 %v4198_v62  ;;  %3763 = vmatprep.mubr.msk.f32.mxu1 %vm1767_vm6, %v5809_v49  ;;  %v4206_v49 = vpack.c.bf16 %v3741_v50, %v3739_v32  ;;  %v2736_v62 = vld [vmem:[%s7168_s5 + $0x40] sm:$0xff]  ;;  %v2747_v32 = vld [vmem:[%s7168_s5 + $0x98] sm:$0xff] }
 0x3b8   :  { %4201 = vmatprep.subr.bf16.mxu1 %v4200_v7  ;;  %v2741_v7 = vld [vmem:[%s7168_s5 + $0x68] sm:$0xff] }
 0x3b9   :  { %v4236_v39 = vpack.c.bf16 %v2743_v63, %v2741_v7 }
 0x3bb   :  { %4203 = vmatpush1.bf16.msra.mxu1 %v4202_v31  ;;  %v2742_v31 = vld [vmem:[%s7168_s5 + $0x70] sm:$0xff] }
 0x3bc   :  { %4205 = vmatprep.subr.bf16.mxu1 %v4204_v30  ;;  %v2745_v30 = vld [vmem:[%s7168_s5 + $0x88] sm:$0xff]  ;;  %v4238_v50 = vpack.c.bf16 %v2742_v31, %v2740_v35 }
 0x3bd   :  { %v4240_v34 = vpack.c.bf16 %v2747_v32, %v2745_v30 }
 0x3bf   :  { %4207 = vmatpush1.bf16.msra.mxu1 %v4206_v49  ;;  %v2746_v49 = vld [vmem:[%s7168_s5 + $0x90] sm:$0xff] }
 0x3c0   :  { %4209 = vmatprep.subr.bf16.mxu1 %v4208_v41  ;;  %v2749_v41 = vld [vmem:[%s7168_s5 + $0xa8] sm:$0xff]  ;;  %v4242_v18 = vpack.c.bf16 %v2746_v49, %v2744_v40 }
 0x3c1   :  { %v4244_v44 = vpack.c.bf16 %v2751_v19, %v2749_v41 }
 0x3c3   :  { %4211 = vmatpush1.bf16.msra.mxu1 %v4210_v56  ;;  %v2750_v56 = vld [vmem:[%s7168_s5 + $0xb0] sm:$0xff] }
 0x3c4   :  { %4213 = vmatprep.subr.bf16.mxu1 %v4212_v36  ;;  %v2753_v36 = vld [vmem:[%s7168_s5 + $0xc8] sm:$0xff]  ;;  %v4246_v57 = vpack.c.bf16 %v2750_v56, %v2748_v48 }
 0x3c5   :  { %v4248_v12 = vpack.c.bf16 %v2755_v37, %v2753_v36 }
 0x3c7   :  { %4215 = vmatpush1.bf16.msra.mxu1 %v4214_v51  ;;  %v2754_v51 = vld [vmem:[%s7168_s5 + $0xd0] sm:$0xff] }
 0x3c8   :  { %4217 = vmatprep.subr.bf16.mxu1 %v4216_v53  ;;  %v2757_v53 = vld [vmem:[%s7168_s5 + $0xe8] sm:$0xff]  ;;  %v4250_v60 = vpack.c.bf16 %v2754_v51, %v2752_v13 }
 0x3c9   :  { %v4252_v61 = vpack.c.bf16 %v2759_v2, %v2757_v53  ;;  %v3774_v2 = vld [vmem:[%s7168_s5 + $0x120] sm:$0xff] }
 0x3cb   :  { %4219 = vmatpush1.bf16.msra.mxu1 %v4218_v1  ;;  %v2758_v1 = vld [vmem:[%s7168_s5 + $0xf0] sm:$0xff] }
 0x3cc   :  { %4221 = vmatprep.subr.bf16.mxu1 %v4220_v8  ;;  %v4254_v8 = vpack.c.bf16 %v2758_v1, %v2756_v4  ;;  %v3779_v1 = vld [vmem:[%s7168_s5 + $0x148] sm:$0xff] }
 0x3cf   :  { %4223 = vmatpush1.bf16.msra.mxu1 %v4222_v11  ;;  %v4256_v11 = vpack.c.bf16 %v2763_v29, %v2761_v9 }
 0x3d0   :  { %3761 = vmatprep.subr.msk.mxu1 %vm1792_vm4, %v3760_v28  ;;  %v2760_v28 = vld [vmem:[%s7168_s5 + $0x100] sm:$0xff] }
 0x3d3   :  { %3762 = vmatpush1.msk.msra.mxu1 %vm1792_vm4, %v3759_v14  ;;  %v2762_v14 = vld [vmem:[%s7168_s5 + $0x110] sm:$0xf] }
 0x3d4   :  { %2561 = vmatmul.mubr.f32.vlgmr.msra.gmra.mrb[0].mxu1 %v5817_v59  ;;  %v1564_v59 = vpop.permute.xlu1 %1563 }
 0x3d5   :  { %3764 = vmatprep.mubr.msk.f32.mxu1 %vm1767_vm6, %v5843_v22  ;;  %v1577_v22 = vsel %vm1565_vm5, %v1562_v55, %v1564_v59  ;;  %v4259_v55 = vpack.c.bf16 %v2762_v14, %v2760_v28 }
 0x3d8   :  { %2567 = vmatmul.mubr.f32.gmra.mrb[2].mxu1 %v5851_v27  ;;  %v1625_v27 = vmax.f32 %v5698_v21, %v1564_v59  ;;  %v2731_v21 = vld [vmem:[%s7168_s5 + $0x18] sm:$0xff]  ;;  %v2625_v59 = vld [vmem:[%s7169_s4] sm:$0x3]  ;;  %s4679_s4 = smov 108  }
 0x3d9   :  { %3765 = vmatprep.mubr.msk.f32.mxu1 %vm1767_vm6, %v5877_v46  ;;  %v1624_v46 = vmax.f32 %v5696_v20, %v1577_v22  ;;  %v3775_v22 = vld [vmem:[%s7168_s5 + $0x128] sm:$0xff] }
 0x3dc   :  { %2573 = vmatmul.mubr.f32.gmra.mrb[4].mxu1 %v5885_v58  ;;  %v1649_v58 = vmax.f32 %v1625_v27, 0.0  ;;  %v3777_v27 = vld [vmem:[%s7168_s5 + $0x138] sm:$0xff] }
 0x3dd   :  { %3766 = vmatprep.mubr.msk.f32.mxu1 %vm1767_vm6, %v5911_v16  ;;  %v1648_v16 = vmax.f32 %v1624_v46, 0.0  ;;  %v4262_v46 = vpack.c.bf16 %v3777_v27, %v3775_v22  ;;  %v3783_v22 = vld [vmem:[%s7168_s5 + $0x168] sm:$0xff]  ;;  %v3785_v27 = vld [vmem:[%s7168_s5 + $0x178] sm:$0xff] }
 0x3e0   :  { %2579 = vmatmul.mubr.f32.gmra.mrb[6].mxu1 %v5919_v26  ;;  %v2729_v26 = vld [vmem:[%s7168_s5 + $0x8] sm:$0xff] }
 0x3e1   :  { %3767 = vmatprep.mubr.msk.f32.mxu1 %vm1767_vm6, %v5939_v42  ;;  %v2728_v42 = vld [vmem:[%s7168_s5] sm:$0xff]  ;;  %v4224_v20 = vpack.c.bf16 %v2731_v21, %v2729_v26  ;;  %v2634_v21 = vrot.slane %v2625_v59, %v5526_v47 }
 0x3e3   :  { %4225 = vmatprep.subr.bf16.mxu1 %v4224_v20 }
 0x3e4   :  { %2585 = vmatmul.mubr.f32.gmra.mrb[8].mxu1 %v5941_v43  ;;  %v2730_v43 = vld [vmem:[%s7168_s5 + $0x10] sm:$0xff] }
 0x3e5   :  { %3768 = vmatprep.mubr.msk.f32.mxu1 %vm1767_vm6, %v6274_v17  ;;  %v2733_v17 = vld [vmem:[%s7168_s5 + $0x28] sm:$0xff]  ;;  %v4226_v15 = vpack.c.bf16 %v2730_v43, %v2728_v42 }
 0x3e7   :  { %4227 = vmatpush1.bf16.msra.mxu1 %v4226_v15 }
 0x3e8   :  { %2591 = vmatmul.mubr.f32.gmra.mrb[10].mxu1 %v6285_v24  ;;  %v2735_v24 = vld [vmem:[%s7168_s5 + $0x38] sm:$0xff] }
 0x3e9   :  { %3769 = vmatprep.mubr.msk.f32.mxu1 %vm1767_vm6, %v6481_v33  ;;  %v4228_v23 = vpack.c.bf16 %v2735_v24, %v2733_v17  ;;  %v2739_v33 = vld [vmem:[%s7168_s5 + $0x58] sm:$0xff] }
 0x3ea   :  { %v4232_v5 = vpack.c.bf16 %v2739_v33, %v2737_v52 }
 0x3eb   :  { %4229 = vmatprep.subr.bf16.mxu1 %v4228_v23 }
 0x3ec   :  { %2597 = vmatmul.mubr.f32.gmra.mrb[12].mxu1 %v6492_v0  ;;  %v2738_v0 = vld [vmem:[%s7168_s5 + $0x50] sm:$0xff] }
 0x3ed   :  { %3770 = vmatprep.mubr.msk.f32.mxu1 %vm1767_vm6, %v1649_v58  ;;  %4231 = vmatpush1.bf16.msra.mxu1 %v4230_v25  ;;  %v4234_v38 = vpack.c.bf16 %v2738_v0, %v2736_v62 }
 0x3ee   :  { %4233 = vmatprep.subr.bf16.mxu1 %v4232_v5 }
 0x3f0   :  { %2603 = vmatmul.mubr.f32.gmra.mrb[14].mxu1 %v1648_v16  ;;  %v2630_v16 = vrot.slane %v2625_v59, %v5521_v45  ;;  %v3780_v59 = vld [vmem:[%s7168_s5 + $0x150] sm:$0xff] }
 0x3f1   :  { %4235 = vmatpush1.bf16.msra.mxu1 %v4234_v38 }
 0x3f2   :  { %4237 = vmatprep.subr.bf16.mxu1 %v4236_v39 }
 0x3f5   :  { %4239 = vmatpush1.bf16.msra.mxu1 %v4238_v50 }
 0x3f6   :  { %4241 = vmatprep.subr.bf16.mxu1 %v4240_v34 }
 0x3f9   :  { %4243 = vmatpush1.bf16.msra.mxu1 %v4242_v18 }
 0x3fa   :  { %4245 = vmatprep.subr.bf16.mxu1 %v4244_v44 }
 0x3fd   :  { %4247 = vmatpush1.bf16.msra.mxu1 %v4246_v57 }
 0x3fe   :  { %4249 = vmatprep.subr.bf16.mxu1 %v4248_v12 }
 0x401   :  { %4251 = vmatpush1.bf16.msra.mxu1 %v4250_v60  ;;  %v3776_v60 = vld [vmem:[%s7168_s5 + $0x130] sm:$0xff] }
 0x402   :  { %4253 = vmatprep.subr.bf16.mxu1 %v4252_v61 }
 0x405   :  { %4255 = vmatpush1.bf16.msra.mxu1 %v4254_v8  ;;  %v3781_v8 = vld [vmem:[%s7168_s5 + $0x158] sm:$0xff] }
 0x406   :  { %4258 = vmatprep.subr.msk.bf16.mxu1 %vm4750_vm2, %v4256_v11  ;;  %v4264_v11 = vpack.c.bf16 %v3776_v60, %v3774_v2  ;;  %v4266_v14 = vpack.c.bf16 %v3781_v8, %v3779_v1  ;;  %v3814_v8 = vld [vmem:[%s7168_s5 + $0x248] sm:$0xff] }
 0x409   :  { %4261 = vmatpush1.bf16.msk.msra.mxu1 %vm4750_vm2, %v4259_v55  ;;  %v3778_v55 = vld [vmem:[%s7168_s5 + $0x140] sm:$0xff] }
 0x40a   :  { %4263 = vmatprep.subr.bf16.mxu1 %v4262_v46  ;;  %v4268_v46 = vpack.c.bf16 %v3780_v59, %v3778_v55  ;;  %v3813_v55 = vld [vmem:[%s7168_s5 + $0x240] sm:$0xff]  ;;  %v3815_v59 = vld [vmem:[%s7168_s5 + $0x250] sm:$0xff] }
 0x4a7   :  { %v2562_v58 = vpop.f32.mrb[0].mxu1 }
 0x4a8   :  { %v2564_v26 = vpop.f32.mrb[1].mxu1  ;;  %v2637_v20 = vadd.f32 %v2630_v16, %v2562_v58 }
 0x4a9   :  { %v2638_v24 = vadd.f32 %v2634_v21, %v2564_v26  ;;  %v3782_v26 = vld [vmem:[%s7168_s5 + $0x160] sm:$0xff] }
 0x4ab   :  { %v2568_v42 = vpop.f32.mrb[2].mxu1 }
 0x4ac   :  { %v2639_v43 = vadd.f32 %v2630_v16, %v2568_v42  ;;  %v2570_v17 = vpop.f32.mrb[3].mxu1 }
 0x4ad   :  { %v2640_v15 = vadd.f32 %v2634_v21, %v2570_v17 }
 0x4ae   :  { %v2653_v23 = vmax.f32 %v2637_v20, %v2639_v43  ;;  %v3787_v20 = vld [vmem:[%s7168_s5 + $0x188] sm:$0xff]  ;;  %v3789_v43 = vld [vmem:[%s7168_s5 + $0x198] sm:$0xff] }
 0x4af   :  { %v2654_v54 = vmax.f32 %v2638_v24, %v2640_v15  ;;  %v2574_v6 = vpop.f32.mrb[4].mxu1  ;;  %v4274_v15 = vpack.c.bf16 %v3789_v43, %v3787_v20  ;;  %v3824_v20 = vld [vmem:[%s7168_s5 + $0x298] sm:$0xff] }
 0x4b0   :  { %v2576_v52 = vpop.f32.mrb[5].mxu1  ;;  %2669 = vrot.lane.b32.xlu0 %v2653_v23, %s4679_s4  ;;  %v2641_v25 = vadd.f32 %v2630_v16, %v2574_v6  ;;  %v3791_v6 = vld [vmem:[%s7168_s5 + $0x1a8] sm:$0xff] }
 0x4b1   :  { %2671 = vrot.lane.b32.xlu1 %v2654_v54, %s4679_s4  ;;  %v2642_v0 = vadd.f32 %v2634_v21, %v2576_v52  ;;  %v3793_v52 = vld [vmem:[%s7168_s5 + $0x1b8] sm:$0xff] }
 0x4b3   :  { %v2580_v33 = vpop.f32.mrb[6].mxu1 }
 0x4b4   :  { %v2643_v5 = vadd.f32 %v2630_v16, %v2580_v33  ;;  %v2582_v62 = vpop.f32.mrb[7].mxu1 }
 0x4b5   :  { %v2644_v7 = vadd.f32 %v2634_v21, %v2582_v62  ;;  %v3792_v62 = vld [vmem:[%s7168_s5 + $0x1b0] sm:$0xff] }
 0x4b6   :  { %v6719_v63 = vmax.f32 %v2641_v25, %v2643_v5  ;;  %v4278_v25 = vpack.c.bf16 %v3793_v52, %v3791_v6  ;;  %v3790_v5 = vld [vmem:[%s7168_s5 + $0x1a0] sm:$0xff] }
 0x4b7   :  { %v2656_v38 = vmax.f32 %v2642_v0, %v2644_v7  ;;  %v2586_v39 = vpop.f32.mrb[8].mxu1  ;;  %v3795_v0 = vld [vmem:[%s7168_s5 + $0x1c8] sm:$0xff]  ;;  %v3797_v7 = vld [vmem:[%s7168_s5 + $0x1d8] sm:$0xff] }
 0x4b8   :  { %v2588_v35 = vpop.f32.mrb[9].mxu1  ;;  %2673 = vrot.lane.b32.xlu0 %v6719_v63, %s4679_s4  ;;  %v2645_v30 = vadd.f32 %v2630_v16, %v2586_v39  ;;  %v4282_v39 = vpack.c.bf16 %v3797_v7, %v3795_v0 }
 0x4b9   :  { %2675 = vrot.lane.b32.xlu1 %v2656_v38, %s4679_s4  ;;  %v2646_v34 = vadd.f32 %v2634_v21, %v2588_v35  ;;  %v3794_v35 = vld [vmem:[%s7168_s5 + $0x1c0] sm:$0xff] }
 0x4bb   :  { %v2592_v31 = vpop.f32.mrb[10].mxu1 }
 0x4bc   :  { %v2647_v32 = vadd.f32 %v2630_v16, %v2592_v31  ;;  %v2594_v50 = vpop.f32.mrb[11].mxu1  ;;  %v3796_v31 = vld [vmem:[%s7168_s5 + $0x1d0] sm:$0xff] }
 0x4bd   :  { %v2648_v40 = vadd.f32 %v2634_v21, %v2594_v50  ;;  %v4284_v50 = vpack.c.bf16 %v3796_v31, %v3794_v35  ;;  %v3834_v35 = vld [vmem:[%s7168_s5 + $0x2e8] sm:$0xff]  ;;  %v3836_v31 = vld [vmem:[%s7168_s5 + $0x2f8] sm:$0xff] }
 0x4be   :  { %v6724_v49 = vmax.f32 %v2645_v30, %v2647_v32  ;;  %v3799_v30 = vld [vmem:[%s7168_s5 + $0x1e8] sm:$0xff]  ;;  %v3801_v32 = vld [vmem:[%s7168_s5 + $0x1f8] sm:$0xff] }
 0x4bf   :  { %v6726_v41 = vmax.f32 %v2646_v34, %v2648_v40  ;;  %v2598_v19 = vpop.f32.mrb[12].mxu1  ;;  %v4286_v34 = vpack.c.bf16 %v3801_v32, %v3799_v30  ;;  %v3798_v40 = vld [vmem:[%s7168_s5 + $0x1e0] sm:$0xff]  ;;  %v4320_v32 = vpack.c.bf16 %v3836_v31, %v3834_v35  ;;  %v3870_v31 = vld [vmem:[%s7168_s5 + $0x3f0] sm:$0xff] }
 0x4c0   :  { %v2600_v18 = vpop.f32.mrb[13].mxu1  ;;  %2677 = vrot.lane.b32.xlu0 %v6724_v49, %s4679_s4  ;;  %v2649_v48 = vadd.f32 %v2630_v16, %v2598_v19  ;;  %v3800_v19 = vld [vmem:[%s7168_s5 + $0x1f0] sm:$0xff]  ;;  %v3868_v35 = vld [vmem:[%s7168_s5 + $0x3e0] sm:$0xff] }
 0x4c1   :  { %2679 = vrot.lane.b32.xlu1 %v6726_v41, %s4679_s4  ;;  %v2650_v37 = vadd.f32 %v2634_v21, %v2600_v18  ;;  %v3803_v18 = vld [vmem:[%s7168_s5 + $0x208] sm:$0xff] }
 0x4c3   :  { %v2604_v44 = vpop.f32.mrb[14].mxu1 }
 0x4c4   :  { %v2651_v56 = vadd.f32 %v2630_v16, %v2604_v44  ;;  %v2606_v36 = vpop.f32.mrb[15].mxu1  ;;  %v4270_v16 = vpack.c.bf16 %v3785_v27, %v3783_v22  ;;  %v3805_v44 = vld [vmem:[%s7168_s5 + $0x218] sm:$0xff]  ;;  %v3818_v27 = vld [vmem:[%s7168_s5 + $0x268] sm:$0xff] }
 0x4c5   :  { %v2652_v57 = vadd.f32 %v2634_v21, %v2606_v36  ;;  %v3784_v21 = vld [vmem:[%s7168_s5 + $0x170] sm:$0xff]  ;;  %v3802_v36 = vld [vmem:[%s7168_s5 + $0x200] sm:$0xff] }
 0x4c6   :  { %v6732_v12 = vmax.f32 %v2649_v48, %v2651_v56  ;;  %v4272_v24 = vpack.c.bf16 %v3784_v21, %v3782_v26  ;;  %v4288_v48 = vpack.c.bf16 %v3800_v19, %v3798_v40  ;;  %v4290_v56 = vpack.c.bf16 %v3805_v44, %v3803_v18  ;;  %v3817_v26 = vld [vmem:[%s7168_s5 + $0x260] sm:$0xff]  ;;  %v3838_v40 = vld [vmem:[%s7168_s5 + $0x308] sm:$0xff]  ;;  %v3840_v19 = vld [vmem:[%s7168_s5 + $0x318] sm:$0xff] }
 0x4c7   :  { %v6734_v13 = vmax.f32 %v2650_v37, %v2652_v57  ;;  %v3804_v37 = vld [vmem:[%s7168_s5 + $0x210] sm:$0xff]  ;;  %v3807_v57 = vld [vmem:[%s7168_s5 + $0x228] sm:$0xff]  ;;  %v4324_v44 = vpack.c.bf16 %v3840_v19, %v3838_v40  ;;  %v3872_v40 = vld [vmem:[%s7168_s5 + $0x400] sm:$0xff] }
 0x4c8   :  { %2681 = vrot.lane.b32.xlu0 %v6732_v12, %s4679_s4  ;;  %v4292_v2 = vpack.c.bf16 %v3804_v37, %v3802_v36  ;;  %v3842_v36 = vld [vmem:[%s7168_s5 + $0x328] sm:$0xff]  ;;  %v3844_v37 = vld [vmem:[%s7168_s5 + $0x338] sm:$0xff]  ;;  %v3874_v19 = vld [vmem:[%s7168_s5 + $0x410] sm:$0xff] }
 0x4c9   :  { %2683 = vrot.lane.b32.xlu1 %v6734_v13, %s4679_s4 }
 0x522   :  { %v2670_v51 = vpop.permute.xlu0 %2669 }
 0x523   :  { %v2672_v53 = vpop.permute.xlu1 %2671 }
 0x524   :  { %v2686_v61 = vsel %vm2685_vm7, %v2670_v51, %v2672_v53  ;;  %v2699_v4 = vmax.f32 %v2654_v54, %v2672_v53  ;;  %v3788_v54 = vld [vmem:[%s7168_s5 + $0x190] sm:$0xff]  ;;  %v3809_v51 = vld [vmem:[%s7168_s5 + $0x238] sm:$0xf] }
 0x525   :  { %v2698_v9 = vmax.f32 %v2653_v23, %v2686_v61  ;;  %v3786_v23 = vld [vmem:[%s7168_s5 + $0x180] sm:$0xff]  ;;  %v4294_v60 = vpack.c.bf16 %v3809_v51, %v3807_v57  ;;  %v4328_v51 = vpack.c.bf16 %v3844_v37, %v3842_v36  ;;  %v3878_v37 = vld [vmem:[%s7168_s5 + $0x430] sm:$0xff] }
 0x526   :  { %v2707_v29 = vmax.f32 %v2699_v4, 0.0  ;;  %v4276_v33 = vpack.c.bf16 %v3788_v54, %v3786_v23  ;;  %v3806_v61 = vld [vmem:[%s7168_s5 + $0x220] sm:$0xff]  ;;  %v3808_v4 = vld [vmem:[%s7168_s5 + $0x230] sm:$0xf]  ;;  %v3826_v23 = vld [vmem:[%s7168_s5 + $0x2a8] sm:$0xff] }
 0x527   :  { %v2706_v28 = vmax.f32 %v2698_v9, 0.0  ;;  %v3816_v9 = vld [vmem:[%s7168_s5 + $0x258] sm:$0xff]  ;;  %v3876_v36 = vld [vmem:[%s7168_s5 + $0x420] sm:$0xff] }
 0x528   :  { %3773 = vmatprep.mubr.msk.f32.mxu1 %vm2764_vm8, %v2707_v29  ;;  %v3828_v54 = vld [vmem:[%s7168_s5 + $0x2b8] sm:$0xff] }
 0x529   :  { %2839 = vmatmul.mubr.f32.vlgmr.msra.gmra.mrb[16].mxu1 %v2706_v28  ;;  %v4312_v52 = vpack.c.bf16 %v3828_v54, %v3826_v23  ;;  %v3860_v23 = vld [vmem:[%s7168_s5 + $0x3a0] sm:$0xff]  ;;  %v3862_v54 = vld [vmem:[%s7168_s5 + $0x3b0] sm:$0xff] }
 0x52a   :  { %4265 = vmatpush1.bf16.msra.mxu1 %v4264_v11  ;;  %v2674_v53 = vpop.permute.xlu0 %2673  ;;  %v4297_v11 = vpack.c.bf16 %v3808_v4, %v3806_v61  ;;  %v3848_v61 = vld [vmem:[%s7168_s5 + $0x358] sm:$0xf] }
 0x52b   :  { %v2676_v58 = vpop.permute.xlu1 %2675  ;;  %4267 = vmatprep.subr.bf16.mxu1 %v4266_v14  ;;  %v4300_v14 = vpack.c.bf16 %v3816_v9, %v3814_v8  ;;  %v3845_v9 = vld [vmem:[%s7168_s5 + $0x340] sm:$0xff] }
 0x52c   :  { %v2701_v42 = vmax.f32 %v2656_v38, %v2676_v58  ;;  %v4280_v38 = vpack.c.bf16 %v3792_v62, %v3790_v5  ;;  %v2687_v1 = vsel %vm2685_vm7, %v2674_v53, %v2676_v58  ;;  %v3830_v5 = vld [vmem:[%s7168_s5 + $0x2c8] sm:$0xff]  ;;  %v3832_v62 = vld [vmem:[%s7168_s5 + $0x2d8] sm:$0xff]  ;;  %v3841_v53 = vld [vmem:[%s7168_s5 + $0x320] sm:$0xff] }
 0x52d   :  { %v2700_v28 = vmax.f32 %v6719_v63, %v2687_v1  ;;  %v3820_v63 = vld [vmem:[%s7168_s5 + $0x278] sm:$0xff]  ;;  %v4316_v7 = vpack.c.bf16 %v3832_v62, %v3830_v5  ;;  %v3864_v5 = vld [vmem:[%s7168_s5 + $0x3c0] sm:$0xff]  ;;  %v3866_v62 = vld [vmem:[%s7168_s5 + $0x3d0] sm:$0xff] }
 0x52e   :  { %v2709_v17 = vmax.f32 %v2701_v42, 0.0  ;;  %4269 = vmatpush1.bf16.msra.mxu1 %v4268_v46  ;;  %v4302_v46 = vpack.c.bf16 %v3815_v59, %v3813_v55  ;;  %v3822_v42 = vld [vmem:[%s7168_s5 + $0x288] sm:$0xff]  ;;  %v3855_v55 = vld [vmem:[%s7168_s5 + $0x378] sm:$0xff] }
 0x52f   :  { %4271 = vmatprep.subr.bf16.mxu1 %v4270_v16  ;;  %v2708_v58 = vmax.f32 %v2700_v28, 0.0  ;;  %v4304_v16 = vpack.c.bf16 %v3820_v63, %v3818_v27 }
 0x530   :  { %3812 = vmatprep.mubr.msk.f32.mxu1 %vm2764_vm8, %v2709_v17  ;;  %v4308_v17 = vpack.c.bf16 %v3824_v20, %v3822_v42  ;;  %v3856_v42 = vld [vmem:[%s7168_s5 + $0x380] sm:$0xff] }
 0x532   :  { %4273 = vmatpush1.bf16.msra.mxu1 %v4272_v24  ;;  %v3821_v24 = vld [vmem:[%s7168_s5 + $0x280] sm:$0xff]  ;;  %v2678_v4 = vpop.permute.xlu0 %2677 }
 0x533   :  { %4275 = vmatprep.subr.bf16.mxu1 %v4274_v15  ;;  %v6852_v29 = vpop.permute.xlu1 %2679  ;;  %v3823_v15 = vld [vmem:[%s7168_s5 + $0x290] sm:$0xff] }
 0x534   :  { %v2703_v22 = vmax.f32 %v6726_v41, %v6852_v29  ;;  %v3819_v41 = vld [vmem:[%s7168_s5 + $0x270] sm:$0xff]  ;;  %v4310_v6 = vpack.c.bf16 %v3823_v15, %v3821_v24  ;;  %v2688_v28 = vsel %vm2685_vm7, %v2678_v4, %v6852_v29  ;;  %v3852_v29 = vld [vmem:[%s7168_s5 + $0x360] sm:$0xff]  ;;  %v3885_v4 = vld [vmem:[%s7168_s5 + $0x468] sm:$0xff] }
 0x535   :  { %v4306_v43 = vpack.c.bf16 %v3819_v41, %v3817_v26  ;;  %v2702_v27 = vmax.f32 %v6724_v49, %v2688_v28  ;;  %v3859_v49 = vld [vmem:[%s7168_s5 + $0x398] sm:$0xff]  ;;  %v3884_v28 = vld [vmem:[%s7168_s5 + $0x460] sm:$0xff] }
 0x536   :  { %4277 = vmatpush1.bf16.msra.mxu1 %v4276_v33  ;;  %v2711_v21 = vmax.f32 %v2703_v22, 0.0  ;;  %v3825_v33 = vld [vmem:[%s7168_s5 + $0x2a0] sm:$0xff] }
 0x537   :  { %4279 = vmatprep.subr.bf16.mxu1 %v4278_v25  ;;  %v3827_v25 = vld [vmem:[%s7168_s5 + $0x2b0] sm:$0xff]  ;;  %v2710_v41 = vmax.f32 %v2702_v27, 0.0 }
 0x538   :  { %v4314_v0 = vpack.c.bf16 %v3827_v25, %v3825_v33  ;;  %v4348_v33 = vpack.c.bf16 %v3862_v54, %v3860_v23  ;;  %v3218_v54 = vld [vmem:[%s7170_s7 + $0x60] sm:$0xff] }
 0x53a   :  { %4281 = vmatpush1.bf16.msra.mxu1 %v4280_v38  ;;  %v3829_v38 = vld [vmem:[%s7168_s5 + $0x2c0] sm:$0xff] }
 0x53b   :  { %4283 = vmatprep.subr.bf16.mxu1 %v4282_v39  ;;  %v3831_v39 = vld [vmem:[%s7168_s5 + $0x2d0] sm:$0xff]  ;;  %v6972_v59 = vpop.permute.xlu1 %2683 }
 0x53c   :  { %v4318_v30 = vpack.c.bf16 %v3831_v39, %v3829_v38  ;;  %v4352_v38 = vpack.c.bf16 %v3866_v62, %v3864_v5  ;;  %v3222_v62 = vld [vmem:[%s7170_s7 + $0x80] sm:$0xff] }
 0x53e   :  { %4285 = vmatpush1.bf16.msra.mxu1 %v4284_v50  ;;  %v3833_v50 = vld [vmem:[%s7168_s5 + $0x2e0] sm:$0xff] }
 0x53f   :  { %4287 = vmatprep.subr.bf16.mxu1 %v4286_v34  ;;  %v3835_v34 = vld [vmem:[%s7168_s5 + $0x2f0] sm:$0xff] }
 0x540   :  { %v4322_v18 = vpack.c.bf16 %v3835_v34, %v3833_v50  ;;  %v4356_v50 = vpack.c.bf16 %v3870_v31, %v3868_v35 }
 0x542   :  { %4289 = vmatpush1.bf16.msra.mxu1 %v4288_v48  ;;  %v3837_v48 = vld [vmem:[%s7168_s5 + $0x300] sm:$0xff] }
 0x543   :  { %4291 = vmatprep.subr.bf16.mxu1 %v4290_v56  ;;  %v3839_v56 = vld [vmem:[%s7168_s5 + $0x310] sm:$0xff] }
 0x544   :  { %v4326_v57 = vpack.c.bf16 %v3839_v56, %v3837_v48  ;;  %v4360_v48 = vpack.c.bf16 %v3874_v19, %v3872_v40  ;;  %v3891_v19 = vld [vmem:[%s7172_s8] ss:$0 sm:$0xff] }
 0x546   :  { %4293 = vmatpush1.bf16.msra.mxu1 %v4292_v2  ;;  %v3843_v2 = vld [vmem:[%s7168_s5 + $0x330] sm:$0xff] }
 0x547   :  { %4296 = vmatprep.subr.msk.bf16.mxu1 %vm4750_vm2, %v4294_v60  ;;  %v3846_v60 = vld [vmem:[%s7168_s5 + $0x348] sm:$0xff]  ;;  %v4330_v1 = vpack.c.bf16 %v3843_v2, %v3841_v53  ;;  %v4364_v53 = vpack.c.bf16 %v3878_v37, %v3876_v36 }
 0x548   :  { %v4332_v8 = vpack.c.bf16 %v3848_v61, %v3846_v60  ;;  %v3880_v60 = vld [vmem:[%s7168_s5 + $0x440] sm:$0xff]  ;;  %v3882_v61 = vld [vmem:[%s7168_s5 + $0x450] sm:$0xff] }
 0x54a   :  { %4299 = vmatpush1.bf16.msk.msra.mxu1 %vm4750_vm2, %v4297_v11  ;;  %v3847_v11 = vld [vmem:[%s7168_s5 + $0x350] sm:$0xf] }
 0x54b   :  { %4301 = vmatprep.subr.bf16.mxu1 %v4300_v14  ;;  %v3853_v14 = vld [vmem:[%s7168_s5 + $0x368] sm:$0xff]  ;;  %v4335_v22 = vpack.c.bf16 %v3847_v11, %v3845_v9  ;;  %v4368_v9 = vpack.c.bf16 %v3882_v61, %v3880_v60 }
 0x54c   :  { %v4338_v63 = vpack.c.bf16 %v3855_v55, %v3853_v14  ;;  %v3886_v14 = vld [vmem:[%s7168_s5 + $0x470] sm:$0xf] }
 0x54d   :  { %2958 = vmatmul.mubr.f32.vlgmr.msra.gmra.mrb[16].mxu1 %v2708_v58  ;;  %v2705_v58 = vmax.f32 %v6734_v13, %v6972_v59  ;;  %v3858_v13 = vld [vmem:[%s7168_s5 + $0x390] sm:$0xff] }
 0x54e   :  { %4303 = vmatpush1.bf16.msra.mxu1 %v4302_v46  ;;  %3851 = vmatprep.mubr.msk.f32.mxu1 %vm2764_vm8, %v2711_v21  ;;  %v3854_v46 = vld [vmem:[%s7168_s5 + $0x370] sm:$0xff]  ;;  %v4344_v24 = vpack.c.bf16 %v3858_v13, %v3856_v42  ;;  %v3213_v42 = vld [vmem:[%s7170_s7 + $0x38] sm:$0xff] }
 0x54f   :  { %4305 = vmatprep.subr.bf16.mxu1 %v4304_v16  ;;  %v3857_v16 = vld [vmem:[%s7168_s5 + $0x388] sm:$0xff]  ;;  %v4340_v26 = vpack.c.bf16 %v3854_v46, %v3852_v29  ;;  %v2713_v20 = vmax.f32 %v2705_v58, 0.0  ;;  %v4680_v58 = vmov 0.0|0.0  }
 0x550   :  { %v4342_v21 = vpack.c.bf16 %v3859_v49, %v3857_v16  ;;  %v3207_v29 = vld [vmem:[%s7170_s7 + $0x8] sm:$0xff]  ;;  %v3209_v16 = vld [vmem:[%s7170_s7 + $0x18] sm:$0xff] }
 0x552   :  { %4307 = vmatpush1.bf16.msra.mxu1 %v4306_v43  ;;  %v3861_v43 = vld [vmem:[%s7168_s5 + $0x3a8] sm:$0xff] }
 0x553   :  { %4309 = vmatprep.subr.bf16.mxu1 %v4308_v17  ;;  %v3863_v17 = vld [vmem:[%s7168_s5 + $0x3b8] sm:$0xff] }
 0x554   :  { %v4346_v15 = vpack.c.bf16 %v3863_v17, %v3861_v43  ;;  %v3215_v43 = vld [vmem:[%s7170_s7 + $0x48] sm:$0xff] }
 0x556   :  { %4311 = vmatpush1.bf16.msra.mxu1 %v4310_v6  ;;  %v3865_v6 = vld [vmem:[%s7168_s5 + $0x3c8] sm:$0xff] }
 0x557   :  { %4313 = vmatprep.subr.bf16.mxu1 %v4312_v52  ;;  %v3867_v52 = vld [vmem:[%s7168_s5 + $0x3d8] sm:$0xff] }
 0x558   :  { %v4350_v25 = vpack.c.bf16 %v3867_v52, %v3865_v6  ;;  %v3219_v6 = vld [vmem:[%s7170_s7 + $0x68] sm:$0xff] }
 0x559   :  { %v4395_v52 = vpack.c.bf16 %v3219_v6, %v3218_v54 }
 0x55a   :  { %4315 = vmatpush1.bf16.msra.mxu1 %v4314_v0  ;;  %v3869_v0 = vld [vmem:[%s7168_s5 + $0x3e8] sm:$0xff] }
 0x55b   :  { %4317 = vmatprep.subr.bf16.mxu1 %v4316_v7  ;;  %v3871_v7 = vld [vmem:[%s7168_s5 + $0x3f8] sm:$0xff] }
 0x55c   :  { %v4354_v39 = vpack.c.bf16 %v3871_v7, %v3869_v0  ;;  %v3223_v0 = vld [vmem:[%s7170_s7 + $0x88] sm:$0xff] }
 0x55d   :  { %v4401_v7 = vpack.c.bf16 %v3223_v0, %v3222_v62 }
 0x55e   :  { %4319 = vmatpush1.bf16.msra.mxu1 %v4318_v30  ;;  %v3873_v30 = vld [vmem:[%s7168_s5 + $0x408] sm:$0xff] }
 0x55f   :  { %4321 = vmatprep.subr.bf16.mxu1 %v4320_v32  ;;  %v3875_v32 = vld [vmem:[%s7168_s5 + $0x418] sm:$0xff] }
 0x560   :  { %v4358_v34 = vpack.c.bf16 %v3875_v32, %v3873_v30 }
 0x562   :  { %4323 = vmatpush1.bf16.msra.mxu1 %v4322_v18  ;;  %v3877_v18 = vld [vmem:[%s7168_s5 + $0x428] sm:$0xff] }
 0x563   :  { %4325 = vmatprep.subr.bf16.mxu1 %v4324_v44  ;;  %v3879_v44 = vld [vmem:[%s7168_s5 + $0x438] sm:$0xff] }
 0x564   :  { %v4362_v56 = vpack.c.bf16 %v3879_v44, %v3877_v18 }
 0x566   :  { %4327 = vmatpush1.bf16.msra.mxu1 %v4326_v57  ;;  %v3881_v57 = vld [vmem:[%s7168_s5 + $0x448] sm:$0xff] }
 0x567   :  { %4329 = vmatprep.subr.bf16.mxu1 %v4328_v51  ;;  %v3883_v51 = vld [vmem:[%s7168_s5 + $0x458] sm:$0xff] }
 0x568   :  { %v4366_v2 = vpack.c.bf16 %v3883_v51, %v3881_v57 }
 0x56a   :  { %4331 = vmatpush1.bf16.msra.mxu1 %v4330_v1  ;;  %v3887_v1 = vld [vmem:[%s7168_s5 + $0x478] sm:$0xf] }
 0x56b   :  { %4334 = vmatprep.subr.msk.bf16.mxu1 %vm4750_vm2, %v4332_v8  ;;  %v2682_v8 = vpop.permute.xlu0 %2681  ;;  %v4370_v11 = vpack.c.bf16 %v3887_v1, %v3885_v4 }
 0x56c   :  { %v2689_v55 = vsel %vm2685_vm7, %v2682_v8, %v6972_v59 }
 0x56d   :  { %v2704_v27 = vmax.f32 %v6732_v12, %v2689_v55  ;;  %v3208_v12 = vld [vmem:[%s7170_s7 + $0x10] sm:$0xff] }
 0x56e   :  { %4337 = vmatpush1.bf16.msk.msra.mxu1 %vm4750_vm2, %v4335_v22  ;;  %v4373_v22 = vpack.c.bf16 %v3886_v14, %v3884_v28  ;;  %v4380_v49 = vpack.c.bf16 %v3209_v16, %v3208_v12 }
 0x56f   :  { %4339 = vmatprep.subr.bf16.mxu1 %v4338_v63  ;;  %v3206_v63 = vld [vmem:[%s7170_s7] sm:$0xff]  ;;  %v2712_v59 = vmax.f32 %v2704_v27, 0.0 }
 0x570   :  { %v4377_v46 = vpack.c.bf16 %v3207_v29, %v3206_v63 }
 0x571   :  { %3077 = vmatmul.mubr.f32.vlgmr.msra.gmra.mrb[16].mxu1 %v2710_v41 }
 0x572   :  { %4341 = vmatpush1.bf16.msra.mxu1 %v4340_v26  ;;  %3890 = vmatprep.mubr.msk.f32.mxu1 %vm2764_vm8, %v2713_v20  ;;  %v3211_v26 = vld [vmem:[%s7170_s7 + $0x28] sm:$0xff]  ;;  %v3214_v20 = vld [vmem:[%s7170_s7 + $0x40] sm:$0xff] }
 0x573   :  { %4343 = vmatprep.subr.bf16.mxu1 %v4342_v21  ;;  %v4383_v41 = vpack.c.bf16 %v3211_v26, %v3210_v10  ;;  %v3212_v21 = vld [vmem:[%s7170_s7 + $0x30] sm:$0xff]  ;;  %v4389_v17 = vpack.c.bf16 %v3215_v43, %v3214_v20 }
 0x574   :  { %v4386_v13 = vpack.c.bf16 %v3213_v42, %v3212_v21 }
 0x576   :  { %4345 = vmatpush1.bf16.msra.mxu1 %v4344_v24  ;;  %v3216_v24 = vld [vmem:[%s7170_s7 + $0x50] sm:$0xff] }
 0x577   :  { %4347 = vmatprep.subr.bf16.mxu1 %v4346_v15  ;;  %v3217_v15 = vld [vmem:[%s7170_s7 + $0x58] sm:$0xff] }
 0x578   :  { %v4392_v23 = vpack.c.bf16 %v3217_v15, %v3216_v24 }
 0x57a   :  { %4349 = vmatpush1.bf16.msra.mxu1 %v4348_v33  ;;  %v3220_v33 = vld [vmem:[%s7170_s7 + $0x70] sm:$0xff] }
 0x57b   :  { %4351 = vmatprep.subr.bf16.mxu1 %v4350_v25  ;;  %v3221_v25 = vld [vmem:[%s7170_s7 + $0x78] sm:$0xff] }
 0x57c   :  { %v4398_v5 = vpack.c.bf16 %v3221_v25, %v3220_v33 }
 0x57e   :  { %4353 = vmatpush1.bf16.msra.mxu1 %v4352_v38  ;;  %v3224_v38 = vld [vmem:[%s7170_s7 + $0x90] sm:$0x3f] }
 0x57f   :  { %4355 = vmatprep.subr.bf16.mxu1 %v4354_v39  ;;  %v2714_v39 = vld [vmem:[%s7171_s6] sm:$0x3] }
 0x580   :  { %v2719_v35 = vrot.slane %v2714_v39, %v5521_v45  ;;  %v2723_v31 = vrot.slane %v2714_v39, %v5526_v47 }
 0x582   :  { %4357 = vmatpush1.bf16.msra.mxu1 %v4356_v50 }
 0x583   :  { %4359 = vmatprep.subr.bf16.mxu1 %v4358_v34 }
 0x586   :  { %4361 = vmatpush1.bf16.msra.mxu1 %v4360_v48 }
 0x587   :  { %4363 = vmatprep.subr.bf16.mxu1 %v4362_v56 }
 0x58a   :  { %4365 = vmatpush1.bf16.msra.mxu1 %v4364_v53 }
 0x58b   :  { %4367 = vmatprep.subr.bf16.mxu1 %v4366_v2 }
 0x58e   :  { %4369 = vmatpush1.bf16.msra.mxu1 %v4368_v9 }
 0x58f   :  { %4372 = vmatprep.subr.msk.bf16.mxu1 %vm4750_vm2, %v4370_v11 }
 0x592   :  { %4375 = vmatpush1.bf16.msk.msra.mxu1 %vm4750_vm2, %v4373_v22 }
 0x593   :  { %4376 = vmatprep.subr.bf16.mxu1 %v4680_v58 }
 0x595   :  { %3196 = vmatmul.mubr.f32.vlgmr.msra.gmra.mrb[16].mxu1 %v2712_v59 }
 0x596   :  { %4378 = vmatpush1.bf16.msra.mxu1 %v4377_v46 }
 0x597   :  { %4379 = vmatprep.subr.bf16.mxu1 %v4680_v58 }
 0x59a   :  { %4381 = vmatpush1.bf16.msra.mxu1 %v4380_v49 }
 0x59b   :  { %4382 = vmatprep.subr.bf16.mxu1 %v4680_v58 }
 0x59e   :  { %4384 = vmatpush1.bf16.msra.mxu1 %v4383_v41 }
 0x59f   :  { %4385 = vmatprep.subr.bf16.mxu1 %v4680_v58 }
 0x5a2   :  { %4387 = vmatpush1.bf16.msra.mxu1 %v4386_v13 }
 0x5a3   :  { %4388 = vmatprep.subr.bf16.mxu1 %v4680_v58 }
 0x5a6   :  { %4390 = vmatpush1.bf16.msra.mxu1 %v4389_v17 }
 0x5a7   :  { %4391 = vmatprep.subr.bf16.mxu1 %v4680_v58 }
 0x5aa   :  { %4393 = vmatpush1.bf16.msra.mxu1 %v4392_v23 }
 0x5ab   :  { %4394 = vmatprep.subr.bf16.mxu1 %v4680_v58 }
 0x5ae   :  { %4396 = vmatpush1.bf16.msra.mxu1 %v4395_v52 }
 0x5af   :  { %4397 = vmatprep.subr.bf16.mxu1 %v4680_v58 }
 0x5b2   :  { %4399 = vmatpush1.bf16.msra.mxu1 %v4398_v5 }
 0x5b3   :  { %4400 = vmatprep.subr.bf16.mxu1 %v4680_v58 }
 0x5b6   :  { %4402 = vmatpush1.bf16.msra.mxu1 %v4401_v7 }
 0x5b7   :  { %3275 = vmatprep.subr.mxu1 %v4676_v3 }
 0x5ba   :  { %3892 = vmatpush1.msk.msra.mxu1 %vm1792_vm4, %v3224_v38 }
 0x668   :  { %v3197_v30 = vpop.f32.mrb[16].mxu1 }
 0x669   :  { %v4403_v32 = vadd.f32 %v3197_v30, %v2719_v35  ;;  %v3199_v50 = vpop.f32.mrb[17].mxu1 }
 0x66a   :  { %v4404_v34 = vadd.f32 %v3199_v50, %v2723_v31 }
 0x66b   :  { %v3204_v40 = vmax.f32 %v4403_v32, 0.0 }
 0x66c   :  { %v3205_v3 = vmax.f32 %v4404_v34, 0.0 }
 0x66e   :  { %3893 = vmatprep.mubr.msk.f32.mxu1 %vm3232_vm9, %v3205_v3 }
 0x66f   :  { %3304 = vmatmul.mubr.f32.vlgmr.msra.gmra.mrb[18].mxu1 %v3204_v40 }
 0x742   :  { %v3305_v18 = vpop.f32.mrb[18].mxu1 }
 0x743   :  { %v3306_v44 = vadd.f32 %v3891_v19, %v3305_v18  ;;  %v3307_v48 = vpop.f32.mrb[19].mxu1 }
 0x745   :  { %v3310_v45 = vsel %vm3309_vm10, %v3306_v44, -inf }
 0x746   :  { %3311 = vmax.xlane.f32.xlu0 %v3310_v45 }
 0x7d3   :  { %v3312_v47 = vpop.xlane.xlu0 %3311 }
 0x7d4   :  { %v3313_v56 = vsub.f32 %v3306_v44, %v3312_v47 }
 0x7d6   :  { %v3314_v36 = vmul.f32 1.442695, %v3313_v56 }
 0x7d8   :  { %4672 = vpow2.f32 %v3314_v36 }
 0x7e2   :  { %v4673_v37 = vpop.eup %4672 }
 0x7e3   :  { %v3316_v57 = vsel %vm3309_vm10, %v4673_v37, 0.0 }
 0x7e4   :  { %3317 = vadd.xlane.f32.xlu1 %v3316_v57 }
 0x871   :  { %v3318_v51 = vpop.xlane.xlu1 %3317 }
 0x872   :  { %4674 = vlog2.f32 %v3318_v51 }
 0x87c   :  { %v4675_v53 = vpop.eup %4674 }
 0x87d   :  { %v3320_v2 = vmul.f32 0.6931472, %v4675_v53 }
 0x87f   :  { %v3321_v60 = vsub.f32 %v3313_v56, %v3320_v2 }
 0x881   :  { %3322 = vst.msk [vmem:[%s7173_s9] sm:$0xff] %vm3309_vm10, %v3321_v60 }

</bundles_post_ra>
